<compile_context>
chip_gen: v7x
topology: tpu7x:2x2x1
jax: 0.10.0
libtpu: 0.0.40
codegen_flags: <defaults>
</compile_context>

<pallas_src>
import functools

import jax
import jax.numpy as jnp
from jax.experimental import pallas as pl
from jax.experimental.pallas import tpu as pltpu

K1 = 7                 # spatial-attention conv kernel size
P1 = 3                 # its padding (kernel_size == 7 -> padding 3)
DILATIONS = (6, 12, 18)
PMAX = 18              # max padding / dilation used by the ASPP branches
RF = 8                 # row offset of the features inside fpad (>= P1, multiple of 8)
RY = 24                # row offset of y inside ypad (>= PMAX, multiple of 8)


def _round_up(n, m):
    return (n + m - 1) // m * m


def _tpu_params():
    """Generation-aware VMEM capacity / TensorCore count (safe fallbacks: v7x)."""
    vmem_cap = 64 << 20        # conservative (v7x); v5e/v6e have 128 MiB
    num_cores = 2              # conservative (v7x megacore); v5e/v6e have 1 TC
    try:
        info = pltpu.get_tpu_info()
        vmem_cap = int(getattr(info, "vmem_capacity_bytes", vmem_cap))
        for name in ("num_tensorcores", "tensorcore_count", "num_cores", "core_count"):
            v = getattr(info, name, None)
            if v:
                num_cores = int(v)
                break
    except Exception:
        pass
    return vmem_cap, num_cores


def _choose_tiles(batch, chan, hw, h, w, wp, hf, hy, in_itemsize, out_itemsize,
                  vmem_cap, num_cores):
    """Pick (bt, ct) so the whole per-step footprint (double-buffered input block +
    resident output + stats and conv scratch) stays well inside VMEM."""
    conv_scratch = (2 * hf * wp + hy * wp) * 4

    def usage(bt_, ct_):
        in_blk = bt_ * ct_ * hw * in_itemsize          # double-buffered by the pipeline
        out_blk = bt_ * h * w * out_itemsize
        stats = 2 * bt_ * hw * 4                       # running sum + max (f32)
        return 2 * in_blk + 2 * out_blk + stats + conv_scratch

    budget = int(vmem_cap * 0.6)

    # Channels per step: full C if it fits, else the largest divisor that is a
    # multiple of the packed sublane count (8 for f32, 16 for bf16, 32 for int8).
    sub = max(8, 32 // in_itemsize)
    ct = chan
    if usage(1, chan) > budget and chan > sub:
        cands = [d for d in range(sub, chan, sub) if chan % d == 0]
        fitting = [d for d in cands if usage(1, d) <= budget]
        if fitting:
            ct = max(fitting)
        elif cands:
            ct = min(cands)
        # Note: for very large H*W with tiny C an additional lane-dense H*W grid
        # axis would bound the block size; not needed at these shapes.

    # Images per step: as many as fit, but keep >= num_cores parallel b-steps so
    # every TensorCore gets work (constraint vanishes on single-TC chips).
    bt = 1
    for d in range(1, batch + 1):
        if batch % d != 0 or usage(d, ct) > budget:
            continue
        if batch >= num_cores and batch // d < num_cores:
            continue
        bt = d
    return bt, ct, usage(bt, ct)


def _shifted(slab, s, wp):
    """Element j of the result reads slab[:, j + s]; the zero lane-margin of the
    padded scratch makes the roll wrap-around equal to zero padding."""
    if s % wp == 0:
        return slab
    return pltpu.roll(slab, shift=(-s) % wp, axis=1)


# --------------------------------------------------------------------------
# Fused kernel: channel mean/max reduction + 7x7 conv + ASPP + residual + sigmoid.
# --------------------------------------------------------------------------
def _fused_kernel(x_ref, w1_ref, wa_ref, ba_ref, o_ref,
                  sum_ref, max_ref, fpad, ypad,
                  *, c_total, bt, h, w, wp):
    c = pl.program_id(1)
    last_c = pl.num_programs(1) - 1

    # ---- Stage 1: running channel sum / max, lane-dense over H*W. ----
    x = x_ref[...].astype(jnp.float32)                 # (bt, ct, HW)
    psum = jnp.sum(x, axis=1)                          # (bt, HW)
    pmax = jnp.max(x, axis=1)                          # (bt, HW)

    @pl.when(c == 0)
    def _init():
        sum_ref[...] = psum
        max_ref[...] = pmax

    @pl.when(c > 0)
    def _accum():
        sum_ref[...] = sum_ref[...] + psum
        max_ref[...] = jnp.maximum(max_ref[...], pmax)

    # ---- Stage 2 (final C step only): conv1 + ASPP + residual + sigmoid. ----
    @pl.when(c == last_c)
    def _conv():
        hf = fpad.shape[1]
        hy = ypad.shape[0]
        # Zero only the halo row bands and lane margins (8-aligned bands), once per
        # final step; the image regions are fully rewritten for every image below.
        fpad[:, :RF, :] = jnp.zeros((2, RF, wp), jnp.float32)
        fpad[:, RF + h:, :] = jnp.zeros((2, hf - RF - h, wp), jnp.float32)
        fpad[:, RF:RF + h, w:] = jnp.zeros((2, h, wp - w), jnp.float32)
        ypad[:RY, :] = jnp.zeros((RY, wp), jnp.float32)
        ypad[RY + h:, :] = jnp.zeros((hy - RY - h, wp), jnp.float32)
        ypad[RY:RY + h, w:] = jnp.zeros((h, wp - w), jnp.float32)

        inv_c = 1.0 / c_total
        b_sum = ba_ref[0] + ba_ref[1] + ba_ref[2]      # ASPP biases folded into one add

        for i in range(bt):                             # static unroll over images
            # Scatter the flat (H*W,) stats row-by-row into the padded 2-D scratch
            # (aligned 2-D layout for the convs without an in-kernel reshape).
            avg_flat = sum_ref[i] * inv_c               # (HW,)
            max_flat = max_ref[i]
            for r in range(h):
                fpad[0, RF + r, 0:w] = avg_flat[r * w:(r + 1) * w]
                fpad[1, RF + r, 0:w] = max_flat[r * w:(r + 1) * w]

            # conv1: Conv2d(2, 1, 7, padding=3, bias=False).
            # Accumulate per-kx partials on UNSHIFTED slabs; one roll per kx at the end.
            acc = [jnp.zeros((h, wp), jnp.float32) for _ in range(K1)]
            for ch in range(2):
                for ky in range(K1):
                    slab = fpad[ch, RF - P1 + ky:RF - P1 + ky + h, :]     # (h, wp)
                    for kx in range(K1):
                        acc[kx] = acc[kx] + w1_ref[(ch * K1 + ky) * K1 + kx] * slab
            y_full = acc[P1]
            for kx in range(K1):
                if kx != P1:
                    y_full = y_full + _shifted(acc[kx], kx - P1, wp)
            y = y_full[:, :w]                                             # (h, w)

            ypad[RY:RY + h, 0:w] = y

            # ASPP: three 3x3 convs with dilation == padding in {6, 12, 18}, summed.
            aspp = jnp.zeros((h, wp), jnp.float32)
            for di, d in enumerate(DILATIONS):
                a3 = [jnp.zeros((h, wp), jnp.float32) for _ in range(3)]
                for ky in range(3):
                    r0 = RY + (ky - 1) * d
                    slab = ypad[r0:r0 + h, :]                             # (h, wp)
                    for kx in range(3):
                        a3[kx] = a3[kx] + wa_ref[di * 9 + ky * 3 + kx] * slab
                aspp = aspp + a3[1]
                aspp = aspp + _shifted(a3[0], -d, wp)
                aspp = aspp + _shifted(a3[2], d, wp)

            out = jax.nn.sigmoid(y + aspp[:, :w] + b_sum)
            o_ref[i, 0] = out.astype(o_ref.dtype)


# --------------------------------------------------------------------------
# Wrapper
# --------------------------------------------------------------------------
def spatial_attention(x, w1_flat, wa_flat, ba):
    B, C, H, W = x.shape
    HW = H * W
    WP = _round_up(W + 2 * PMAX, 128)        # lane-dense padded scratch width
    HF = RF + H + 8                          # fpad rows (>= RF + H + P1)
    HY = RY + H + PMAX                       # ypad rows
    # roll-as-zero-pad validity: lane margin covers the largest shift, row halos
    # cover every tap row.
    assert WP >= W + PMAX and RF >= P1 and HF - RF - H >= P1
    assert RY >= PMAX and HY - RY - H >= PMAX

    vmem_cap, num_cores = _tpu_params()
    bt, ct, vmem_use = _choose_tiles(B, C, HW, H, W, WP, HF, HY,
                                     x.dtype.itemsize, x.dtype.itemsize,
                                     vmem_cap, num_cores)
    vmem_limit = int(min(vmem_cap * 0.85, max(32 << 20, 2 * vmem_use + (8 << 20))))

    xr = x.reshape(B, C, HW)                 # lane-dense view for the reduction
    out = pl.pallas_call(
        functools.partial(_fused_kernel, c_total=C, bt=bt, h=H, w=W, wp=WP),
        out_shape=jax.ShapeDtypeStruct((B, 1, H, W), x.dtype),
        grid=(B // bt, C // ct),
        in_specs=[
            pl.BlockSpec((bt, ct, HW), lambda b, c: (b, c, 0)),
            pl.BlockSpec(memory_space=pltpu.MemorySpace.SMEM),
            pl.BlockSpec(memory_space=pltpu.MemorySpace.SMEM),
            pl.BlockSpec(memory_space=pltpu.MemorySpace.SMEM),
        ],
        out_specs=pl.BlockSpec((bt, 1, H, W), lambda b, c: (b, 0, 0, 0)),
        scratch_shapes=[
            pltpu.VMEM((bt, HW), jnp.float32),       # running channel sum
            pltpu.VMEM((bt, HW), jnp.float32),       # running channel max
            pltpu.VMEM((2, HF, WP), jnp.float32),    # zero-margined avg / max planes
            pltpu.VMEM((HY, WP), jnp.float32),       # zero-margined y for ASPP taps
        ],
        compiler_params=pltpu.CompilerParams(
            dimension_semantics=("parallel", "arbitrary"),
            vmem_limit_bytes=vmem_limit),
    )(xr, w1_flat, wa_flat, ba)
    return out


def reference(x, w1_flat, wa_flat, ba):
    """Pure-JAX reference matching the PyTorch forward semantics."""
    dn = ("NCHW", "OIHW", "NCHW")
    prec = jax.lax.Precision.HIGHEST
    avg = jnp.mean(x, axis=1, keepdims=True)
    mx = jnp.max(x, axis=1, keepdims=True)
    f = jnp.concatenate([avg, mx], axis=1)
    w1 = w1_flat.reshape(1, 2, K1, K1)
    y = jax.lax.conv_general_dilated(f, w1, (1, 1), ((P1, P1), (P1, P1)),
                                     dimension_numbers=dn, precision=prec)
    wa = wa_flat.reshape(3, 1, 1, 3, 3)
    aspp = jnp.zeros_like(y)
    for i, d in enumerate(DILATIONS):
        c = jax.lax.conv_general_dilated(y, wa[i], (1, 1), ((d, d), (d, d)),
                                         rhs_dilation=(d, d),
                                         dimension_numbers=dn, precision=prec)
        aspp = aspp + c + ba[i]
    return jax.nn.sigmoid(y + aspp)


if __name__ == "__main__":
    key = jax.random.PRNGKey(0)
    k1, k2, k3, kx = jax.random.split(key, 4)

    # Deterministic synthetic parameters (shapes from the module's __init__).
    w1 = (0.1 * jax.random.normal(k1, (1, 2, K1, K1), jnp.float32)).reshape(-1)
    wa = (0.1 * jax.random.normal(k2, (3, 1, 1, 3, 3), jnp.float32)).reshape(-1)
    ba = 0.1 * jax.random.normal(k3, (3,), jnp.float32)
    # NOTE: ASPP.conv_1x1_output exists in __init__ but is unused in forward();
    # it is intentionally omitted here.

    x = jax.random.normal(kx, (2, 4, 16, 16), jnp.float32)

    out = jax.block_until_ready(spatial_attention(x, w1, wa, ba))
    ref = jax.block_until_ready(reference(x, w1, wa, ba))

    assert out.shape == (2, 1, 16, 16)
    assert jnp.max(jnp.abs(out - ref)) < 1e-4

    print("KERNEL_OK")
</pallas_src>

<mosaic_0001>
module attributes {stable_mosaic.version = 11 : i64} {
  func.func @_fused_kernel(%arg0: i32, %arg1: i32, %arg2: memref<1x4x256xf32, #tpu.memory_space<vmem>>, %arg3: memref<98xf32, #tpu.memory_space<smem>>, %arg4: memref<27xf32, #tpu.memory_space<smem>>, %arg5: memref<3xf32, #tpu.memory_space<smem>>, %arg6: memref<1x1x16x16xf32, #tpu.memory_space<vmem>>, %arg7: memref<1x256xf32, #tpu.memory_space<vmem>>, %arg8: memref<1x256xf32, #tpu.memory_space<vmem>>, %arg9: memref<2x32x128xf32, #tpu.memory_space<vmem>>, %arg10: memref<58x128xf32, #tpu.memory_space<vmem>>) attributes {dimension_semantics = [#tpu.dimension_semantics<parallel>, #tpu.dimension_semantics<arbitrary>], iteration_bounds = array<i64: 2, 1>, scalar_prefetch = 0 : i64, scratch_operands = 4 : i64, tpu.core_type = #tpu.core_type<tc>, window_params = [{transform_indices = @transform_0, window_bounds = array<i64: 1, 4, 256>}, {transform_indices = @transform_1, window_bounds = array<i64: 98>}, {transform_indices = @transform_2, window_bounds = array<i64: 27>}, {transform_indices = @transform_3, window_bounds = array<i64: 3>}, {transform_indices = @transform_4, window_bounds = array<i64: 1, 1, 16, 16>}]} {
    %c0 = arith.constant 0 : index
    %c0_0 = arith.constant 0 : index
    %c0_1 = arith.constant 0 : index
    %0 = vector.load %arg2[%c0, %c0_0, %c0_1] : memref<1x4x256xf32, #tpu.memory_space<vmem>>, vector<1x4x256xf32>
    %cst = arith.constant dense<0.000000e+00> : vector<1x256xf32>
    %1 = vector.multi_reduction <add>, %0, %cst [1] : vector<1x4x256xf32> to vector<1x256xf32>
    %cst_2 = arith.constant dense<0xFF800000> : vector<1x256xf32>
    %2 = vector.multi_reduction <maximumf>, %0, %cst_2 [1] : vector<1x4x256xf32> to vector<1x256xf32>
    %c0_i32 = arith.constant 0 : i32
    %3 = arith.cmpi eq, %arg1, %c0_i32 : i32
    %4 = arith.extui %3 : i1 to i32
    %c0_i32_3 = arith.constant 0 : i32
    %5 = arith.cmpi ne, %4, %c0_i32_3 : i32
    scf.if %5 {
      %c0_8 = arith.constant 0 : index
      %c0_9 = arith.constant 0 : index
      %12 = vector.load %arg7[%c0_8, %c0_9] : memref<1x256xf32, #tpu.memory_space<vmem>>, vector<1x256xf32>
      tpu.vector_store %arg7[%c0_8, %c0_9], %1 {strides = array<i32>} : memref<1x256xf32, #tpu.memory_space<vmem>>, vector<1x256xf32>,
      %c0_10 = arith.constant 0 : index
      %c0_11 = arith.constant 0 : index
      %13 = vector.load %arg8[%c0_10, %c0_11] : memref<1x256xf32, #tpu.memory_space<vmem>>, vector<1x256xf32>
      tpu.vector_store %arg8[%c0_10, %c0_11], %2 {strides = array<i32>} : memref<1x256xf32, #tpu.memory_space<vmem>>, vector<1x256xf32>,
    } else {
    }
    %c0_i32_4 = arith.constant 0 : i32
    %6 = arith.cmpi sgt, %arg1, %c0_i32_4 : i32
    %7 = arith.extui %6 : i1 to i32
    %c0_i32_5 = arith.constant 0 : i32
    %8 = arith.cmpi ne, %7, %c0_i32_5 : i32
    scf.if %8 {
      %c0_8 = arith.constant 0 : index
      %c0_9 = arith.constant 0 : index
      %12 = vector.load %arg7[%c0_8, %c0_9] : memref<1x256xf32, #tpu.memory_space<vmem>>, vector<1x256xf32>
      %13 = arith.addf %12, %1 : vector<1x256xf32>
      %c0_10 = arith.constant 0 : index
      %c0_11 = arith.constant 0 : index
      %14 = vector.load %arg7[%c0_10, %c0_11] : memref<1x256xf32, #tpu.memory_space<vmem>>, vector<1x256xf32>
      tpu.vector_store %arg7[%c0_10, %c0_11], %13 {strides = array<i32>} : memref<1x256xf32, #tpu.memory_space<vmem>>, vector<1x256xf32>,
      %c0_12 = arith.constant 0 : index
      %c0_13 = arith.constant 0 : index
      %15 = vector.load %arg8[%c0_12, %c0_13] : memref<1x256xf32, #tpu.memory_space<vmem>>, vector<1x256xf32>
      %16 = arith.maximumf %15, %2 : vector<1x256xf32>
      %c0_14 = arith.constant 0 : index
      %c0_15 = arith.constant 0 : index
      %17 = vector.load %arg8[%c0_14, %c0_15] : memref<1x256xf32, #tpu.memory_space<vmem>>, vector<1x256xf32>
      tpu.vector_store %arg8[%c0_14, %c0_15], %16 {strides = array<i32>} : memref<1x256xf32, #tpu.memory_space<vmem>>, vector<1x256xf32>,
    } else {
    }
    %c0_i32_6 = arith.constant 0 : i32
    %9 = arith.cmpi eq, %arg1, %c0_i32_6 : i32
    %10 = arith.extui %9 : i1 to i32
    %c0_i32_7 = arith.constant 0 : i32
    %11 = arith.cmpi ne, %10, %c0_i32_7 : i32
    scf.if %11 {
      %cst_8 = arith.constant 0.000000e+00 : f32
      %12 = vector.broadcast %cst_8 : f32 to vector<2x8x128xf32>
      %c0_9 = arith.constant 0 : index
      %c0_10 = arith.constant 0 : index
      %c0_11 = arith.constant 0 : index
      %13 = vector.load %arg9[%c0_9, %c0_10, %c0_11] : memref<2x32x128xf32, #tpu.memory_space<vmem>>, vector<2x8x128xf32>
      tpu.vector_store %arg9[%c0_9, %c0_10, %c0_11], %12 {strides = array<i32>} : memref<2x32x128xf32, #tpu.memory_space<vmem>>, vector<2x8x128xf32>,
      %cst_12 = arith.constant 0.000000e+00 : f32
      %14 = vector.broadcast %cst_12 : f32 to vector<2x8x128xf32>
      %c0_13 = arith.constant 0 : index
      %c24 = arith.constant 24 : index
      %c0_14 = arith.constant 0 : index
      %15 = vector.load %arg9[%c0_13, %c24, %c0_14] : memref<2x32x128xf32, #tpu.memory_space<vmem>>, vector<2x8x128xf32>
      tpu.vector_store %arg9[%c0_13, %c24, %c0_14], %14 {strides = array<i32>} : memref<2x32x128xf32, #tpu.memory_space<vmem>>, vector<2x8x128xf32>,
      %cst_15 = arith.constant 0.000000e+00 : f32
      %16 = vector.broadcast %cst_15 : f32 to vector<2x16x112xf32>
      %c0_16 = arith.constant 0 : index
      %c8 = arith.constant 8 : index
      %c16 = arith.constant 16 : index
      %17 = vector.load %arg9[%c0_16, %c8, %c16] : memref<2x32x128xf32, #tpu.memory_space<vmem>>, vector<2x16x112xf32>
      tpu.vector_store %arg9[%c0_16, %c8, %c16], %16 {strides = array<i32>} : memref<2x32x128xf32, #tpu.memory_space<vmem>>, vector<2x16x112xf32>,
      %cst_17 = arith.constant 0.000000e+00 : f32
      %18 = vector.broadcast %cst_17 : f32 to vector<24x128xf32>
      %c0_18 = arith.constant 0 : index
      %c0_19 = arith.constant 0 : index
      %19 = vector.load %arg10[%c0_18, %c0_19] : memref<58x128xf32, #tpu.memory_space<vmem>>, vector<24x128xf32>
      tpu.vector_store %arg10[%c0_18, %c0_19], %18 {strides = array<i32>} : memref<58x128xf32, #tpu.memory_space<vmem>>, vector<24x128xf32>,
      %cst_20 = arith.constant 0.000000e+00 : f32
      %20 = vector.broadcast %cst_20 : f32 to vector<18x128xf32>
      %c40 = arith.constant 40 : index
      %c0_21 = arith.constant 0 : index
      %21 = vector.load %arg10[%c40, %c0_21] : memref<58x128xf32, #tpu.memory_space<vmem>>, vector<18x128xf32>
      tpu.vector_store %arg10[%c40, %c0_21], %20 {strides = array<i32>} : memref<58x128xf32, #tpu.memory_space<vmem>>, vector<18x128xf32>,
      %cst_22 = arith.constant 0.000000e+00 : f32
      %22 = vector.broadcast %cst_22 : f32 to vector<16x112xf32>
      %c24_23 = arith.constant 24 : index
      %c16_24 = arith.constant 16 : index
      %23 = vector.load %arg10[%c24_23, %c16_24] : memref<58x128xf32, #tpu.memory_space<vmem>>, vector<16x112xf32>
      tpu.vector_store %arg10[%c24_23, %c16_24], %22 {strides = array<i32>} : memref<58x128xf32, #tpu.memory_space<vmem>>, vector<16x112xf32>,
      %c0_25 = arith.constant 0 : index
      %24 = memref.load %arg5[%c0_25] : memref<3xf32, #tpu.memory_space<smem>>
      %c1 = arith.constant 1 : index
      %25 = memref.load %arg5[%c1] : memref<3xf32, #tpu.memory_space<smem>>
      %26 = arith.addf %24, %25 : f32
      %c2 = arith.constant 2 : index
      %27 = memref.load %arg5[%c2] : memref<3xf32, #tpu.memory_space<smem>>
      %28 = arith.addf %26, %27 : f32
      %c0_26 = arith.constant 0 : index
      %c0_27 = arith.constant 0 : index
      %29 = vector.load %arg7[%c0_26, %c0_27] : memref<1x256xf32, #tpu.memory_space<vmem>>, vector<1x256xf32>
      %30 = vector.shape_cast %29 : vector<1x256xf32> to vector<256xf32>
      %cst_28 = arith.constant 2.500000e-01 : f32
      %31 = vector.broadcast %cst_28 : f32 to vector<256xf32>
      %32 = arith.mulf %30, %31 : vector<256xf32>
      %c0_29 = arith.constant 0 : index
      %c0_30 = arith.constant 0 : index
      %33 = vector.load %arg8[%c0_29, %c0_30] : memref<1x256xf32, #tpu.memory_space<vmem>>, vector<1x256xf32>
      %34 = vector.shape_cast %33 : vector<1x256xf32> to vector<256xf32>
      %35 = vector.extract_strided_slice %32 {offsets = [0], sizes = [16], strides = [1]} : vector<256xf32> to vector<16xf32>
      %c0_31 = arith.constant 0 : index
      %c8_32 = arith.constant 8 : index
      %c0_33 = arith.constant 0 : index
      %36 = vector.load %arg9[%c0_31, %c8_32, %c0_33] : memref<2x32x128xf32, #tpu.memory_space<vmem>>, vector<1x1x16xf32>
      %37 = vector.shape_cast %36 : vector<1x1x16xf32> to vector<16xf32>
      %38 = vector.shape_cast %35 : vector<16xf32> to vector<1x1x16xf32>
      tpu.vector_store %arg9[%c0_31, %c8_32, %c0_33], %38 {strides = array<i32>} : memref<2x32x128xf32, #tpu.memory_space<vmem>>, vector<1x1x16xf32>,
      %39 = vector.extract_strided_slice %34 {offsets = [0], sizes = [16], strides = [1]} : vector<256xf32> to vector<16xf32>
      %c1_34 = arith.constant 1 : index
      %c8_35 = arith.constant 8 : index
      %c0_36 = arith.constant 0 : index
      %40 = vector.load %arg9[%c1_34, %c8_35, %c0_36] : memref<2x32x128xf32, #tpu.memory_space<vmem>>, vector<1x1x16xf32>
      %41 = vector.shape_cast %40 : vector<1x1x16xf32> to vector<16xf32>
      %42 = vector.shape_cast %39 : vector<16xf32> to vector<1x1x16xf32>
      tpu.vector_store %arg9[%c1_34, %c8_35, %c0_36], %42 {strides = array<i32>} : memref<2x32x128xf32, #tpu.memory_space<vmem>>, vector<1x1x16xf32>,
      %43 = vector.extract_strided_slice %32 {offsets = [16], sizes = [16], strides = [1]} : vector<256xf32> to vector<16xf32>
      %c0_37 = arith.constant 0 : index
      %c9 = arith.constant 9 : index
      %c0_38 = arith.constant 0 : index
      %44 = vector.load %arg9[%c0_37, %c9, %c0_38] : memref<2x32x128xf32, #tpu.memory_space<vmem>>, vector<1x1x16xf32>
      %45 = vector.shape_cast %44 : vector<1x1x16xf32> to vector<16xf32>
      %46 = vector.shape_cast %43 : vector<16xf32> to vector<1x1x16xf32>
      tpu.vector_store %arg9[%c0_37, %c9, %c0_38], %46 {strides = array<i32>} : memref<2x32x128xf32, #tpu.memory_space<vmem>>, vector<1x1x16xf32>,
      %47 = vector.extract_strided_slice %34 {offsets = [16], sizes = [16], strides = [1]} : vector<256xf32> to vector<16xf32>
      %c1_39 = arith.constant 1 : index
      %c9_40 = arith.constant 9 : index
      %c0_41 = arith.constant 0 : index
      %48 = vector.load %arg9[%c1_39, %c9_40, %c0_41] : memref<2x32x128xf32, #tpu.memory_space<vmem>>, vector<1x1x16xf32>
      %49 = vector.shape_cast %48 : vector<1x1x16xf32> to vector<16xf32>
      %50 = vector.shape_cast %47 : vector<16xf32> to vector<1x1x16xf32>
      tpu.vector_store %arg9[%c1_39, %c9_40, %c0_41], %50 {strides = array<i32>} : memref<2x32x128xf32, #tpu.memory_space<vmem>>, vector<1x1x16xf32>,
      %51 = vector.extract_strided_slice %32 {offsets = [32], sizes = [16], strides = [1]} : vector<256xf32> to vector<16xf32>
      %c0_42 = arith.constant 0 : index
      %c10 = arith.constant 10 : index
      %c0_43 = arith.constant 0 : index
      %52 = vector.load %arg9[%c0_42, %c10, %c0_43] : memref<2x32x128xf32, #tpu.memory_space<vmem>>, vector<1x1x16xf32>
      %53 = vector.shape_cast %52 : vector<1x1x16xf32> to vector<16xf32>
      %54 = vector.shape_cast %51 : vector<16xf32> to vector<1x1x16xf32>
      tpu.vector_store %arg9[%c0_42, %c10, %c0_43], %54 {strides = array<i32>} : memref<2x32x128xf32, #tpu.memory_space<vmem>>, vector<1x1x16xf32>,
      %55 = vector.extract_strided_slice %34 {offsets = [32], sizes = [16], strides = [1]} : vector<256xf32> to vector<16xf32>
      %c1_44 = arith.constant 1 : index
      %c10_45 = arith.constant 10 : index
      %c0_46 = arith.constant 0 : index
      %56 = vector.load %arg9[%c1_44, %c10_45, %c0_46] : memref<2x32x128xf32, #tpu.memory_space<vmem>>, vector<1x1x16xf32>
      %57 = vector.shape_cast %56 : vector<1x1x16xf32> to vector<16xf32>
      %58 = vector.shape_cast %55 : vector<16xf32> to vector<1x1x16xf32>
      tpu.vector_store %arg9[%c1_44, %c10_45, %c0_46], %58 {strides = array<i32>} : memref<2x32x128xf32, #tpu.memory_space<vmem>>, vector<1x1x16xf32>,
      %59 = vector.extract_strided_slice %32 {offsets = [48], sizes = [16], strides = [1]} : vector<256xf32> to vector<16xf32>
      %c0_47 = arith.constant 0 : index
      %c11 = arith.constant 11 : index
      %c0_48 = arith.constant 0 : index
      %60 = vector.load %arg9[%c0_47, %c11, %c0_48] : memref<2x32x128xf32, #tpu.memory_space<vmem>>, vector<1x1x16xf32>
      %61 = vector.shape_cast %60 : vector<1x1x16xf32> to vector<16xf32>
      %62 = vector.shape_cast %59 : vector<16xf32> to vector<1x1x16xf32>
      tpu.vector_store %arg9[%c0_47, %c11, %c0_48], %62 {strides = array<i32>} : memref<2x32x128xf32, #tpu.memory_space<vmem>>, vector<1x1x16xf32>,
      %63 = vector.extract_strided_slice %34 {offsets = [48], sizes = [16], strides = [1]} : vector<256xf32> to vector<16xf32>
      %c1_49 = arith.constant 1 : index
      %c11_50 = arith.constant 11 : index
      %c0_51 = arith.constant 0 : index
      %64 = vector.load %arg9[%c1_49, %c11_50, %c0_51] : memref<2x32x128xf32, #tpu.memory_space<vmem>>, vector<1x1x16xf32>
      %65 = vector.shape_cast %64 : vector<1x1x16xf32> to vector<16xf32>
      %66 = vector.shape_cast %63 : vector<16xf32> to vector<1x1x16xf32>
      tpu.vector_store %arg9[%c1_49, %c11_50, %c0_51], %66 {strides = array<i32>} : memref<2x32x128xf32, #tpu.memory_space<vmem>>, vector<1x1x16xf32>,
      %67 = vector.extract_strided_slice %32 {offsets = [64], sizes = [16], strides = [1]} : vector<256xf32> to vector<16xf32>
      %c0_52 = arith.constant 0 : index
      %c12 = arith.constant 12 : index
      %c0_53 = arith.constant 0 : index
      %68 = vector.load %arg9[%c0_52, %c12, %c0_53] : memref<2x32x128xf32, #tpu.memory_space<vmem>>, vector<1x1x16xf32>
      %69 = vector.shape_cast %68 : vector<1x1x16xf32> to vector<16xf32>
      %70 = vector.shape_cast %67 : vector<16xf32> to vector<1x1x16xf32>
      tpu.vector_store %arg9[%c0_52, %c12, %c0_53], %70 {strides = array<i32>} : memref<2x32x128xf32, #tpu.memory_space<vmem>>, vector<1x1x16xf32>,
      %71 = vector.extract_strided_slice %34 {offsets = [64], sizes = [16], strides = [1]} : vector<256xf32> to vector<16xf32>
      %c1_54 = arith.constant 1 : index
      %c12_55 = arith.constant 12 : index
      %c0_56 = arith.constant 0 : index
      %72 = vector.load %arg9[%c1_54, %c12_55, %c0_56] : memref<2x32x128xf32, #tpu.memory_space<vmem>>, vector<1x1x16xf32>
      %73 = vector.shape_cast %72 : vector<1x1x16xf32> to vector<16xf32>
      %74 = vector.shape_cast %71 : vector<16xf32> to vector<1x1x16xf32>
      tpu.vector_store %arg9[%c1_54, %c12_55, %c0_56], %74 {strides = array<i32>} : memref<2x32x128xf32, #tpu.memory_space<vmem>>, vector<1x1x16xf32>,
      %75 = vector.extract_strided_slice %32 {offsets = [80], sizes = [16], strides = [1]} : vector<256xf32> to vector<16xf32>
      %c0_57 = arith.constant 0 : index
      %c13 = arith.constant 13 : index
      %c0_58 = arith.constant 0 : index
      %76 = vector.load %arg9[%c0_57, %c13, %c0_58] : memref<2x32x128xf32, #tpu.memory_space<vmem>>, vector<1x1x16xf32>
      %77 = vector.shape_cast %76 : vector<1x1x16xf32> to vector<16xf32>
      %78 = vector.shape_cast %75 : vector<16xf32> to vector<1x1x16xf32>
      tpu.vector_store %arg9[%c0_57, %c13, %c0_58], %78 {strides = array<i32>} : memref<2x32x128xf32, #tpu.memory_space<vmem>>, vector<1x1x16xf32>,
      %79 = vector.extract_strided_slice %34 {offsets = [80], sizes = [16], strides = [1]} : vector<256xf32> to vector<16xf32>
      %c1_59 = arith.constant 1 : index
      %c13_60 = arith.constant 13 : index
      %c0_61 = arith.constant 0 : index
      %80 = vector.load %arg9[%c1_59, %c13_60, %c0_61] : memref<2x32x128xf32, #tpu.memory_space<vmem>>, vector<1x1x16xf32>
      %81 = vector.shape_cast %80 : vector<1x1x16xf32> to vector<16xf32>
      %82 = vector.shape_cast %79 : vector<16xf32> to vector<1x1x16xf32>
      tpu.vector_store %arg9[%c1_59, %c13_60, %c0_61], %82 {strides = array<i32>} : memref<2x32x128xf32, #tpu.memory_space<vmem>>, vector<1x1x16xf32>,
      %83 = vector.extract_strided_slice %32 {offsets = [96], sizes = [16], strides = [1]} : vector<256xf32> to vector<16xf32>
      %c0_62 = arith.constant 0 : index
      %c14 = arith.constant 14 : index
      %c0_63 = arith.constant 0 : index
      %84 = vector.load %arg9[%c0_62, %c14, %c0_63] : memref<2x32x128xf32, #tpu.memory_space<vmem>>, vector<1x1x16xf32>
      %85 = vector.shape_cast %84 : vector<1x1x16xf32> to vector<16xf32>
      %86 = vector.shape_cast %83 : vector<16xf32> to vector<1x1x16xf32>
      tpu.vector_store %arg9[%c0_62, %c14, %c0_63], %86 {strides = array<i32>} : memref<2x32x128xf32, #tpu.memory_space<vmem>>, vector<1x1x16xf32>,
      %87 = vector.extract_strided_slice %34 {offsets = [96], sizes = [16], strides = [1]} : vector<256xf32> to vector<16xf32>
      %c1_64 = arith.constant 1 : index
      %c14_65 = arith.constant 14 : index
      %c0_66 = arith.constant 0 : index
      %88 = vector.load %arg9[%c1_64, %c14_65, %c0_66] : memref<2x32x128xf32, #tpu.memory_space<vmem>>, vector<1x1x16xf32>
      %89 = vector.shape_cast %88 : vector<1x1x16xf32> to vector<16xf32>
      %90 = vector.shape_cast %87 : vector<16xf32> to vector<1x1x16xf32>
      tpu.vector_store %arg9[%c1_64, %c14_65, %c0_66], %90 {strides = array<i32>} : memref<2x32x128xf32, #tpu.memory_space<vmem>>, vector<1x1x16xf32>,
      %91 = vector.extract_strided_slice %32 {offsets = [112], sizes = [16], strides = [1]} : vector<256xf32> to vector<16xf32>
      %c0_67 = arith.constant 0 : index
      %c15 = arith.constant 15 : index
      %c0_68 = arith.constant 0 : index
      %92 = vector.load %arg9[%c0_67, %c15, %c0_68] : memref<2x32x128xf32, #tpu.memory_space<vmem>>, vector<1x1x16xf32>
      %93 = vector.shape_cast %92 : vector<1x1x16xf32> to vector<16xf32>
      %94 = vector.shape_cast %91 : vector<16xf32> to vector<1x1x16xf32>
      tpu.vector_store %arg9[%c0_67, %c15, %c0_68], %94 {strides = array<i32>} : memref<2x32x128xf32, #tpu.memory_space<vmem>>, vector<1x1x16xf32>,
      %95 = vector.extract_strided_slice %34 {offsets = [112], sizes = [16], strides = [1]} : vector<256xf32> to vector<16xf32>
      %c1_69 = arith.constant 1 : index
      %c15_70 = arith.constant 15 : index
      %c0_71 = arith.constant 0 : index
      %96 = vector.load %arg9[%c1_69, %c15_70, %c0_71] : memref<2x32x128xf32, #tpu.memory_space<vmem>>, vector<1x1x16xf32>
      %97 = vector.shape_cast %96 : vector<1x1x16xf32> to vector<16xf32>
      %98 = vector.shape_cast %95 : vector<16xf32> to vector<1x1x16xf32>
      tpu.vector_store %arg9[%c1_69, %c15_70, %c0_71], %98 {strides = array<i32>} : memref<2x32x128xf32, #tpu.memory_space<vmem>>, vector<1x1x16xf32>,
      %99 = vector.extract_strided_slice %32 {offsets = [128], sizes = [16], strides = [1]} : vector<256xf32> to vector<16xf32>
      %c0_72 = arith.constant 0 : index
      %c16_73 = arith.constant 16 : index
      %c0_74 = arith.constant 0 : index
      %100 = vector.load %arg9[%c0_72, %c16_73, %c0_74] : memref<2x32x128xf32, #tpu.memory_space<vmem>>, vector<1x1x16xf32>
      %101 = vector.shape_cast %100 : vector<1x1x16xf32> to vector<16xf32>
      %102 = vector.shape_cast %99 : vector<16xf32> to vector<1x1x16xf32>
      tpu.vector_store %arg9[%c0_72, %c16_73, %c0_74], %102 {strides = array<i32>} : memref<2x32x128xf32, #tpu.memory_space<vmem>>, vector<1x1x16xf32>,
      %103 = vector.extract_strided_slice %34 {offsets = [128], sizes = [16], strides = [1]} : vector<256xf32> to vector<16xf32>
      %c1_75 = arith.constant 1 : index
      %c16_76 = arith.constant 16 : index
      %c0_77 = arith.constant 0 : index
      %104 = vector.load %arg9[%c1_75, %c16_76, %c0_77] : memref<2x32x128xf32, #tpu.memory_space<vmem>>, vector<1x1x16xf32>
      %105 = vector.shape_cast %104 : vector<1x1x16xf32> to vector<16xf32>
      %106 = vector.shape_cast %103 : vector<16xf32> to vector<1x1x16xf32>
      tpu.vector_store %arg9[%c1_75, %c16_76, %c0_77], %106 {strides = array<i32>} : memref<2x32x128xf32, #tpu.memory_space<vmem>>, vector<1x1x16xf32>,
      %107 = vector.extract_strided_slice %32 {offsets = [144], sizes = [16], strides = [1]} : vector<256xf32> to vector<16xf32>
      %c0_78 = arith.constant 0 : index
      %c17 = arith.constant 17 : index
      %c0_79 = arith.constant 0 : index
      %108 = vector.load %arg9[%c0_78, %c17, %c0_79] : memref<2x32x128xf32, #tpu.memory_space<vmem>>, vector<1x1x16xf32>
      %109 = vector.shape_cast %108 : vector<1x1x16xf32> to vector<16xf32>
      %110 = vector.shape_cast %107 : vector<16xf32> to vector<1x1x16xf32>
      tpu.vector_store %arg9[%c0_78, %c17, %c0_79], %110 {strides = array<i32>} : memref<2x32x128xf32, #tpu.memory_space<vmem>>, vector<1x1x16xf32>,
      %111 = vector.extract_strided_slice %34 {offsets = [144], sizes = [16], strides = [1]} : vector<256xf32> to vector<16xf32>
      %c1_80 = arith.constant 1 : index
      %c17_81 = arith.constant 17 : index
      %c0_82 = arith.constant 0 : index
      %112 = vector.load %arg9[%c1_80, %c17_81, %c0_82] : memref<2x32x128xf32, #tpu.memory_space<vmem>>, vector<1x1x16xf32>
      %113 = vector.shape_cast %112 : vector<1x1x16xf32> to vector<16xf32>
      %114 = vector.shape_cast %111 : vector<16xf32> to vector<1x1x16xf32>
      tpu.vector_store %arg9[%c1_80, %c17_81, %c0_82], %114 {strides = array<i32>} : memref<2x32x128xf32, #tpu.memory_space<vmem>>, vector<1x1x16xf32>,
      %115 = vector.extract_strided_slice %32 {offsets = [160], sizes = [16], strides = [1]} : vector<256xf32> to vector<16xf32>
      %c0_83 = arith.constant 0 : index
      %c18 = arith.constant 18 : index
      %c0_84 = arith.constant 0 : index
      %116 = vector.load %arg9[%c0_83, %c18, %c0_84] : memref<2x32x128xf32, #tpu.memory_space<vmem>>, vector<1x1x16xf32>
      %117 = vector.shape_cast %116 : vector<1x1x16xf32> to vector<16xf32>
      %118 = vector.shape_cast %115 : vector<16xf32> to vector<1x1x16xf32>
      tpu.vector_store %arg9[%c0_83, %c18, %c0_84], %118 {strides = array<i32>} : memref<2x32x128xf32, #tpu.memory_space<vmem>>, vector<1x1x16xf32>,
      %119 = vector.extract_strided_slice %34 {offsets = [160], sizes = [16], strides = [1]} : vector<256xf32> to vector<16xf32>
      %c1_85 = arith.constant 1 : index
      %c18_86 = arith.constant 18 : index
      %c0_87 = arith.constant 0 : index
      %120 = vector.load %arg9[%c1_85, %c18_86, %c0_87] : memref<2x32x128xf32, #tpu.memory_space<vmem>>, vector<1x1x16xf32>
      %121 = vector.shape_cast %120 : vector<1x1x16xf32> to vector<16xf32>
      %122 = vector.shape_cast %119 : vector<16xf32> to vector<1x1x16xf32>
      tpu.vector_store %arg9[%c1_85, %c18_86, %c0_87], %122 {strides = array<i32>} : memref<2x32x128xf32, #tpu.memory_space<vmem>>, vector<1x1x16xf32>,
      %123 = vector.extract_strided_slice %32 {offsets = [176], sizes = [16], strides = [1]} : vector<256xf32> to vector<16xf32>
      %c0_88 = arith.constant 0 : index
      %c19 = arith.constant 19 : index
      %c0_89 = arith.constant 0 : index
      %124 = vector.load %arg9[%c0_88, %c19, %c0_89] : memref<2x32x128xf32, #tpu.memory_space<vmem>>, vector<1x1x16xf32>
      %125 = vector.shape_cast %124 : vector<1x1x16xf32> to vector<16xf32>
      %126 = vector.shape_cast %123 : vector<16xf32> to vector<1x1x16xf32>
      tpu.vector_store %arg9[%c0_88, %c19, %c0_89], %126 {strides = array<i32>} : memref<2x32x128xf32, #tpu.memory_space<vmem>>, vector<1x1x16xf32>,
      %127 = vector.extract_strided_slice %34 {offsets = [176], sizes = [16], strides = [1]} : vector<256xf32> to vector<16xf32>
      %c1_90 = arith.constant 1 : index
      %c19_91 = arith.constant 19 : index
      %c0_92 = arith.constant 0 : index
      %128 = vector.load %arg9[%c1_90, %c19_91, %c0_92] : memref<2x32x128xf32, #tpu.memory_space<vmem>>, vector<1x1x16xf32>
      %129 = vector.shape_cast %128 : vector<1x1x16xf32> to vector<16xf32>
      %130 = vector.shape_cast %127 : vector<16xf32> to vector<1x1x16xf32>
      tpu.vector_store %arg9[%c1_90, %c19_91, %c0_92], %130 {strides = array<i32>} : memref<2x32x128xf32, #tpu.memory_space<vmem>>, vector<1x1x16xf32>,
      %131 = vector.extract_strided_slice %32 {offsets = [192], sizes = [16], strides = [1]} : vector<256xf32> to vector<16xf32>
      %c0_93 = arith.constant 0 : index
      %c20 = arith.constant 20 : index
      %c0_94 = arith.constant 0 : index
      %132 = vector.load %arg9[%c0_93, %c20, %c0_94] : memref<2x32x128xf32, #tpu.memory_space<vmem>>, vector<1x1x16xf32>
      %133 = vector.shape_cast %132 : vector<1x1x16xf32> to vector<16xf32>
      %134 = vector.shape_cast %131 : vector<16xf32> to vector<1x1x16xf32>
      tpu.vector_store %arg9[%c0_93, %c20, %c0_94], %134 {strides = array<i32>} : memref<2x32x128xf32, #tpu.memory_space<vmem>>, vector<1x1x16xf32>,
      %135 = vector.extract_strided_slice %34 {offsets = [192], sizes = [16], strides = [1]} : vector<256xf32> to vector<16xf32>
      %c1_95 = arith.constant 1 : index
      %c20_96 = arith.constant 20 : index
      %c0_97 = arith.constant 0 : index
      %136 = vector.load %arg9[%c1_95, %c20_96, %c0_97] : memref<2x32x128xf32, #tpu.memory_space<vmem>>, vector<1x1x16xf32>
      %137 = vector.shape_cast %136 : vector<1x1x16xf32> to vector<16xf32>
      %138 = vector.shape_cast %135 : vector<16xf32> to vector<1x1x16xf32>
      tpu.vector_store %arg9[%c1_95, %c20_96, %c0_97], %138 {strides = array<i32>} : memref<2x32x128xf32, #tpu.memory_space<vmem>>, vector<1x1x16xf32>,
      %139 = vector.extract_strided_slice %32 {offsets = [208], sizes = [16], strides = [1]} : vector<256xf32> to vector<16xf32>
      %c0_98 = arith.constant 0 : index
      %c21 = arith.constant 21 : index
      %c0_99 = arith.constant 0 : index
      %140 = vector.load %arg9[%c0_98, %c21, %c0_99] : memref<2x32x128xf32, #tpu.memory_space<vmem>>, vector<1x1x16xf32>
      %141 = vector.shape_cast %140 : vector<1x1x16xf32> to vector<16xf32>
      %142 = vector.shape_cast %139 : vector<16xf32> to vector<1x1x16xf32>
      tpu.vector_store %arg9[%c0_98, %c21, %c0_99], %142 {strides = array<i32>} : memref<2x32x128xf32, #tpu.memory_space<vmem>>, vector<1x1x16xf32>,
      %143 = vector.extract_strided_slice %34 {offsets = [208], sizes = [16], strides = [1]} : vector<256xf32> to vector<16xf32>
      %c1_100 = arith.constant 1 : index
      %c21_101 = arith.constant 21 : index
      %c0_102 = arith.constant 0 : index
      %144 = vector.load %arg9[%c1_100, %c21_101, %c0_102] : memref<2x32x128xf32, #tpu.memory_space<vmem>>, vector<1x1x16xf32>
      %145 = vector.shape_cast %144 : vector<1x1x16xf32> to vector<16xf32>
      %146 = vector.shape_cast %143 : vector<16xf32> to vector<1x1x16xf32>
      tpu.vector_store %arg9[%c1_100, %c21_101, %c0_102], %146 {strides = array<i32>} : memref<2x32x128xf32, #tpu.memory_space<vmem>>, vector<1x1x16xf32>,
      %147 = vector.extract_strided_slice %32 {offsets = [224], sizes = [16], strides = [1]} : vector<256xf32> to vector<16xf32>
      %c0_103 = arith.constant 0 : index
      %c22 = arith.constant 22 : index
      %c0_104 = arith.constant 0 : index
      %148 = vector.load %arg9[%c0_103, %c22, %c0_104] : memref<2x32x128xf32, #tpu.memory_space<vmem>>, vector<1x1x16xf32>
      %149 = vector.shape_cast %148 : vector<1x1x16xf32> to vector<16xf32>
      %150 = vector.shape_cast %147 : vector<16xf32> to vector<1x1x16xf32>
      tpu.vector_store %arg9[%c0_103, %c22, %c0_104], %150 {strides = array<i32>} : memref<2x32x128xf32, #tpu.memory_space<vmem>>, vector<1x1x16xf32>,
      %151 = vector.extract_strided_slice %34 {offsets = [224], sizes = [16], strides = [1]} : vector<256xf32> to vector<16xf32>
      %c1_105 = arith.constant 1 : index
      %c22_106 = arith.constant 22 : index
      %c0_107 = arith.constant 0 : index
      %152 = vector.load %arg9[%c1_105, %c22_106, %c0_107] : memref<2x32x128xf32, #tpu.memory_space<vmem>>, vector<1x1x16xf32>
      %153 = vector.shape_cast %152 : vector<1x1x16xf32> to vector<16xf32>
      %154 = vector.shape_cast %151 : vector<16xf32> to vector<1x1x16xf32>
      tpu.vector_store %arg9[%c1_105, %c22_106, %c0_107], %154 {strides = array<i32>} : memref<2x32x128xf32, #tpu.memory_space<vmem>>, vector<1x1x16xf32>,
      %155 = vector.extract_strided_slice %32 {offsets = [240], sizes = [16], strides = [1]} : vector<256xf32> to vector<16xf32>
      %c0_108 = arith.constant 0 : index
      %c23 = arith.constant 23 : index
      %c0_109 = arith.constant 0 : index
      %156 = vector.load %arg9[%c0_108, %c23, %c0_109] : memref<2x32x128xf32, #tpu.memory_space<vmem>>, vector<1x1x16xf32>
      %157 = vector.shape_cast %156 : vector<1x1x16xf32> to vector<16xf32>
      %158 = vector.shape_cast %155 : vector<16xf32> to vector<1x1x16xf32>
      tpu.vector_store %arg9[%c0_108, %c23, %c0_109], %158 {strides = array<i32>} : memref<2x32x128xf32, #tpu.memory_space<vmem>>, vector<1x1x16xf32>,
      %159 = vector.extract_strided_slice %34 {offsets = [240], sizes = [16], strides = [1]} : vector<256xf32> to vector<16xf32>
      %c1_110 = arith.constant 1 : index
      %c23_111 = arith.constant 23 : index
      %c0_112 = arith.constant 0 : index
      %160 = vector.load %arg9[%c1_110, %c23_111, %c0_112] : memref<2x32x128xf32, #tpu.memory_space<vmem>>, vector<1x1x16xf32>
      %161 = vector.shape_cast %160 : vector<1x1x16xf32> to vector<16xf32>
      %162 = vector.shape_cast %159 : vector<16xf32> to vector<1x1x16xf32>
      tpu.vector_store %arg9[%c1_110, %c23_111, %c0_112], %162 {strides = array<i32>} : memref<2x32x128xf32, #tpu.memory_space<vmem>>, vector<1x1x16xf32>,
      %cst_113 = arith.constant 0.000000e+00 : f32
      %163 = vector.broadcast %cst_113 : f32 to vector<16x128xf32>
      %cst_114 = arith.constant 0.000000e+00 : f32
      %164 = vector.broadcast %cst_114 : f32 to vector<16x128xf32>
      %cst_115 = arith.constant 0.000000e+00 : f32
      %165 = vector.broadcast %cst_115 : f32 to vector<16x128xf32>
      %cst_116 = arith.constant 0.000000e+00 : f32
      %166 = vector.broadcast %cst_116 : f32 to vector<16x128xf32>
      %cst_117 = arith.constant 0.000000e+00 : f32
      %167 = vector.broadcast %cst_117 : f32 to vector<16x128xf32>
      %cst_118 = arith.constant 0.000000e+00 : f32
      %168 = vector.broadcast %cst_118 : f32 to vector<16x128xf32>
      %cst_119 = arith.constant 0.000000e+00 : f32
      %169 = vector.broadcast %cst_119 : f32 to vector<16x128xf32>
      %c0_120 = arith.constant 0 : index
      %c5 = arith.constant 5 : index
      %c0_121 = arith.constant 0 : index
      %170 = vector.load %arg9[%c0_120, %c5, %c0_121] : memref<2x32x128xf32, #tpu.memory_space<vmem>>, vector<1x16x128xf32>
      %171 = vector.shape_cast %170 : vector<1x16x128xf32> to vector<16x128xf32>
      %c0_122 = arith.constant 0 : index
      %172 = memref.load %arg3[%c0_122] : memref<98xf32, #tpu.memory_space<smem>>
      %173 = vector.broadcast %172 : f32 to vector<16x128xf32>
      %174 = arith.mulf %173, %171 : vector<16x128xf32>
      %175 = arith.addf %163, %174 : vector<16x128xf32>
      %c1_123 = arith.constant 1 : index
      %176 = memref.load %arg3[%c1_123] : memref<98xf32, #tpu.memory_space<smem>>
      %177 = vector.broadcast %176 : f32 to vector<16x128xf32>
      %178 = arith.mulf %177, %171 : vector<16x128xf32>
      %179 = arith.addf %164, %178 : vector<16x128xf32>
      %c2_124 = arith.constant 2 : index
      %180 = memref.load %arg3[%c2_124] : memref<98xf32, #tpu.memory_space<smem>>
      %181 = vector.broadcast %180 : f32 to vector<16x128xf32>
      %182 = arith.mulf %181, %171 : vector<16x128xf32>
      %183 = arith.addf %165, %182 : vector<16x128xf32>
      %c3 = arith.constant 3 : index
      %184 = memref.load %arg3[%c3] : memref<98xf32, #tpu.memory_space<smem>>
      %185 = vector.broadcast %184 : f32 to vector<16x128xf32>
      %186 = arith.mulf %185, %171 : vector<16x128xf32>
      %187 = arith.addf %166, %186 : vector<16x128xf32>
      %c4 = arith.constant 4 : index
      %188 = memref.load %arg3[%c4] : memref<98xf32, #tpu.memory_space<smem>>
      %189 = vector.broadcast %188 : f32 to vector<16x128xf32>
      %190 = arith.mulf %189, %171 : vector<16x128xf32>
      %191 = arith.addf %167, %190 : vector<16x128xf32>
      %c5_125 = arith.constant 5 : index
      %192 = memref.load %arg3[%c5_125] : memref<98xf32, #tpu.memory_space<smem>>
      %193 = vector.broadcast %192 : f32 to vector<16x128xf32>
      %194 = arith.mulf %193, %171 : vector<16x128xf32>
      %195 = arith.addf %168, %194 : vector<16x128xf32>
      %c6 = arith.constant 6 : index
      %196 = memref.load %arg3[%c6] : memref<98xf32, #tpu.memory_space<smem>>
      %197 = vector.broadcast %196 : f32 to vector<16x128xf32>
      %198 = arith.mulf %197, %171 : vector<16x128xf32>
      %199 = arith.addf %169, %198 : vector<16x128xf32>
      %c0_126 = arith.constant 0 : index
      %c6_127 = arith.constant 6 : index
      %c0_128 = arith.constant 0 : index
      %200 = vector.load %arg9[%c0_126, %c6_127, %c0_128] : memref<2x32x128xf32, #tpu.memory_space<vmem>>, vector<1x16x128xf32>
      %201 = vector.shape_cast %200 : vector<1x16x128xf32> to vector<16x128xf32>
      %c7 = arith.constant 7 : index
      %202 = memref.load %arg3[%c7] : memref<98xf32, #tpu.memory_space<smem>>
      %203 = vector.broadcast %202 : f32 to vector<16x128xf32>
      %204 = arith.mulf %203, %201 : vector<16x128xf32>
      %205 = arith.addf %175, %204 : vector<16x128xf32>
      %c8_129 = arith.constant 8 : index
      %206 = memref.load %arg3[%c8_129] : memref<98xf32, #tpu.memory_space<smem>>
      %207 = vector.broadcast %206 : f32 to vector<16x128xf32>
      %208 = arith.mulf %207, %201 : vector<16x128xf32>
      %209 = arith.addf %179, %208 : vector<16x128xf32>
      %c9_130 = arith.constant 9 : index
      %210 = memref.load %arg3[%c9_130] : memref<98xf32, #tpu.memory_space<smem>>
      %211 = vector.broadcast %210 : f32 to vector<16x128xf32>
      %212 = arith.mulf %211, %201 : vector<16x128xf32>
      %213 = arith.addf %183, %212 : vector<16x128xf32>
      %c10_131 = arith.constant 10 : index
      %214 = memref.load %arg3[%c10_131] : memref<98xf32, #tpu.memory_space<smem>>
      %215 = vector.broadcast %214 : f32 to vector<16x128xf32>
      %216 = arith.mulf %215, %201 : vector<16x128xf32>
      %217 = arith.addf %187, %216 : vector<16x128xf32>
      %c11_132 = arith.constant 11 : index
      %218 = memref.load %arg3[%c11_132] : memref<98xf32, #tpu.memory_space<smem>>
      %219 = vector.broadcast %218 : f32 to vector<16x128xf32>
      %220 = arith.mulf %219, %201 : vector<16x128xf32>
      %221 = arith.addf %191, %220 : vector<16x128xf32>
      %c12_133 = arith.constant 12 : index
      %222 = memref.load %arg3[%c12_133] : memref<98xf32, #tpu.memory_space<smem>>
      %223 = vector.broadcast %222 : f32 to vector<16x128xf32>
      %224 = arith.mulf %223, %201 : vector<16x128xf32>
      %225 = arith.addf %195, %224 : vector<16x128xf32>
      %c13_134 = arith.constant 13 : index
      %226 = memref.load %arg3[%c13_134] : memref<98xf32, #tpu.memory_space<smem>>
      %227 = vector.broadcast %226 : f32 to vector<16x128xf32>
      %228 = arith.mulf %227, %201 : vector<16x128xf32>
      %229 = arith.addf %199, %228 : vector<16x128xf32>
      %c0_135 = arith.constant 0 : index
      %c7_136 = arith.constant 7 : index
      %c0_137 = arith.constant 0 : index
      %230 = vector.load %arg9[%c0_135, %c7_136, %c0_137] : memref<2x32x128xf32, #tpu.memory_space<vmem>>, vector<1x16x128xf32>
      %231 = vector.shape_cast %230 : vector<1x16x128xf32> to vector<16x128xf32>
      %c14_138 = arith.constant 14 : index
      %232 = memref.load %arg3[%c14_138] : memref<98xf32, #tpu.memory_space<smem>>
      %233 = vector.broadcast %232 : f32 to vector<16x128xf32>
      %234 = arith.mulf %233, %231 : vector<16x128xf32>
      %235 = arith.addf %205, %234 : vector<16x128xf32>
      %c15_139 = arith.constant 15 : index
      %236 = memref.load %arg3[%c15_139] : memref<98xf32, #tpu.memory_space<smem>>
      %237 = vector.broadcast %236 : f32 to vector<16x128xf32>
      %238 = arith.mulf %237, %231 : vector<16x128xf32>
      %239 = arith.addf %209, %238 : vector<16x128xf32>
      %c16_140 = arith.constant 16 : index
      %240 = memref.load %arg3[%c16_140] : memref<98xf32, #tpu.memory_space<smem>>
      %241 = vector.broadcast %240 : f32 to vector<16x128xf32>
      %242 = arith.mulf %241, %231 : vector<16x128xf32>
      %243 = arith.addf %213, %242 : vector<16x128xf32>
      %c17_141 = arith.constant 17 : index
      %244 = memref.load %arg3[%c17_141] : memref<98xf32, #tpu.memory_space<smem>>
      %245 = vector.broadcast %244 : f32 to vector<16x128xf32>
      %246 = arith.mulf %245, %231 : vector<16x128xf32>
      %247 = arith.addf %217, %246 : vector<16x128xf32>
      %c18_142 = arith.constant 18 : index
      %248 = memref.load %arg3[%c18_142] : memref<98xf32, #tpu.memory_space<smem>>
      %249 = vector.broadcast %248 : f32 to vector<16x128xf32>
      %250 = arith.mulf %249, %231 : vector<16x128xf32>
      %251 = arith.addf %221, %250 : vector<16x128xf32>
      %c19_143 = arith.constant 19 : index
      %252 = memref.load %arg3[%c19_143] : memref<98xf32, #tpu.memory_space<smem>>
      %253 = vector.broadcast %252 : f32 to vector<16x128xf32>
      %254 = arith.mulf %253, %231 : vector<16x128xf32>
      %255 = arith.addf %225, %254 : vector<16x128xf32>
      %c20_144 = arith.constant 20 : index
      %256 = memref.load %arg3[%c20_144] : memref<98xf32, #tpu.memory_space<smem>>
      %257 = vector.broadcast %256 : f32 to vector<16x128xf32>
      %258 = arith.mulf %257, %231 : vector<16x128xf32>
      %259 = arith.addf %229, %258 : vector<16x128xf32>
      %c0_145 = arith.constant 0 : index
      %c8_146 = arith.constant 8 : index
      %c0_147 = arith.constant 0 : index
      %260 = vector.load %arg9[%c0_145, %c8_146, %c0_147] : memref<2x32x128xf32, #tpu.memory_space<vmem>>, vector<1x16x128xf32>
      %261 = vector.shape_cast %260 : vector<1x16x128xf32> to vector<16x128xf32>
      %c21_148 = arith.constant 21 : index
      %262 = memref.load %arg3[%c21_148] : memref<98xf32, #tpu.memory_space<smem>>
      %263 = vector.broadcast %262 : f32 to vector<16x128xf32>
      %264 = arith.mulf %263, %261 : vector<16x128xf32>
      %265 = arith.addf %235, %264 : vector<16x128xf32>
      %c22_149 = arith.constant 22 : index
      %266 = memref.load %arg3[%c22_149] : memref<98xf32, #tpu.memory_space<smem>>
      %267 = vector.broadcast %266 : f32 to vector<16x128xf32>
      %268 = arith.mulf %267, %261 : vector<16x128xf32>
      %269 = arith.addf %239, %268 : vector<16x128xf32>
      %c23_150 = arith.constant 23 : index
      %270 = memref.load %arg3[%c23_150] : memref<98xf32, #tpu.memory_space<smem>>
      %271 = vector.broadcast %270 : f32 to vector<16x128xf32>
      %272 = arith.mulf %271, %261 : vector<16x128xf32>
      %273 = arith.addf %243, %272 : vector<16x128xf32>
      %c24_151 = arith.constant 24 : index
      %274 = memref.load %arg3[%c24_151] : memref<98xf32, #tpu.memory_space<smem>>
      %275 = vector.broadcast %274 : f32 to vector<16x128xf32>
      %276 = arith.mulf %275, %261 : vector<16x128xf32>
      %277 = arith.addf %247, %276 : vector<16x128xf32>
      %c25 = arith.constant 25 : index
      %278 = memref.load %arg3[%c25] : memref<98xf32, #tpu.memory_space<smem>>
      %279 = vector.broadcast %278 : f32 to vector<16x128xf32>
      %280 = arith.mulf %279, %261 : vector<16x128xf32>
      %281 = arith.addf %251, %280 : vector<16x128xf32>
      %c26 = arith.constant 26 : index
      %282 = memref.load %arg3[%c26] : memref<98xf32, #tpu.memory_space<smem>>
      %283 = vector.broadcast %282 : f32 to vector<16x128xf32>
      %284 = arith.mulf %283, %261 : vector<16x128xf32>
      %285 = arith.addf %255, %284 : vector<16x128xf32>
      %c27 = arith.constant 27 : index
      %286 = memref.load %arg3[%c27] : memref<98xf32, #tpu.memory_space<smem>>
      %287 = vector.broadcast %286 : f32 to vector<16x128xf32>
      %288 = arith.mulf %287, %261 : vector<16x128xf32>
      %289 = arith.addf %259, %288 : vector<16x128xf32>
      %c0_152 = arith.constant 0 : index
      %c9_153 = arith.constant 9 : index
      %c0_154 = arith.constant 0 : index
      %290 = vector.load %arg9[%c0_152, %c9_153, %c0_154] : memref<2x32x128xf32, #tpu.memory_space<vmem>>, vector<1x16x128xf32>
      %291 = vector.shape_cast %290 : vector<1x16x128xf32> to vector<16x128xf32>
      %c28 = arith.constant 28 : index
      %292 = memref.load %arg3[%c28] : memref<98xf32, #tpu.memory_space<smem>>
      %293 = vector.broadcast %292 : f32 to vector<16x128xf32>
      %294 = arith.mulf %293, %291 : vector<16x128xf32>
      %295 = arith.addf %265, %294 : vector<16x128xf32>
      %c29 = arith.constant 29 : index
      %296 = memref.load %arg3[%c29] : memref<98xf32, #tpu.memory_space<smem>>
      %297 = vector.broadcast %296 : f32 to vector<16x128xf32>
      %298 = arith.mulf %297, %291 : vector<16x128xf32>
      %299 = arith.addf %269, %298 : vector<16x128xf32>
      %c30 = arith.constant 30 : index
      %300 = memref.load %arg3[%c30] : memref<98xf32, #tpu.memory_space<smem>>
      %301 = vector.broadcast %300 : f32 to vector<16x128xf32>
      %302 = arith.mulf %301, %291 : vector<16x128xf32>
      %303 = arith.addf %273, %302 : vector<16x128xf32>
      %c31 = arith.constant 31 : index
      %304 = memref.load %arg3[%c31] : memref<98xf32, #tpu.memory_space<smem>>
      %305 = vector.broadcast %304 : f32 to vector<16x128xf32>
      %306 = arith.mulf %305, %291 : vector<16x128xf32>
      %307 = arith.addf %277, %306 : vector<16x128xf32>
      %c32 = arith.constant 32 : index
      %308 = memref.load %arg3[%c32] : memref<98xf32, #tpu.memory_space<smem>>
      %309 = vector.broadcast %308 : f32 to vector<16x128xf32>
      %310 = arith.mulf %309, %291 : vector<16x128xf32>
      %311 = arith.addf %281, %310 : vector<16x128xf32>
      %c33 = arith.constant 33 : index
      %312 = memref.load %arg3[%c33] : memref<98xf32, #tpu.memory_space<smem>>
      %313 = vector.broadcast %312 : f32 to vector<16x128xf32>
      %314 = arith.mulf %313, %291 : vector<16x128xf32>
      %315 = arith.addf %285, %314 : vector<16x128xf32>
      %c34 = arith.constant 34 : index
      %316 = memref.load %arg3[%c34] : memref<98xf32, #tpu.memory_space<smem>>
      %317 = vector.broadcast %316 : f32 to vector<16x128xf32>
      %318 = arith.mulf %317, %291 : vector<16x128xf32>
      %319 = arith.addf %289, %318 : vector<16x128xf32>
      %c0_155 = arith.constant 0 : index
      %c10_156 = arith.constant 10 : index
      %c0_157 = arith.constant 0 : index
      %320 = vector.load %arg9[%c0_155, %c10_156, %c0_157] : memref<2x32x128xf32, #tpu.memory_space<vmem>>, vector<1x16x128xf32>
      %321 = vector.shape_cast %320 : vector<1x16x128xf32> to vector<16x128xf32>
      %c35 = arith.constant 35 : index
      %322 = memref.load %arg3[%c35] : memref<98xf32, #tpu.memory_space<smem>>
      %323 = vector.broadcast %322 : f32 to vector<16x128xf32>
      %324 = arith.mulf %323, %321 : vector<16x128xf32>
      %325 = arith.addf %295, %324 : vector<16x128xf32>
      %c36 = arith.constant 36 : index
      %326 = memref.load %arg3[%c36] : memref<98xf32, #tpu.memory_space<smem>>
      %327 = vector.broadcast %326 : f32 to vector<16x128xf32>
      %328 = arith.mulf %327, %321 : vector<16x128xf32>
      %329 = arith.addf %299, %328 : vector<16x128xf32>
      %c37 = arith.constant 37 : index
      %330 = memref.load %arg3[%c37] : memref<98xf32, #tpu.memory_space<smem>>
      %331 = vector.broadcast %330 : f32 to vector<16x128xf32>
      %332 = arith.mulf %331, %321 : vector<16x128xf32>
      %333 = arith.addf %303, %332 : vector<16x128xf32>
      %c38 = arith.constant 38 : index
      %334 = memref.load %arg3[%c38] : memref<98xf32, #tpu.memory_space<smem>>
      %335 = vector.broadcast %334 : f32 to vector<16x128xf32>
      %336 = arith.mulf %335, %321 : vector<16x128xf32>
      %337 = arith.addf %307, %336 : vector<16x128xf32>
      %c39 = arith.constant 39 : index
      %338 = memref.load %arg3[%c39] : memref<98xf32, #tpu.memory_space<smem>>
      %339 = vector.broadcast %338 : f32 to vector<16x128xf32>
      %340 = arith.mulf %339, %321 : vector<16x128xf32>
      %341 = arith.addf %311, %340 : vector<16x128xf32>
      %c40_158 = arith.constant 40 : index
      %342 = memref.load %arg3[%c40_158] : memref<98xf32, #tpu.memory_space<smem>>
      %343 = vector.broadcast %342 : f32 to vector<16x128xf32>
      %344 = arith.mulf %343, %321 : vector<16x128xf32>
      %345 = arith.addf %315, %344 : vector<16x128xf32>
      %c41 = arith.constant 41 : index
      %346 = memref.load %arg3[%c41] : memref<98xf32, #tpu.memory_space<smem>>
      %347 = vector.broadcast %346 : f32 to vector<16x128xf32>
      %348 = arith.mulf %347, %321 : vector<16x128xf32>
      %349 = arith.addf %319, %348 : vector<16x128xf32>
      %c0_159 = arith.constant 0 : index
      %c11_160 = arith.constant 11 : index
      %c0_161 = arith.constant 0 : index
      %350 = vector.load %arg9[%c0_159, %c11_160, %c0_161] : memref<2x32x128xf32, #tpu.memory_space<vmem>>, vector<1x16x128xf32>
      %351 = vector.shape_cast %350 : vector<1x16x128xf32> to vector<16x128xf32>
      %c42 = arith.constant 42 : index
      %352 = memref.load %arg3[%c42] : memref<98xf32, #tpu.memory_space<smem>>
      %353 = vector.broadcast %352 : f32 to vector<16x128xf32>
      %354 = arith.mulf %353, %351 : vector<16x128xf32>
      %355 = arith.addf %325, %354 : vector<16x128xf32>
      %c43 = arith.constant 43 : index
      %356 = memref.load %arg3[%c43] : memref<98xf32, #tpu.memory_space<smem>>
      %357 = vector.broadcast %356 : f32 to vector<16x128xf32>
      %358 = arith.mulf %357, %351 : vector<16x128xf32>
      %359 = arith.addf %329, %358 : vector<16x128xf32>
      %c44 = arith.constant 44 : index
      %360 = memref.load %arg3[%c44] : memref<98xf32, #tpu.memory_space<smem>>
      %361 = vector.broadcast %360 : f32 to vector<16x128xf32>
      %362 = arith.mulf %361, %351 : vector<16x128xf32>
      %363 = arith.addf %333, %362 : vector<16x128xf32>
      %c45 = arith.constant 45 : index
      %364 = memref.load %arg3[%c45] : memref<98xf32, #tpu.memory_space<smem>>
      %365 = vector.broadcast %364 : f32 to vector<16x128xf32>
      %366 = arith.mulf %365, %351 : vector<16x128xf32>
      %367 = arith.addf %337, %366 : vector<16x128xf32>
      %c46 = arith.constant 46 : index
      %368 = memref.load %arg3[%c46] : memref<98xf32, #tpu.memory_space<smem>>
      %369 = vector.broadcast %368 : f32 to vector<16x128xf32>
      %370 = arith.mulf %369, %351 : vector<16x128xf32>
      %371 = arith.addf %341, %370 : vector<16x128xf32>
      %c47 = arith.constant 47 : index
      %372 = memref.load %arg3[%c47] : memref<98xf32, #tpu.memory_space<smem>>
      %373 = vector.broadcast %372 : f32 to vector<16x128xf32>
      %374 = arith.mulf %373, %351 : vector<16x128xf32>
      %375 = arith.addf %345, %374 : vector<16x128xf32>
      %c48 = arith.constant 48 : index
      %376 = memref.load %arg3[%c48] : memref<98xf32, #tpu.memory_space<smem>>
      %377 = vector.broadcast %376 : f32 to vector<16x128xf32>
      %378 = arith.mulf %377, %351 : vector<16x128xf32>
      %379 = arith.addf %349, %378 : vector<16x128xf32>
      %c1_162 = arith.constant 1 : index
      %c5_163 = arith.constant 5 : index
      %c0_164 = arith.constant 0 : index
      %380 = vector.load %arg9[%c1_162, %c5_163, %c0_164] : memref<2x32x128xf32, #tpu.memory_space<vmem>>, vector<1x16x128xf32>
      %381 = vector.shape_cast %380 : vector<1x16x128xf32> to vector<16x128xf32>
      %c49 = arith.constant 49 : index
      %382 = memref.load %arg3[%c49] : memref<98xf32, #tpu.memory_space<smem>>
      %383 = vector.broadcast %382 : f32 to vector<16x128xf32>
      %384 = arith.mulf %383, %381 : vector<16x128xf32>
      %385 = arith.addf %355, %384 : vector<16x128xf32>
      %c50 = arith.constant 50 : index
      %386 = memref.load %arg3[%c50] : memref<98xf32, #tpu.memory_space<smem>>
      %387 = vector.broadcast %386 : f32 to vector<16x128xf32>
      %388 = arith.mulf %387, %381 : vector<16x128xf32>
      %389 = arith.addf %359, %388 : vector<16x128xf32>
      %c51 = arith.constant 51 : index
      %390 = memref.load %arg3[%c51] : memref<98xf32, #tpu.memory_space<smem>>
      %391 = vector.broadcast %390 : f32 to vector<16x128xf32>
      %392 = arith.mulf %391, %381 : vector<16x128xf32>
      %393 = arith.addf %363, %392 : vector<16x128xf32>
      %c52 = arith.constant 52 : index
      %394 = memref.load %arg3[%c52] : memref<98xf32, #tpu.memory_space<smem>>
      %395 = vector.broadcast %394 : f32 to vector<16x128xf32>
      %396 = arith.mulf %395, %381 : vector<16x128xf32>
      %397 = arith.addf %367, %396 : vector<16x128xf32>
      %c53 = arith.constant 53 : index
      %398 = memref.load %arg3[%c53] : memref<98xf32, #tpu.memory_space<smem>>
      %399 = vector.broadcast %398 : f32 to vector<16x128xf32>
      %400 = arith.mulf %399, %381 : vector<16x128xf32>
      %401 = arith.addf %371, %400 : vector<16x128xf32>
      %c54 = arith.constant 54 : index
      %402 = memref.load %arg3[%c54] : memref<98xf32, #tpu.memory_space<smem>>
      %403 = vector.broadcast %402 : f32 to vector<16x128xf32>
      %404 = arith.mulf %403, %381 : vector<16x128xf32>
      %405 = arith.addf %375, %404 : vector<16x128xf32>
      %c55 = arith.constant 55 : index
      %406 = memref.load %arg3[%c55] : memref<98xf32, #tpu.memory_space<smem>>
      %407 = vector.broadcast %406 : f32 to vector<16x128xf32>
      %408 = arith.mulf %407, %381 : vector<16x128xf32>
      %409 = arith.addf %379, %408 : vector<16x128xf32>
      %c1_165 = arith.constant 1 : index
      %c6_166 = arith.constant 6 : index
      %c0_167 = arith.constant 0 : index
      %410 = vector.load %arg9[%c1_165, %c6_166, %c0_167] : memref<2x32x128xf32, #tpu.memory_space<vmem>>, vector<1x16x128xf32>
      %411 = vector.shape_cast %410 : vector<1x16x128xf32> to vector<16x128xf32>
      %c56 = arith.constant 56 : index
      %412 = memref.load %arg3[%c56] : memref<98xf32, #tpu.memory_space<smem>>
      %413 = vector.broadcast %412 : f32 to vector<16x128xf32>
      %414 = arith.mulf %413, %411 : vector<16x128xf32>
      %415 = arith.addf %385, %414 : vector<16x128xf32>
      %c57 = arith.constant 57 : index
      %416 = memref.load %arg3[%c57] : memref<98xf32, #tpu.memory_space<smem>>
      %417 = vector.broadcast %416 : f32 to vector<16x128xf32>
      %418 = arith.mulf %417, %411 : vector<16x128xf32>
      %419 = arith.addf %389, %418 : vector<16x128xf32>
      %c58 = arith.constant 58 : index
      %420 = memref.load %arg3[%c58] : memref<98xf32, #tpu.memory_space<smem>>
      %421 = vector.broadcast %420 : f32 to vector<16x128xf32>
      %422 = arith.mulf %421, %411 : vector<16x128xf32>
      %423 = arith.addf %393, %422 : vector<16x128xf32>
      %c59 = arith.constant 59 : index
      %424 = memref.load %arg3[%c59] : memref<98xf32, #tpu.memory_space<smem>>
      %425 = vector.broadcast %424 : f32 to vector<16x128xf32>
      %426 = arith.mulf %425, %411 : vector<16x128xf32>
      %427 = arith.addf %397, %426 : vector<16x128xf32>
      %c60 = arith.constant 60 : index
      %428 = memref.load %arg3[%c60] : memref<98xf32, #tpu.memory_space<smem>>
      %429 = vector.broadcast %428 : f32 to vector<16x128xf32>
      %430 = arith.mulf %429, %411 : vector<16x128xf32>
      %431 = arith.addf %401, %430 : vector<16x128xf32>
      %c61 = arith.constant 61 : index
      %432 = memref.load %arg3[%c61] : memref<98xf32, #tpu.memory_space<smem>>
      %433 = vector.broadcast %432 : f32 to vector<16x128xf32>
      %434 = arith.mulf %433, %411 : vector<16x128xf32>
      %435 = arith.addf %405, %434 : vector<16x128xf32>
      %c62 = arith.constant 62 : index
      %436 = memref.load %arg3[%c62] : memref<98xf32, #tpu.memory_space<smem>>
      %437 = vector.broadcast %436 : f32 to vector<16x128xf32>
      %438 = arith.mulf %437, %411 : vector<16x128xf32>
      %439 = arith.addf %409, %438 : vector<16x128xf32>
      %c1_168 = arith.constant 1 : index
      %c7_169 = arith.constant 7 : index
      %c0_170 = arith.constant 0 : index
      %440 = vector.load %arg9[%c1_168, %c7_169, %c0_170] : memref<2x32x128xf32, #tpu.memory_space<vmem>>, vector<1x16x128xf32>
      %441 = vector.shape_cast %440 : vector<1x16x128xf32> to vector<16x128xf32>
      %c63 = arith.constant 63 : index
      %442 = memref.load %arg3[%c63] : memref<98xf32, #tpu.memory_space<smem>>
      %443 = vector.broadcast %442 : f32 to vector<16x128xf32>
      %444 = arith.mulf %443, %441 : vector<16x128xf32>
      %445 = arith.addf %415, %444 : vector<16x128xf32>
      %c64 = arith.constant 64 : index
      %446 = memref.load %arg3[%c64] : memref<98xf32, #tpu.memory_space<smem>>
      %447 = vector.broadcast %446 : f32 to vector<16x128xf32>
      %448 = arith.mulf %447, %441 : vector<16x128xf32>
      %449 = arith.addf %419, %448 : vector<16x128xf32>
      %c65 = arith.constant 65 : index
      %450 = memref.load %arg3[%c65] : memref<98xf32, #tpu.memory_space<smem>>
      %451 = vector.broadcast %450 : f32 to vector<16x128xf32>
      %452 = arith.mulf %451, %441 : vector<16x128xf32>
      %453 = arith.addf %423, %452 : vector<16x128xf32>
      %c66 = arith.constant 66 : index
      %454 = memref.load %arg3[%c66] : memref<98xf32, #tpu.memory_space<smem>>
      %455 = vector.broadcast %454 : f32 to vector<16x128xf32>
      %456 = arith.mulf %455, %441 : vector<16x128xf32>
      %457 = arith.addf %427, %456 : vector<16x128xf32>
      %c67 = arith.constant 67 : index
      %458 = memref.load %arg3[%c67] : memref<98xf32, #tpu.memory_space<smem>>
      %459 = vector.broadcast %458 : f32 to vector<16x128xf32>
      %460 = arith.mulf %459, %441 : vector<16x128xf32>
      %461 = arith.addf %431, %460 : vector<16x128xf32>
      %c68 = arith.constant 68 : index
      %462 = memref.load %arg3[%c68] : memref<98xf32, #tpu.memory_space<smem>>
      %463 = vector.broadcast %462 : f32 to vector<16x128xf32>
      %464 = arith.mulf %463, %441 : vector<16x128xf32>
      %465 = arith.addf %435, %464 : vector<16x128xf32>
      %c69 = arith.constant 69 : index
      %466 = memref.load %arg3[%c69] : memref<98xf32, #tpu.memory_space<smem>>
      %467 = vector.broadcast %466 : f32 to vector<16x128xf32>
      %468 = arith.mulf %467, %441 : vector<16x128xf32>
      %469 = arith.addf %439, %468 : vector<16x128xf32>
      %c1_171 = arith.constant 1 : index
      %c8_172 = arith.constant 8 : index
      %c0_173 = arith.constant 0 : index
      %470 = vector.load %arg9[%c1_171, %c8_172, %c0_173] : memref<2x32x128xf32, #tpu.memory_space<vmem>>, vector<1x16x128xf32>
      %471 = vector.shape_cast %470 : vector<1x16x128xf32> to vector<16x128xf32>
      %c70 = arith.constant 70 : index
      %472 = memref.load %arg3[%c70] : memref<98xf32, #tpu.memory_space<smem>>
      %473 = vector.broadcast %472 : f32 to vector<16x128xf32>
      %474 = arith.mulf %473, %471 : vector<16x128xf32>
      %475 = arith.addf %445, %474 : vector<16x128xf32>
      %c71 = arith.constant 71 : index
      %476 = memref.load %arg3[%c71] : memref<98xf32, #tpu.memory_space<smem>>
      %477 = vector.broadcast %476 : f32 to vector<16x128xf32>
      %478 = arith.mulf %477, %471 : vector<16x128xf32>
      %479 = arith.addf %449, %478 : vector<16x128xf32>
      %c72 = arith.constant 72 : index
      %480 = memref.load %arg3[%c72] : memref<98xf32, #tpu.memory_space<smem>>
      %481 = vector.broadcast %480 : f32 to vector<16x128xf32>
      %482 = arith.mulf %481, %471 : vector<16x128xf32>
      %483 = arith.addf %453, %482 : vector<16x128xf32>
      %c73 = arith.constant 73 : index
      %484 = memref.load %arg3[%c73] : memref<98xf32, #tpu.memory_space<smem>>
      %485 = vector.broadcast %484 : f32 to vector<16x128xf32>
      %486 = arith.mulf %485, %471 : vector<16x128xf32>
      %487 = arith.addf %457, %486 : vector<16x128xf32>
      %c74 = arith.constant 74 : index
      %488 = memref.load %arg3[%c74] : memref<98xf32, #tpu.memory_space<smem>>
      %489 = vector.broadcast %488 : f32 to vector<16x128xf32>
      %490 = arith.mulf %489, %471 : vector<16x128xf32>
      %491 = arith.addf %461, %490 : vector<16x128xf32>
      %c75 = arith.constant 75 : index
      %492 = memref.load %arg3[%c75] : memref<98xf32, #tpu.memory_space<smem>>
      %493 = vector.broadcast %492 : f32 to vector<16x128xf32>
      %494 = arith.mulf %493, %471 : vector<16x128xf32>
      %495 = arith.addf %465, %494 : vector<16x128xf32>
      %c76 = arith.constant 76 : index
      %496 = memref.load %arg3[%c76] : memref<98xf32, #tpu.memory_space<smem>>
      %497 = vector.broadcast %496 : f32 to vector<16x128xf32>
      %498 = arith.mulf %497, %471 : vector<16x128xf32>
      %499 = arith.addf %469, %498 : vector<16x128xf32>
      %c1_174 = arith.constant 1 : index
      %c9_175 = arith.constant 9 : index
      %c0_176 = arith.constant 0 : index
      %500 = vector.load %arg9[%c1_174, %c9_175, %c0_176] : memref<2x32x128xf32, #tpu.memory_space<vmem>>, vector<1x16x128xf32>
      %501 = vector.shape_cast %500 : vector<1x16x128xf32> to vector<16x128xf32>
      %c77 = arith.constant 77 : index
      %502 = memref.load %arg3[%c77] : memref<98xf32, #tpu.memory_space<smem>>
      %503 = vector.broadcast %502 : f32 to vector<16x128xf32>
      %504 = arith.mulf %503, %501 : vector<16x128xf32>
      %505 = arith.addf %475, %504 : vector<16x128xf32>
      %c78 = arith.constant 78 : index
      %506 = memref.load %arg3[%c78] : memref<98xf32, #tpu.memory_space<smem>>
      %507 = vector.broadcast %506 : f32 to vector<16x128xf32>
      %508 = arith.mulf %507, %501 : vector<16x128xf32>
      %509 = arith.addf %479, %508 : vector<16x128xf32>
      %c79 = arith.constant 79 : index
      %510 = memref.load %arg3[%c79] : memref<98xf32, #tpu.memory_space<smem>>
      %511 = vector.broadcast %510 : f32 to vector<16x128xf32>
      %512 = arith.mulf %511, %501 : vector<16x128xf32>
      %513 = arith.addf %483, %512 : vector<16x128xf32>
      %c80 = arith.constant 80 : index
      %514 = memref.load %arg3[%c80] : memref<98xf32, #tpu.memory_space<smem>>
      %515 = vector.broadcast %514 : f32 to vector<16x128xf32>
      %516 = arith.mulf %515, %501 : vector<16x128xf32>
      %517 = arith.addf %487, %516 : vector<16x128xf32>
      %c81 = arith.constant 81 : index
      %518 = memref.load %arg3[%c81] : memref<98xf32, #tpu.memory_space<smem>>
      %519 = vector.broadcast %518 : f32 to vector<16x128xf32>
      %520 = arith.mulf %519, %501 : vector<16x128xf32>
      %521 = arith.addf %491, %520 : vector<16x128xf32>
      %c82 = arith.constant 82 : index
      %522 = memref.load %arg3[%c82] : memref<98xf32, #tpu.memory_space<smem>>
      %523 = vector.broadcast %522 : f32 to vector<16x128xf32>
      %524 = arith.mulf %523, %501 : vector<16x128xf32>
      %525 = arith.addf %495, %524 : vector<16x128xf32>
      %c83 = arith.constant 83 : index
      %526 = memref.load %arg3[%c83] : memref<98xf32, #tpu.memory_space<smem>>
      %527 = vector.broadcast %526 : f32 to vector<16x128xf32>
      %528 = arith.mulf %527, %501 : vector<16x128xf32>
      %529 = arith.addf %499, %528 : vector<16x128xf32>
      %c1_177 = arith.constant 1 : index
      %c10_178 = arith.constant 10 : index
      %c0_179 = arith.constant 0 : index
      %530 = vector.load %arg9[%c1_177, %c10_178, %c0_179] : memref<2x32x128xf32, #tpu.memory_space<vmem>>, vector<1x16x128xf32>
      %531 = vector.shape_cast %530 : vector<1x16x128xf32> to vector<16x128xf32>
      %c84 = arith.constant 84 : index
      %532 = memref.load %arg3[%c84] : memref<98xf32, #tpu.memory_space<smem>>
      %533 = vector.broadcast %532 : f32 to vector<16x128xf32>
      %534 = arith.mulf %533, %531 : vector<16x128xf32>
      %535 = arith.addf %505, %534 : vector<16x128xf32>
      %c85 = arith.constant 85 : index
      %536 = memref.load %arg3[%c85] : memref<98xf32, #tpu.memory_space<smem>>
      %537 = vector.broadcast %536 : f32 to vector<16x128xf32>
      %538 = arith.mulf %537, %531 : vector<16x128xf32>
      %539 = arith.addf %509, %538 : vector<16x128xf32>
      %c86 = arith.constant 86 : index
      %540 = memref.load %arg3[%c86] : memref<98xf32, #tpu.memory_space<smem>>
      %541 = vector.broadcast %540 : f32 to vector<16x128xf32>
      %542 = arith.mulf %541, %531 : vector<16x128xf32>
      %543 = arith.addf %513, %542 : vector<16x128xf32>
      %c87 = arith.constant 87 : index
      %544 = memref.load %arg3[%c87] : memref<98xf32, #tpu.memory_space<smem>>
      %545 = vector.broadcast %544 : f32 to vector<16x128xf32>
      %546 = arith.mulf %545, %531 : vector<16x128xf32>
      %547 = arith.addf %517, %546 : vector<16x128xf32>
      %c88 = arith.constant 88 : index
      %548 = memref.load %arg3[%c88] : memref<98xf32, #tpu.memory_space<smem>>
      %549 = vector.broadcast %548 : f32 to vector<16x128xf32>
      %550 = arith.mulf %549, %531 : vector<16x128xf32>
      %551 = arith.addf %521, %550 : vector<16x128xf32>
      %c89 = arith.constant 89 : index
      %552 = memref.load %arg3[%c89] : memref<98xf32, #tpu.memory_space<smem>>
      %553 = vector.broadcast %552 : f32 to vector<16x128xf32>
      %554 = arith.mulf %553, %531 : vector<16x128xf32>
      %555 = arith.addf %525, %554 : vector<16x128xf32>
      %c90 = arith.constant 90 : index
      %556 = memref.load %arg3[%c90] : memref<98xf32, #tpu.memory_space<smem>>
      %557 = vector.broadcast %556 : f32 to vector<16x128xf32>
      %558 = arith.mulf %557, %531 : vector<16x128xf32>
      %559 = arith.addf %529, %558 : vector<16x128xf32>
      %c1_180 = arith.constant 1 : index
      %c11_181 = arith.constant 11 : index
      %c0_182 = arith.constant 0 : index
      %560 = vector.load %arg9[%c1_180, %c11_181, %c0_182] : memref<2x32x128xf32, #tpu.memory_space<vmem>>, vector<1x16x128xf32>
      %561 = vector.shape_cast %560 : vector<1x16x128xf32> to vector<16x128xf32>
      %c91 = arith.constant 91 : index
      %562 = memref.load %arg3[%c91] : memref<98xf32, #tpu.memory_space<smem>>
      %563 = vector.broadcast %562 : f32 to vector<16x128xf32>
      %564 = arith.mulf %563, %561 : vector<16x128xf32>
      %565 = arith.addf %535, %564 : vector<16x128xf32>
      %c92 = arith.constant 92 : index
      %566 = memref.load %arg3[%c92] : memref<98xf32, #tpu.memory_space<smem>>
      %567 = vector.broadcast %566 : f32 to vector<16x128xf32>
      %568 = arith.mulf %567, %561 : vector<16x128xf32>
      %569 = arith.addf %539, %568 : vector<16x128xf32>
      %c93 = arith.constant 93 : index
      %570 = memref.load %arg3[%c93] : memref<98xf32, #tpu.memory_space<smem>>
      %571 = vector.broadcast %570 : f32 to vector<16x128xf32>
      %572 = arith.mulf %571, %561 : vector<16x128xf32>
      %573 = arith.addf %543, %572 : vector<16x128xf32>
      %c94 = arith.constant 94 : index
      %574 = memref.load %arg3[%c94] : memref<98xf32, #tpu.memory_space<smem>>
      %575 = vector.broadcast %574 : f32 to vector<16x128xf32>
      %576 = arith.mulf %575, %561 : vector<16x128xf32>
      %577 = arith.addf %547, %576 : vector<16x128xf32>
      %c95 = arith.constant 95 : index
      %578 = memref.load %arg3[%c95] : memref<98xf32, #tpu.memory_space<smem>>
      %579 = vector.broadcast %578 : f32 to vector<16x128xf32>
      %580 = arith.mulf %579, %561 : vector<16x128xf32>
      %581 = arith.addf %551, %580 : vector<16x128xf32>
      %c96 = arith.constant 96 : index
      %582 = memref.load %arg3[%c96] : memref<98xf32, #tpu.memory_space<smem>>
      %583 = vector.broadcast %582 : f32 to vector<16x128xf32>
      %584 = arith.mulf %583, %561 : vector<16x128xf32>
      %585 = arith.addf %555, %584 : vector<16x128xf32>
      %c97 = arith.constant 97 : index
      %586 = memref.load %arg3[%c97] : memref<98xf32, #tpu.memory_space<smem>>
      %587 = vector.broadcast %586 : f32 to vector<16x128xf32>
      %588 = arith.mulf %587, %561 : vector<16x128xf32>
      %589 = arith.addf %559, %588 : vector<16x128xf32>
      %c3_i32 = arith.constant 3 : i32
      %590 = tpu.dynamic_rotate %565 by %c3_i32 dim 1 : vector<16x128xf32>, i32 -> vector<16x128xf32>
      %591 = arith.addf %577, %590 : vector<16x128xf32>
      %c2_i32 = arith.constant 2 : i32
      %592 = tpu.dynamic_rotate %569 by %c2_i32 dim 1 : vector<16x128xf32>, i32 -> vector<16x128xf32>
      %593 = arith.addf %591, %592 : vector<16x128xf32>
      %c1_i32 = arith.constant 1 : i32
      %594 = tpu.dynamic_rotate %573 by %c1_i32 dim 1 : vector<16x128xf32>, i32 -> vector<16x128xf32>
      %595 = arith.addf %593, %594 : vector<16x128xf32>
      %c127_i32 = arith.constant 127 : i32
      %596 = tpu.dynamic_rotate %581 by %c127_i32 dim 1 : vector<16x128xf32>, i32 -> vector<16x128xf32>
      %597 = arith.addf %595, %596 : vector<16x128xf32>
      %c126_i32 = arith.constant 126 : i32
      %598 = tpu.dynamic_rotate %585 by %c126_i32 dim 1 : vector<16x128xf32>, i32 -> vector<16x128xf32>
      %599 = arith.addf %597, %598 : vector<16x128xf32>
      %c125_i32 = arith.constant 125 : i32
      %600 = tpu.dynamic_rotate %589 by %c125_i32 dim 1 : vector<16x128xf32>, i32 -> vector<16x128xf32>
      %601 = arith.addf %599, %600 : vector<16x128xf32>
      %602 = vector.extract_strided_slice %601 {offsets = [0, 0], sizes = [16, 16], strides = [1, 1]} : vector<16x128xf32> to vector<16x16xf32>
      %c24_183 = arith.constant 24 : index
      %c0_184 = arith.constant 0 : index
      %603 = vector.load %arg10[%c24_183, %c0_184] : memref<58x128xf32, #tpu.memory_space<vmem>>, vector<16x16xf32>
      tpu.vector_store %arg10[%c24_183, %c0_184], %602 {strides = array<i32>} : memref<58x128xf32, #tpu.memory_space<vmem>>, vector<16x16xf32>,
      %cst_185 = arith.constant 0.000000e+00 : f32
      %604 = vector.broadcast %cst_185 : f32 to vector<16x128xf32>
      %cst_186 = arith.constant 0.000000e+00 : f32
      %605 = vector.broadcast %cst_186 : f32 to vector<16x128xf32>
      %cst_187 = arith.constant 0.000000e+00 : f32
      %606 = vector.broadcast %cst_187 : f32 to vector<16x128xf32>
      %cst_188 = arith.constant 0.000000e+00 : f32
      %607 = vector.broadcast %cst_188 : f32 to vector<16x128xf32>
      %c18_189 = arith.constant 18 : index
      %c0_190 = arith.constant 0 : index
      %608 = vector.load %arg10[%c18_189, %c0_190] : memref<58x128xf32, #tpu.memory_space<vmem>>, vector<16x128xf32>
      %c0_191 = arith.constant 0 : index
      %609 = memref.load %arg4[%c0_191] : memref<27xf32, #tpu.memory_space<smem>>
      %610 = vector.broadcast %609 : f32 to vector<16x128xf32>
      %611 = arith.mulf %610, %608 : vector<16x128xf32>
      %612 = arith.addf %605, %611 : vector<16x128xf32>
      %c1_192 = arith.constant 1 : index
      %613 = memref.load %arg4[%c1_192] : memref<27xf32, #tpu.memory_space<smem>>
      %614 = vector.broadcast %613 : f32 to vector<16x128xf32>
      %615 = arith.mulf %614, %608 : vector<16x128xf32>
      %616 = arith.addf %606, %615 : vector<16x128xf32>
      %c2_193 = arith.constant 2 : index
      %617 = memref.load %arg4[%c2_193] : memref<27xf32, #tpu.memory_space<smem>>
      %618 = vector.broadcast %617 : f32 to vector<16x128xf32>
      %619 = arith.mulf %618, %608 : vector<16x128xf32>
      %620 = arith.addf %607, %619 : vector<16x128xf32>
      %c24_194 = arith.constant 24 : index
      %c0_195 = arith.constant 0 : index
      %621 = vector.load %arg10[%c24_194, %c0_195] : memref<58x128xf32, #tpu.memory_space<vmem>>, vector<16x128xf32>
      %c3_196 = arith.constant 3 : index
      %622 = memref.load %arg4[%c3_196] : memref<27xf32, #tpu.memory_space<smem>>
      %623 = vector.broadcast %622 : f32 to vector<16x128xf32>
      %624 = arith.mulf %623, %621 : vector<16x128xf32>
      %625 = arith.addf %612, %624 : vector<16x128xf32>
      %c4_197 = arith.constant 4 : index
      %626 = memref.load %arg4[%c4_197] : memref<27xf32, #tpu.memory_space<smem>>
      %627 = vector.broadcast %626 : f32 to vector<16x128xf32>
      %628 = arith.mulf %627, %621 : vector<16x128xf32>
      %629 = arith.addf %616, %628 : vector<16x128xf32>
      %c5_198 = arith.constant 5 : index
      %630 = memref.load %arg4[%c5_198] : memref<27xf32, #tpu.memory_space<smem>>
      %631 = vector.broadcast %630 : f32 to vector<16x128xf32>
      %632 = arith.mulf %631, %621 : vector<16x128xf32>
      %633 = arith.addf %620, %632 : vector<16x128xf32>
      %c30_199 = arith.constant 30 : index
      %c0_200 = arith.constant 0 : index
      %634 = vector.load %arg10[%c30_199, %c0_200] : memref<58x128xf32, #tpu.memory_space<vmem>>, vector<16x128xf32>
      %c6_201 = arith.constant 6 : index
      %635 = memref.load %arg4[%c6_201] : memref<27xf32, #tpu.memory_space<smem>>
      %636 = vector.broadcast %635 : f32 to vector<16x128xf32>
      %637 = arith.mulf %636, %634 : vector<16x128xf32>
      %638 = arith.addf %625, %637 : vector<16x128xf32>
      %c7_202 = arith.constant 7 : index
      %639 = memref.load %arg4[%c7_202] : memref<27xf32, #tpu.memory_space<smem>>
      %640 = vector.broadcast %639 : f32 to vector<16x128xf32>
      %641 = arith.mulf %640, %634 : vector<16x128xf32>
      %642 = arith.addf %629, %641 : vector<16x128xf32>
      %c8_203 = arith.constant 8 : index
      %643 = memref.load %arg4[%c8_203] : memref<27xf32, #tpu.memory_space<smem>>
      %644 = vector.broadcast %643 : f32 to vector<16x128xf32>
      %645 = arith.mulf %644, %634 : vector<16x128xf32>
      %646 = arith.addf %633, %645 : vector<16x128xf32>
      %647 = arith.addf %604, %642 : vector<16x128xf32>
      %c6_i32 = arith.constant 6 : i32
      %648 = tpu.dynamic_rotate %638 by %c6_i32 dim 1 : vector<16x128xf32>, i32 -> vector<16x128xf32>
      %649 = arith.addf %647, %648 : vector<16x128xf32>
      %c122_i32 = arith.constant 122 : i32
      %650 = tpu.dynamic_rotate %646 by %c122_i32 dim 1 : vector<16x128xf32>, i32 -> vector<16x128xf32>
      %651 = arith.addf %649, %650 : vector<16x128xf32>
      %cst_204 = arith.constant 0.000000e+00 : f32
      %652 = vector.broadcast %cst_204 : f32 to vector<16x128xf32>
      %cst_205 = arith.constant 0.000000e+00 : f32
      %653 = vector.broadcast %cst_205 : f32 to vector<16x128xf32>
      %cst_206 = arith.constant 0.000000e+00 : f32
      %654 = vector.broadcast %cst_206 : f32 to vector<16x128xf32>
      %c12_207 = arith.constant 12 : index
      %c0_208 = arith.constant 0 : index
      %655 = vector.load %arg10[%c12_207, %c0_208] : memref<58x128xf32, #tpu.memory_space<vmem>>, vector<16x128xf32>
      %c9_209 = arith.constant 9 : index
      %656 = memref.load %arg4[%c9_209] : memref<27xf32, #tpu.memory_space<smem>>
      %657 = vector.broadcast %656 : f32 to vector<16x128xf32>
      %658 = arith.mulf %657, %655 : vector<16x128xf32>
      %659 = arith.addf %652, %658 : vector<16x128xf32>
      %c10_210 = arith.constant 10 : index
      %660 = memref.load %arg4[%c10_210] : memref<27xf32, #tpu.memory_space<smem>>
      %661 = vector.broadcast %660 : f32 to vector<16x128xf32>
      %662 = arith.mulf %661, %655 : vector<16x128xf32>
      %663 = arith.addf %653, %662 : vector<16x128xf32>
      %c11_211 = arith.constant 11 : index
      %664 = memref.load %arg4[%c11_211] : memref<27xf32, #tpu.memory_space<smem>>
      %665 = vector.broadcast %664 : f32 to vector<16x128xf32>
      %666 = arith.mulf %665, %655 : vector<16x128xf32>
      %667 = arith.addf %654, %666 : vector<16x128xf32>
      %c24_212 = arith.constant 24 : index
      %c0_213 = arith.constant 0 : index
      %668 = vector.load %arg10[%c24_212, %c0_213] : memref<58x128xf32, #tpu.memory_space<vmem>>, vector<16x128xf32>
      %c12_214 = arith.constant 12 : index
      %669 = memref.load %arg4[%c12_214] : memref<27xf32, #tpu.memory_space<smem>>
      %670 = vector.broadcast %669 : f32 to vector<16x128xf32>
      %671 = arith.mulf %670, %668 : vector<16x128xf32>
      %672 = arith.addf %659, %671 : vector<16x128xf32>
      %c13_215 = arith.constant 13 : index
      %673 = memref.load %arg4[%c13_215] : memref<27xf32, #tpu.memory_space<smem>>
      %674 = vector.broadcast %673 : f32 to vector<16x128xf32>
      %675 = arith.mulf %674, %668 : vector<16x128xf32>
      %676 = arith.addf %663, %675 : vector<16x128xf32>
      %c14_216 = arith.constant 14 : index
      %677 = memref.load %arg4[%c14_216] : memref<27xf32, #tpu.memory_space<smem>>
      %678 = vector.broadcast %677 : f32 to vector<16x128xf32>
      %679 = arith.mulf %678, %668 : vector<16x128xf32>
      %680 = arith.addf %667, %679 : vector<16x128xf32>
      %c36_217 = arith.constant 36 : index
      %c0_218 = arith.constant 0 : index
      %681 = vector.load %arg10[%c36_217, %c0_218] : memref<58x128xf32, #tpu.memory_space<vmem>>, vector<16x128xf32>
      %c15_219 = arith.constant 15 : index
      %682 = memref.load %arg4[%c15_219] : memref<27xf32, #tpu.memory_space<smem>>
      %683 = vector.broadcast %682 : f32 to vector<16x128xf32>
      %684 = arith.mulf %683, %681 : vector<16x128xf32>
      %685 = arith.addf %672, %684 : vector<16x128xf32>
      %c16_220 = arith.constant 16 : index
      %686 = memref.load %arg4[%c16_220] : memref<27xf32, #tpu.memory_space<smem>>
      %687 = vector.broadcast %686 : f32 to vector<16x128xf32>
      %688 = arith.mulf %687, %681 : vector<16x128xf32>
      %689 = arith.addf %676, %688 : vector<16x128xf32>
      %c17_221 = arith.constant 17 : index
      %690 = memref.load %arg4[%c17_221] : memref<27xf32, #tpu.memory_space<smem>>
      %691 = vector.broadcast %690 : f32 to vector<16x128xf32>
      %692 = arith.mulf %691, %681 : vector<16x128xf32>
      %693 = arith.addf %680, %692 : vector<16x128xf32>
      %694 = arith.addf %651, %689 : vector<16x128xf32>
      %c12_i32 = arith.constant 12 : i32
      %695 = tpu.dynamic_rotate %685 by %c12_i32 dim 1 : vector<16x128xf32>, i32 -> vector<16x128xf32>
      %696 = arith.addf %694, %695 : vector<16x128xf32>
      %c116_i32 = arith.constant 116 : i32
      %697 = tpu.dynamic_rotate %693 by %c116_i32 dim 1 : vector<16x128xf32>, i32 -> vector<16x128xf32>
      %698 = arith.addf %696, %697 : vector<16x128xf32>
      %cst_222 = arith.constant 0.000000e+00 : f32
      %699 = vector.broadcast %cst_222 : f32 to vector<16x128xf32>
      %cst_223 = arith.constant 0.000000e+00 : f32
      %700 = vector.broadcast %cst_223 : f32 to vector<16x128xf32>
      %cst_224 = arith.constant 0.000000e+00 : f32
      %701 = vector.broadcast %cst_224 : f32 to vector<16x128xf32>
      %c6_225 = arith.constant 6 : index
      %c0_226 = arith.constant 0 : index
      %702 = vector.load %arg10[%c6_225, %c0_226] : memref<58x128xf32, #tpu.memory_space<vmem>>, vector<16x128xf32>
      %c18_227 = arith.constant 18 : index
      %703 = memref.load %arg4[%c18_227] : memref<27xf32, #tpu.memory_space<smem>>
      %704 = vector.broadcast %703 : f32 to vector<16x128xf32>
      %705 = arith.mulf %704, %702 : vector<16x128xf32>
      %706 = arith.addf %699, %705 : vector<16x128xf32>
      %c19_228 = arith.constant 19 : index
      %707 = memref.load %arg4[%c19_228] : memref<27xf32, #tpu.memory_space<smem>>
      %708 = vector.broadcast %707 : f32 to vector<16x128xf32>
      %709 = arith.mulf %708, %702 : vector<16x128xf32>
      %710 = arith.addf %700, %709 : vector<16x128xf32>
      %c20_229 = arith.constant 20 : index
      %711 = memref.load %arg4[%c20_229] : memref<27xf32, #tpu.memory_space<smem>>
      %712 = vector.broadcast %711 : f32 to vector<16x128xf32>
      %713 = arith.mulf %712, %702 : vector<16x128xf32>
      %714 = arith.addf %701, %713 : vector<16x128xf32>
      %c24_230 = arith.constant 24 : index
      %c0_231 = arith.constant 0 : index
      %715 = vector.load %arg10[%c24_230, %c0_231] : memref<58x128xf32, #tpu.memory_space<vmem>>, vector<16x128xf32>
      %c21_232 = arith.constant 21 : index
      %716 = memref.load %arg4[%c21_232] : memref<27xf32, #tpu.memory_space<smem>>
      %717 = vector.broadcast %716 : f32 to vector<16x128xf32>
      %718 = arith.mulf %717, %715 : vector<16x128xf32>
      %719 = arith.addf %706, %718 : vector<16x128xf32>
      %c22_233 = arith.constant 22 : index
      %720 = memref.load %arg4[%c22_233] : memref<27xf32, #tpu.memory_space<smem>>
      %721 = vector.broadcast %720 : f32 to vector<16x128xf32>
      %722 = arith.mulf %721, %715 : vector<16x128xf32>
      %723 = arith.addf %710, %722 : vector<16x128xf32>
      %c23_234 = arith.constant 23 : index
      %724 = memref.load %arg4[%c23_234] : memref<27xf32, #tpu.memory_space<smem>>
      %725 = vector.broadcast %724 : f32 to vector<16x128xf32>
      %726 = arith.mulf %725, %715 : vector<16x128xf32>
      %727 = arith.addf %714, %726 : vector<16x128xf32>
      %c42_235 = arith.constant 42 : index
      %c0_236 = arith.constant 0 : index
      %728 = vector.load %arg10[%c42_235, %c0_236] : memref<58x128xf32, #tpu.memory_space<vmem>>, vector<16x128xf32>
      %c24_237 = arith.constant 24 : index
      %729 = memref.load %arg4[%c24_237] : memref<27xf32, #tpu.memory_space<smem>>
      %730 = vector.broadcast %729 : f32 to vector<16x128xf32>
      %731 = arith.mulf %730, %728 : vector<16x128xf32>
      %732 = arith.addf %719, %731 : vector<16x128xf32>
      %c25_238 = arith.constant 25 : index
      %733 = memref.load %arg4[%c25_238] : memref<27xf32, #tpu.memory_space<smem>>
      %734 = vector.broadcast %733 : f32 to vector<16x128xf32>
      %735 = arith.mulf %734, %728 : vector<16x128xf32>
      %736 = arith.addf %723, %735 : vector<16x128xf32>
      %c26_239 = arith.constant 26 : index
      %737 = memref.load %arg4[%c26_239] : memref<27xf32, #tpu.memory_space<smem>>
      %738 = vector.broadcast %737 : f32 to vector<16x128xf32>
      %739 = arith.mulf %738, %728 : vector<16x128xf32>
      %740 = arith.addf %727, %739 : vector<16x128xf32>
      %741 = arith.addf %698, %736 : vector<16x128xf32>
      %c18_i32 = arith.constant 18 : i32
      %742 = tpu.dynamic_rotate %732 by %c18_i32 dim 1 : vector<16x128xf32>, i32 -> vector<16x128xf32>
      %743 = arith.addf %741, %742 : vector<16x128xf32>
      %c110_i32 = arith.constant 110 : i32
      %744 = tpu.dynamic_rotate %740 by %c110_i32 dim 1 : vector<16x128xf32>, i32 -> vector<16x128xf32>
      %745 = arith.addf %743, %744 : vector<16x128xf32>
      %746 = vector.extract_strided_slice %745 {offsets = [0, 0], sizes = [16, 16], strides = [1, 1]} : vector<16x128xf32> to vector<16x16xf32>
      %747 = arith.addf %602, %746 : vector<16x16xf32>
      %748 = vector.broadcast %28 : f32 to vector<16x16xf32>
      %749 = arith.addf %747, %748 : vector<16x16xf32>
      %750 = arith.negf %749 : vector<16x16xf32>
      %751 = math.exp %750 : vector<16x16xf32>
      %cst_240 = arith.constant 1.000000e+00 : f32
      %752 = vector.broadcast %cst_240 : f32 to vector<16x16xf32>
      %753 = arith.addf %752, %751 : vector<16x16xf32>
      %754 = arith.divf %752, %753 : vector<16x16xf32>
      %c0_241 = arith.constant 0 : index
      %c0_242 = arith.constant 0 : index
      %c0_243 = arith.constant 0 : index
      %c0_244 = arith.constant 0 : index
      %755 = vector.load %arg6[%c0_241, %c0_242, %c0_243, %c0_244] : memref<1x1x16x16xf32, #tpu.memory_space<vmem>>, vector<1x1x16x16xf32>
      %756 = vector.shape_cast %755 : vector<1x1x16x16xf32> to vector<16x16xf32>
      %757 = vector.shape_cast %754 : vector<16x16xf32> to vector<1x1x16x16xf32>
      tpu.vector_store %arg6[%c0_241, %c0_242, %c0_243, %c0_244], %757 {strides = array<i32>} : memref<1x1x16x16xf32, #tpu.memory_space<vmem>>, vector<1x1x16x16xf32>,
    } else {
    }
    return
  }
  func.func @transform_0(%arg0: i32, %arg1: i32) -> (i32, i32, i32) {
    %c0_i32 = arith.constant 0 : i32
    %c0_i32_0 = arith.constant 0 : i32
    return %arg0, %arg1, %c0_i32 : i32, i32, i32
  }
  func.func @transform_1(%arg0: i32, %arg1: i32) -> i32 {
    %c0_i32 = arith.constant 0 : i32
    %c0_i32_0 = arith.constant 0 : i32
    return %c0_i32 : i32
  }
  func.func @transform_2(%arg0: i32, %arg1: i32) -> i32 {
    %c0_i32 = arith.constant 0 : i32
    %c0_i32_0 = arith.constant 0 : i32
    return %c0_i32 : i32
  }
  func.func @transform_3(%arg0: i32, %arg1: i32) -> i32 {
    %c0_i32 = arith.constant 0 : i32
    %c0_i32_0 = arith.constant 0 : i32
    return %c0_i32 : i32
  }
  func.func @transform_4(%arg0: i32, %arg1: i32) -> (i32, i32, i32, i32) {
    %c0_i32 = arith.constant 0 : i32
    %c0_i32_0 = arith.constant 0 : i32
    %c0_i32_1 = arith.constant 0 : i32
    %c0_i32_2 = arith.constant 0 : i32
    return %arg0, %c0_i32, %c0_i32_0, %c0_i32_1 : i32, i32, i32, i32
  }
}

</mosaic_0001>

<bundles_post_ra>
// kernel: tpu_custom_call.1
= control target key start
LH: loop header
LB: loop body
LE: loop exit
PB: predicated region body
PF: predicated region fallthrough
CT: control target
= control target key end

     0   :  { %s3580_s0 = inlined_call_operand.hbm [shape: f32[2,4,256], index: 0, kind: input, shape index: {}]   ;;  %s3581_s1 = inlined_call_operand.vmem [shape: f32[98], index: 1, kind: input, shape index: {}]   ;;  %s3582_s2 = inlined_call_operand.vmem [shape: f32[27], index: 2, kind: input, shape index: {}]   ;;  %s3583_s3 = inlined_call_operand.vmem [shape: f32[3], index: 3, kind: input, shape index: {}]   ;;  %s3584_s4 = inlined_call_operand.hbm [shape: f32[2,1,16,16], index: 4, kind: output, shape index: {}]  }
   0x1   :  { %3763 = sst [smem:[#allocation125_spill]] %s3580_s0 }
   0x2   :  { %3764 = sst [smem:[#allocation126_spill]] %s3581_s1 }
   0x3   :  { %3765 = sst [smem:[#allocation127_spill]] %s3582_s2 }
   0x4   :  { %3766 = sst [smem:[#allocation128_spill]] %s3583_s3 }
   0x5   :  { %3767 = sst [smem:[#allocation129_spill]] %s3584_s4 }
   0x6   :  { %9 = vsyncpa [#allocation7], 0 }
   0x7   :  { %11 = vsyncpa [#allocation7 + $0x1], 0 }
   0x8   :  { %12 = vsyncpa [#allocation9], 0 }
   0x9   :  { %13 = vsyncpa [#allocation12], 0 }
   0xa   :  { %14 = vsyncpa [#allocation8], 0 }
   0xb   :  { %16 = vsyncpa [#allocation8 + $0x1], 0  ;;  %s2088_s15 = smov 0   ;;  %s2090_s16 = smov 0  }
   0xc   :  { %s2092_s17 = smov 0   ;;  %s2094_s18 = smov 0  }
   0xd   :  { %s2096_s19 = smov 0   ;;  %s2098_s20 = smov 0  }
   0xe LB: > { %3768 = sst [smem:[#allocation19_spill]] %s2013_s15  ;;  %s1593_s21 = sadd.s32 4294967295, %s2033_s20   ;;  %s2033_s20 = sphi %s2098_s20, %s22_s20   ;;  %s2029_s19 = sphi %s2096_s19, %s4190_s19   ;;  %s2025_s18 = sphi %s2094_s18, %s4189_s18   ;;  %s2021_s17 = sphi %s2092_s17, %s4188_s17   ;;  %s2017_s16 = sphi %s2090_s16, %s4187_s16   ;;  %s2013_s15 = sphi %s2088_s15, %s4186_s15  }
   0xf   : > { %3769 = sst [smem:[#allocation20_spill]] %s2017_s16  ;;  %s1594_s22 = sadd.s32 4294967294, %s2033_s20  }
  0x10   : > { %3770 = sst [smem:[#allocation21_spill]] %s2021_s17  ;;  %p56_p0 = scmp.ne.s32.totalorder %s2017_s16, %s2013_s15 }
  0x11   : > { %3771 = sst [smem:[#allocation22_spill]] %s2025_s18  ;;  %p2122_p1 = scmp.eq.s32.totalorder %s1593_s21, 0 }
  0x12   : > { %3772 = sst [smem:[#allocation23_spill]] %s2029_s19  ;;  %p2126_p2 = scmp.eq.s32.totalorder %s1593_s21, 1 }
  0x13   : > { %3773 = sst [smem:[#allocation24_spill]] %s2033_s20  ;;  %p149_p3 = scmp.eq.s32.totalorder %s1594_s22, 1 }
  0x14   : > { %s3774_s23 = scalar_select %p2122_p1, 1, 0 }
  0x15   : > { %s3775_s24 = scalar_select %p2126_p2, 1, 0 }
  0x16   : > { %p2132_p4 = por %p2122_p1, %p56_p0  ;;  %p1595_p5 = scmp.ge.s32.totalorder %s2033_s20, 1 }
  0x17   : > { %p2137_p6 = por %p149_p3, %p56_p0  ;;  %p156_p7 = scmp.lt.s32.totalorder %s2033_s20, 3 }
  0x18   : > { %s3776_s25 = scalar_select %p2132_p4, 1, 0 }
  0x19   : > { %s3777_s26 = scalar_select %p2137_p6, 1, 0 }
  0x1a   : > { %s3779_s2 = sld [smem:[#allocation127_spill]]  ;;  %p2145_p8 = pnand %p1595_p5, %p156_p7 }
  0x1b   : > { %3778 = sst [smem:[#allocation25_spill]] %s3777_s26  ;;  %s3781_s1 = sld [smem:[#allocation126_spill]] }
  0x1c   : > { %s3780_s30 = scalar_select %p2145_p8, 1, 0 }
  0x1d   : > { %p1759_p10 = pneg %p2145_p8  ;;  %s3783_s3 = sld [smem:[#allocation128_spill]] }
  0x1f   : > { %p2157_p11 = pnand %p1759_p10, %p2122_p1 }
  0x20   : > { %s180_s29 = sshll.u32 %s3779_s2, 4  ;;  %s181_s29 = int_to_ptr.vmem [resolvable:$true] %s180_s29 }
  0x21   : > { %s169_s7 = sshll.u32 %s3781_s1, 4  ;;  %s1868_s12 = scalar_lea.vmem %s181_s29, 16  ;;  %s170_s7 = int_to_ptr.vmem [resolvable:$true] %s169_s7 }
  0x22   : > { %p1869_p12 = scmp.ne.s32.totalorder %s181_s29, %s1868_s12  ;;  %p1870_p13 = pneg %p2157_p11 }
  0x23   : > { %s191_s11 = sshll.u32 %s3783_s3, 4  ;;  %p1876_p5 = scmp.lt.s32.totalorder %s181_s29, %s181_s29  ;;  %s2164_s11 = int_to_ptr.vmem [resolvable:$true] %s191_s11 }
  0x24   : > { %p1871_p0 = pnand %p1870_p13, %p1869_p12  ;;  %p1877_p7 = scmp.lt.s32.totalorder %s1868_s12, %s1868_s12 }
  0x26   : > { %p1872_p3 = pneg %p1871_p0  ;;  %p1878_p10 = por %p1877_p7, %p1876_p5 }
  0x28   : > { %p1879_p9 = pnand %p1878_p10, %p1872_p3 }
  0x2a   : > { %1882 = shalt.err (!%p1879_p9)
}
  0x2b   : > { %s2035_s13 = smov [#allocation11]   ;;  %s1883_s14 = scalar_lea.vmem %s170_s7, 16 }
  0x2c   : > { %1765 = dma.vmem_to_smem (!%p2157_p11), %s181_s29, 16, %s2035_s13, [#allocation12]  }
  0x2d   : > { %p1884_p6 = scmp.ne.s32.totalorder %s170_s7, %s1883_s14  ;;  %p1891_p8 = scmp.lt.s32.totalorder %s170_s7, %s170_s7 }
  0x2e   : > { %p1892_p2 = scmp.lt.s32.totalorder %s1883_s14, %s1883_s14 }
  0x2f   : > { %p1886_p1 = pnand %p1884_p6, %p1870_p13 }
  0x30   : > { %p1893_p12 = por %p1892_p2, %p1891_p8 }
  0x31   : > { %p1887_p4 = pneg %p1886_p1 }
  0x33   : > { %p1894_p0 = pnand %p1893_p12, %p1887_p4 }
  0x35   : > { %1897 = shalt.err (!%p1894_p0)
}
  0x36   : > { %s2036_s21 = smov [#allocation10]   ;;  %s1898_s22 = scalar_lea.vmem %s2164_s11, 16 }
  0x37   : > { %1762 = dma.vmem_to_smem (!%p2157_p11), %s170_s7, 16, %s2036_s21, [#allocation9]  }
  0x38   : > { %p1899_p9 = scmp.ne.s32.totalorder %s2164_s11, %s1898_s22  ;;  %p1906_p1 = scmp.lt.s32.totalorder %s2164_s11, %s2164_s11 }
  0x39   : > { %p1907_p5 = scmp.lt.s32.totalorder %s1898_s22, %s1898_s22 }
  0x3a   : > { %p1901_p3 = pnand %p1899_p9, %p1870_p13 }
  0x3b   : > { %p1908_p2 = por %p1907_p5, %p1906_p1 }
  0x3c   : > { %p1902_p6 = pneg %p1901_p3 }
  0x3e   : > { %p1909_p4 = pnand %p1908_p2, %p1902_p6 }
  0x40   : > { %1912 = shalt.err (!%p1909_p4)
}
  0x41   : > { %s2037_s27 = smov [#allocation13]   ;;  %s43_s28 = sadd.s32 1, %s2021_s17 }
  0x42   : > { %1768 = dma.vmem_to_smem (!%p2157_p11), %s2164_s11, 16, %s2037_s27, [#allocation12]  }
  0x43   : > { %s34_s29 = sadd.s32 1, %s2029_s19  ;;  %p50_p8 = scmp.ne.s32.totalorder %s2021_s17, %s2017_s16 }
  0x44   : > { %p36_p13 = scmp.ge.s32.totalorder %s34_s29, 2  ;;  %p51_p7 = scmp.eq.s32.totalorder %s2033_s20, 0 }
  0x45   : > { %p3784_p10 = scmp.ne.s32.totalorder %s3775_s24, 0  ;;  %p1780_p0 = scmp.lt.s32.totalorder %s2033_s20, 2 }
  0x46   : > { %s4192_s29 = smov (%p36_p13, %s34_s29), 0  ;;  %p52_p9 = por %p51_p7, %p50_p8 }
  0x47   : > { %p2195_p12 = por %p3784_p10, %p50_p8  ;;  %3787 = sst [smem:[#allocation27_spill]] %s4192_s29 }
  0x48   : > { %s202_s6 = sand.u32 1, %s2021_s17   ;;  %s38_s7 = ssub.s32 %s2029_s19, %s4192_s29 }
  0x49   : > { %s3785_s5 = scalar_select %p2195_p12, 1, 0 }
  0x4a   : > { %p41_p3 = scmp.eq.s32.totalorder %s38_s7, 0  ;;  %s1600_s8 = sshll.u32 %s202_s6, 3 }
  0x4b   : > { %3786 = sst [smem:[#allocation26_spill]] %s3785_s5  ;;  %s1741_s9 = sshll.u32 %s2029_s19, 7 }
  0x4c   : > { %s2207_s10 = scalar_select %p41_p3, %s2021_s17, %s43_s28  }
  0x4d   : > { %s3789_s0 = sld [smem:[#allocation125_spill]]  ;;  %s206_s13 = scalar_lea.vmem [#allocation6], %s1600_s8 }
  0x4e   : > { %3788 = sst [smem:[#allocation28_spill]] %s2207_s10  ;;  %s216_s14 = sshll.u32 %s206_s13, 4  ;;  %s2214_s14 = int_to_ptr.vmem [resolvable:$true] %s216_s14 }
  0x4f   : > { %p2218_p11 = pnand %p1780_p0, %p52_p9  ;;  %s203_s22 = scalar_lea.sflag [#allocation7], %s202_s6 }
  0x51   : > { %p1915_p1 = pneg %p2218_p11 }
  0x53   : > { %s2212_s24 = scalar_lea.hbm %s3789_s0, %s1741_s9  ;;  %s1918_s8 = scalar_lea.hbm %s3789_s0, 256 }
  0x54   : > { %s1913_s27 = scalar_lea.hbm %s2212_s24, 128  ;;  %p1919_p4 = scmp.lt.u32.totalorder %s2212_s24, %s3789_s0 }
  0x55   : > { %p1914_p6 = scmp.ne.s32.totalorder %s2212_s24, %s1913_s27  ;;  %p1920_p8 = scmp.lt.u32.totalorder %s1918_s8, %s1913_s27 }
  0x56   : > { %p1922_p7 = scmp.lt.u32.totalorder %s1913_s27, %s2212_s24 }
  0x57   : > { %p1916_p5 = pnand %p1915_p1, %p1914_p6  ;;  %p1921_p13 = por %p1920_p8, %p1919_p4 }
  0x59   : > { %p1917_p2 = pneg %p1916_p5  ;;  %p1923_p10 = por %p1922_p7, %p1921_p13 }
  0x5b   : > { %p1924_p0 = pnand %p1923_p10, %p1917_p2 }
  0x5d   : > { %1927 = shalt.err (!%p1924_p0)
}
  0x5e   : > { %s1928_s6 = scalar_lea.vmem %s2214_s14, 128  ;;  %s2038_s12 = smov [#allocation6]  }
  0x5f   : > { %p1929_p9 = scmp.ne.s32.totalorder %s2214_s14, %s1928_s6  ;;  %s1933_s13 = sshll.u32 %s2038_s12, 4  ;;  %s1934_s13 = int_to_ptr.vmem [resolvable:$false] %s1933_s13 }
  0x60   : > { %s1935_s28 = scalar_lea.vmem %s1934_s13, 256  ;;  %p1936_p5 = scmp.lt.s32.totalorder %s2214_s14, %s1934_s13 }
  0x61   : > { %p1931_p3 = pnand %p1929_p9, %p1915_p1  ;;  %p1937_p4 = scmp.lt.s32.totalorder %s1935_s28, %s1928_s6 }
  0x63   : > { %p1932_p6 = pneg %p1931_p3  ;;  %p1938_p8 = por %p1937_p4, %p1936_p5 }
  0x65   : > { %p1939_p13 = pnand %p1938_p8, %p1932_p6 }
  0x67   : > { %1942 = shalt.err (!%p1939_p13)
}
  0x68   : > { %1772 = dma.hbm_to_vmem [thread:$0]  (!%p2218_p11), %s2212_s24, 128, %s2214_s14, %s203_s22  }
  0x69   : > { %p3791_p2 = scmp.ne.s32.totalorder %s3780_s30, 0 }
  0x6b   : > { %225 = sbr.rel (%p3791_p2) target bundleno = 748 (0x2ec), region = 36 }
  0x72   : > { %s2250_s27 = sand.u32 1, %s2017_s16   ;;  %p3793_p1 = scmp.ne.s32.totalorder %s3776_s25, 0 }
  0x73   : > { %3792 = sst [smem:[#allocation29_spill]] %s2250_s27  ;;  %s1604_s7 = sshll.u32 %s2250_s27, 3 }
  0x74   : > { %s228_s8 = scalar_lea.sflag [#allocation7], %s2250_s27  ;;  %s231_s9 = scalar_lea.vmem [#allocation6], %s1604_s7 }
  0x75   : > { %1996 = dma.done.wait (%p3793_p1), %s228_s8, 128  }
  0x76   : > { %1998 = vsyncadd (%p3793_p1), %s228_s8, 4294967168  ;;  %p3794_p7 = scmp.ne.s32.totalorder %s3774_s23, 0 }
  0x78   : > { %2000 = dma.done.wait (%p3794_p7), [#allocation9], 16  }
  0x79   : > { %2002 = vsyncadd (%p3794_p7), [#allocation9], 4294967280 }
  0x7a   : > { %2004 = dma.done.wait (%p3794_p7), [#allocation12], 32  }
  0x7b   : > { %2006 = vsyncadd (%p3794_p7), [#allocation12], 4294967264 }
  0x7c   : > { %248 = sfence }
  0x7d   : > { %v269_v0 = vld [vmem:[%s231_s9] sm:$0xff]  ;;  %vm273_vm0 = vcmask 1043456   ;;  %v2039_v12 = vmov 0.0   ;;  %v2040_v13 = vmov 1966171168   ;;  %v312_v15 = vlaneseq  ;;  %s2041_s23 = smov 96  }
  0x7e   : > { %v271_v1 = vcombine.high %v269_v0, %v269_v0  ;;  %v274_v2 = vsel %vm273_vm0, %v269_v0, 0.0  ;;  %v288_v3 = vsel %vm273_vm0, %v269_v0, -inf  ;;  %401 = vst [vmem:[#allocation4] sm:$0xff] %v2039_v12  ;;  %402 = vst [vmem:[#allocation4 + $0x20] sm:$0xff] %v2039_v12  ;;  %v310_v14 = vunpack.c.l.s4 %v2040_v13  ;;  %s2042_s25 = smov 112   ;;  %s2043_s30 = smov 64  }
  0x7f   : > { %v275_v4 = vrot.slane %v274_v2, 4  ;;  %v289_v5 = vrot.slane %v288_v3, 4  ;;  %403 = vst [vmem:[#allocation4 + $0x18] sm:$0xff] %v2039_v12  ;;  %404 = vst [vmem:[#allocation4 + $0x38] sm:$0xff] %v2039_v12  ;;  %vm405_vm1 = vcmask 1047680   ;;  %v313_v25 = vshrl.u32 %v312_v15, 7 }
  0x80   : > { %v295_v6 = vsel %vm273_vm0, %v271_v1, -inf  ;;  %v281_v7 = vsel %vm273_vm0, %v271_v1, 0.0  ;;  %410 = vst [vmem:[#allocation5] sm:$0xff] %v2039_v12  ;;  %411 = vst [vmem:[#allocation5 + $0x8] sm:$0xff] %v2039_v12  ;;  %v311_v24 = vunpack.c.0.s8 %v310_v14  ;;  %vm326_vm2 = vcmp.lt.s32.totalorder %v312_v15, 256  ;;  %s2044_s24 = smov 80  }
  0x81   : > { %v276_v8 = vadd.f32 %v275_v4, %v274_v2  ;;  %v290_v9 = vmax.f32 %v288_v3, %v289_v5  ;;  %v296_v10 = vrot.slane %v295_v6, 4  ;;  %v282_v11 = vrot.slane %v281_v7, 4  ;;  %412 = vst [vmem:[#allocation5 + $0x10] sm:$0xff] %v2039_v12  ;;  %413 = vst [vmem:[#allocation5 + $0x28] sm:$0xff] %v2039_v12  ;;  %s2045_s14 = smov 16   ;;  %s2046_s21 = smov 48  }
  0x82   : > { %414 = vst [vmem:[#allocation5 + $0x30] sm:$0xff] %v2039_v12  ;;  %415 = vst [vmem:[#allocation5 + $0x38] sm:$0x3] %v2039_v12  ;;  %v314_v35 = vsub.s32 %v311_v24, %v313_v25  ;;  %vm426_vm3 = vcmask 122880   ;;  %v433_v48 = vsub.s32 0, %v313_v25  ;;  %s2047_s22 = smov 32  }
  0x83   : > { %v277_v16 = vrot.slane %v276_v8, 2  ;;  %v291_v17 = vrot.slane %v290_v9, 2  ;;  %v297_v18 = vmax.f32 %v295_v6, %v296_v10  ;;  %v283_v19 = vadd.f32 %v282_v11, %v281_v7  ;;  %409 = vst.msk [vmem:[#allocation4 + $0x30] sm:$0xff] %vm405_vm1, %v2039_v12  ;;  %406 = vst.msk [vmem:[#allocation4 + $0x8] sm:$0xff] %vm405_vm1, %v2039_v12  ;;  %s2278_s11 = sld [smem:[#allocation10 + $0x15]]  ;;  %s2280_s6 = sld [smem:[#allocation10 + $0x1c]] }
  0x84   : > { %407 = vst.msk [vmem:[#allocation4 + $0x10] sm:$0xff] %vm405_vm1, %v2039_v12  ;;  %408 = vst.msk [vmem:[#allocation4 + $0x28] sm:$0xff] %vm405_vm1, %v2039_v12  ;;  %s2282_s12 = sld [smem:[#allocation10 + $0x23]]  ;;  %s2284_s13 = sld [smem:[#allocation10 + $0x2a]]  ;;  %vm1224_vm4 = vcmask 130048  }
  0x85   : > { %416 = vst.msk [vmem:[#allocation5 + $0x18] sm:$0xff] %vm405_vm1, %v2039_v12  ;;  %417 = vst.msk [vmem:[#allocation5 + $0x20] sm:$0xff] %vm405_vm1, %v2039_v12  ;;  %v278_v20 = vadd.f32 %v277_v16, %v276_v8  ;;  %v292_v21 = vmax.f32 %v290_v9, %v291_v17  ;;  %v298_v22 = vrot.slane %v297_v18, 2  ;;  %v284_v23 = vrot.slane %v283_v19, 2  ;;  %s2286_s28 = sld [smem:[#allocation10 + $0x16]]  ;;  %s2288_s7 = sld [smem:[#allocation10 + $0x1d]] }
  0x86   : > { %s2290_s8 = sld [smem:[#allocation10 + $0x24]]  ;;  %s2292_s9 = sld [smem:[#allocation10 + $0x2b]] }
  0x87   : > { %v279_v26 = vrot.slane %v278_v20, 1  ;;  %v293_v27 = vrot.slane %v292_v21, 1  ;;  %v299_v28 = vmax.f32 %v297_v18, %v298_v22  ;;  %v285_v29 = vadd.f32 %v284_v23, %v283_v19  ;;  %s2308_s0 = sld [smem:[#allocation10 + $0x8]]  ;;  %s2310_s1 = sld [smem:[#allocation10 + $0x2]] }
  0x88   : > { %s2312_s2 = sld [smem:[#allocation10 + $0x9]]  ;;  %s2314_s3 = sld [smem:[#allocation10 + $0xe]] }
  0x89   : > { %v280_v30 = vadd.f32 %v279_v26, %v278_v20  ;;  %v294_v31 = vmax.f32 %v292_v21, %v293_v27  ;;  %v300_v32 = vrot.slane %v299_v28, 1  ;;  %v286_v33 = vrot.slane %v285_v29, 1  ;;  %3795 = sst [smem:[#allocation30_spill]] %s2278_s11  ;;  %s2316_s29 = sld [smem:[#allocation10 + $0xf]] }
  0x8a   : > { %3796 = sst [smem:[#allocation31_spill]] %s2280_s6  ;;  %s2318_s19 = sld [smem:[#allocation10 + $0x10]]  ;;  %v707_v63 = vstv %s2278_s11  ;;  %v751_v0 = vstv %s2280_s6  ;;  %v795_v1 = vstv %s2282_s12  ;;  %v839_v2 = vstv %s2284_s13 }
  0x8b   : > { %v301_v34 = vmax.f32 %v299_v28, %v300_v32  ;;  %v287_v36 = vadd.f32 %v286_v33, %v285_v29  ;;  %3797 = sst [smem:[#allocation32_spill]] %s2282_s12  ;;  %s2320_s10 = sld [smem:[#allocation10 + $0x19]]  ;;  %v713_v3 = vstv %s2286_s28  ;;  %v757_v4 = vstv %s2288_s7 }
  0x8c   : > { %3798 = sst [smem:[#allocation33_spill]] %s2284_s13  ;;  %s2322_s17 = sld [smem:[#allocation10 + $0x31]]  ;;  %v801_v5 = vstv %s2290_s8  ;;  %v845_v6 = vstv %s2292_s9 }
  0x8d   : > { %v331_v37 = vcombine.low %v294_v31, %v301_v34  ;;  %v308_v38 = vcombine.low %v280_v30, %v287_v36  ;;  %3799 = sst [smem:[#allocation34_spill]] %s2286_s28  ;;  %s2324_s16 = sld [smem:[#allocation10 + $0x20]]  ;;  %v3754_v18 = vstv %s2308_s0  ;;  %v3749_v19 = vstv %s2310_s1 }
  0x8e   : > { %3800 = sst [smem:[#allocation35_spill]] %s2288_s7  ;;  %s2326_s20 = sld [smem:[#allocation10 + $0x32]]  ;;  %v3748_v20 = vstv %s2312_s2  ;;  %v663_v21 = vstv %s2314_s3 }
  0x8f   : > { %v338_v39 = vrot.slane %v331_v37, %v314_v35  ;;  %v315_v40 = vrot.slane %v308_v38, %v314_v35  ;;  %3801 = sst [smem:[#allocation36_spill]] %s2290_s8  ;;  %s2328_s26 = sld [smem:[#allocation10 + $0x27]]  ;;  %v3751_v22 = vstv %s2316_s29 }
  0x90   : > { %3802 = sst [smem:[#allocation37_spill]] %s2292_s9  ;;  %s2330_s15 = sld [smem:[#allocation10 + $0x4]] }
  0x91   : > { %v345_v41 = vrot.slane %v338_v39, %v314_v35  ;;  %v322_v42 = vrot.slane %v315_v40, %v314_v35  ;;  %3810 = sst [smem:[#allocation45_spill]] %s2308_s0  ;;  %s2332_s4 = sld [smem:[#allocation10 + $0xb]] }
  0x92   : > { %3811 = sst [smem:[#allocation46_spill]] %s2310_s1  ;;  %s2334_s5 = sld [smem:[#allocation10 + $0x38]] }
  0x93   : > { %347 = vst.msk [vmem:[#allocation3] sm:$0x3] %vm326_vm2, %v345_v41  ;;  %328 = vst.msk [vmem:[#allocation2] sm:$0x3] %vm326_vm2, %v322_v42  ;;  %3812 = sst [smem:[#allocation47_spill]] %s2312_s2  ;;  %s2336_s18 = sld [smem:[#allocation10 + $0x3f]] }
  0x94   : > { %3813 = sst [smem:[#allocation48_spill]] %s2314_s3  ;;  %s2338_s27 = sld [smem:[#allocation10 + $0x39]] }
  0x95   : > { %3814 = sst [smem:[#allocation49_spill]] %s2316_s29  ;;  %s2416_s6 = sld [smem:[#allocation10 + $0x22]] }
  0x96   : > { %3815 = sst [smem:[#allocation50_spill]] %s2318_s19  ;;  %s2340_s19 = sld [smem:[#allocation10 + $0x40]] }
  0x97   : > { %3816 = sst [smem:[#allocation51_spill]] %s2320_s10  ;;  %s2342_s10 = sld [smem:[#allocation10 + $0x33]] }
  0x98   : > { %3817 = sst [smem:[#allocation52_spill]] %s2322_s17  ;;  %s2344_s17 = sld [smem:[#allocation10 + $0x12]] }
  0x99   : > { %3818 = sst [smem:[#allocation53_spill]] %s2324_s16  ;;  %s2346_s16 = sld [smem:[#allocation10 + $0x46]] }
  0x9a   : > { %v425_v43 = vld [vmem:[#allocation3] sm:$0x3]  ;;  %v423_v44 = vld [vmem:[#allocation2] sm:$0x3]  ;;  %3819 = sst [smem:[#allocation54_spill]] %s2326_s20  ;;  %s2348_s20 = sld [smem:[#allocation10 + $0x4d]] }
  0x9b   : > { %517 = vrot.lane.b32.xlu1 %v425_v43, %s2041_s23  ;;  %507 = vrot.lane.b32.xlu0 %v425_v43, %s2042_s25  ;;  %v424_v45 = vmul.f32 0.25, %v423_v44  ;;  %v499_v46 = vrot.slane %v425_v43, 1  ;;  %429 = vst.msk [vmem:[#allocation4 + $0x28] sm:$0x1] %vm426_vm3, %v425_v43  ;;  %v443_v50 = vrot.slane %v425_v43, %v433_v48  ;;  %3820 = sst [smem:[#allocation55_spill]] %s2328_s26  ;;  %s2418_s12 = sld [smem:[#allocation10 + $0x29]] }
  0x9c   : > { %3821 = sst [smem:[#allocation56_spill]] %s2330_s15  ;;  %s2350_s26 = sld [smem:[#allocation10 + $0x54]] }
  0x9d   : > { %501 = vst.msk [vmem:[#allocation4 + $0x30] sm:$0x1] %vm426_vm3, %v499_v46  ;;  %427 = vst.msk [vmem:[#allocation4 + $0x8] sm:$0x1] %vm426_vm3, %v424_v45  ;;  %v496_v47 = vrot.slane %v424_v45, 1  ;;  %v434_v49 = vrot.slane %v424_v45, %v433_v48  ;;  %3822 = sst [smem:[#allocation57_spill]] %s2332_s4 }
  0x9e   : > { %3823 = sst [smem:[#allocation58_spill]] %s2334_s5  ;;  %s2352_s15 = sld [smem:[#allocation10 + $0x5b]] }
  0x9f   : > { %537 = vrot.lane.b32.xlu1 %v425_v43, %s2043_s30  ;;  %527 = vrot.lane.b32.xlu0 %v425_v43, %s2044_s24  ;;  %498 = vst.msk [vmem:[#allocation4 + $0x10] sm:$0x1] %vm426_vm3, %v496_v47  ;;  %3824 = sst [smem:[#allocation59_spill]] %s2336_s18  ;;  %s2354_s4 = sld [smem:[#allocation10 + $0x47]] }
  0xa0   : > { %3825 = sst [smem:[#allocation60_spill]] %s2338_s27  ;;  %s2356_s5 = sld [smem:[#allocation10 + $0x4e]] }
  0xa1   : > { %3826 = sst [smem:[#allocation61_spill]] %s2340_s19  ;;  %s2358_s27 = sld [smem:[#allocation10 + $0x55]] }
  0xa2   : > { %3827 = sst [smem:[#allocation62_spill]] %s2342_s10  ;;  %s2360_s19 = sld [smem:[#allocation10 + $0x5c]] }
  0xa3   : > { %522 = vrot.lane.b32.xlu1 %v424_v45, %s2044_s24  ;;  %502 = vrot.lane.b32.xlu0 %v424_v45, %s2042_s25  ;;  %3828 = sst [smem:[#allocation63_spill]] %s2344_s17  ;;  %s2362_s17 = sld [smem:[#allocation10 + $0x3a]] }
  0xa4   : > { %3829 = sst [smem:[#allocation64_spill]] %s2346_s16  ;;  %s2364_s10 = sld [smem:[#allocation10 + $0x41]] }
  0xa5   : > { %3830 = sst [smem:[#allocation65_spill]] %s2348_s20  ;;  %s2366_s20 = sld [smem:[#allocation10 + $0x48]] }
  0xa6   : > { %3831 = sst [smem:[#allocation66_spill]] %s2350_s26  ;;  %s2368_s26 = sld [smem:[#allocation10 + $0x2e]] }
  0xa7   : > { %532 = vrot.lane.b32.xlu1 %v424_v45, %s2043_s30  ;;  %512 = vrot.lane.b32.xlu0 %v424_v45, %s2041_s23  ;;  %3832 = sst [smem:[#allocation67_spill]] %s2352_s15  ;;  %s2424_s28 = sld [smem:[#allocation10 + $0x4a]] }
  0xa8   : > { %3833 = sst [smem:[#allocation68_spill]] %s2354_s4  ;;  %s2374_s4 = sld [smem:[#allocation10 + $0x56]] }
  0xa9   : > { %3834 = sst [smem:[#allocation69_spill]] %s2356_s5  ;;  %s2372_s5 = sld [smem:[#allocation10 + $0x4f]] }
  0xaa   : > { %3835 = sst [smem:[#allocation70_spill]] %s2358_s27  ;;  %s2378_s27 = sld [smem:[#allocation10 + $0x5]] }
  0xab   : > { %562 = vrot.lane.b32.xlu1 %v424_v45, %s2045_s14  ;;  %542 = vrot.lane.b32.xlu0 %v424_v45, %s2046_s21  ;;  %3836 = sst [smem:[#allocation71_spill]] %s2360_s19  ;;  %s2376_s19 = sld [smem:[#allocation10 + $0x5d]] }
  0xac   : > { %3837 = sst [smem:[#allocation72_spill]] %s2362_s17  ;;  %s2426_s7 = sld [smem:[#allocation10 + $0x30]] }
  0xad   : > { %3838 = sst [smem:[#allocation73_spill]] %s2364_s10  ;;  %s2380_s10 = sld [smem:[#allocation10 + $0xc]] }
  0xae   : > { %3839 = sst [smem:[#allocation74_spill]] %s2366_s20  ;;  %s2384_s20 = sld [smem:[#allocation10 + $0x21]] }
  0xaf   : > { %552 = vrot.lane.b32.xlu0 %v424_v45, %s2047_s22  ;;  %435 = vrot.lane.b32.xlu1 %v434_v49, %s2042_s25  ;;  %3840 = sst [smem:[#allocation75_spill]] %s2368_s26  ;;  %s2382_s26 = sld [smem:[#allocation10 + $0x1a]] }
  0xb0   : > { %3841 = sst [smem:[#allocation76_spill]] %s2372_s5  ;;  %s2386_s5 = sld [smem:[#allocation10 + $0x28]] }
  0xb1   : > { %3842 = sst [smem:[#allocation77_spill]] %s2374_s4  ;;  %s3860_s9 = sld [smem:[#allocation50_spill]] }
  0xb2   : > { %3843 = sst [smem:[#allocation78_spill]] %s2376_s19  ;;  %s2390_s19 = sld [smem:[#allocation10 + $0x35]] }
  0xb3   : > { %448 = vrot.lane.b32.xlu0 %v434_v49, %s2041_s23  ;;  %456 = vrot.lane.b32.xlu1 %v434_v49, %s2044_s24  ;;  %3844 = sst [smem:[#allocation79_spill]] %s2378_s27  ;;  %s2392_s27 = sld [smem:[#allocation10 + $0x2f]] }
  0xb4   : > { %3845 = sst [smem:[#allocation80_spill]] %s2380_s10  ;;  %s3861_s8 = sld [smem:[#allocation51_spill]] }
  0xb5   : > { %3846 = sst [smem:[#allocation81_spill]] %s2382_s26  ;;  %s2394_s26 = sld [smem:[#allocation10 + $0x13]] }
  0xb6   : > { %3847 = sst [smem:[#allocation82_spill]] %s2384_s20  ;;  %s2396_s20 = sld [smem:[#allocation10 + $0x6]] }
  0xb7   : > { %464 = vrot.lane.b32.xlu0 %v434_v49, %s2043_s30  ;;  %472 = vrot.lane.b32.xlu1 %v434_v49, %s2046_s21  ;;  %3848 = sst [smem:[#allocation83_spill]] %s2386_s5  ;;  %s2398_s5 = sld [smem:[#allocation10 + $0x3c]]  ;;  %v3759_v23 = vstv %s3860_s9 }
  0xb8   : > { %3849 = sst [smem:[#allocation84_spill]] %s2390_s19  ;;  %s2400_s10 = sld [smem:[#allocation10 + $0xd]] }
  0xb9   : > { %3850 = sst [smem:[#allocation85_spill]] %s2392_s27  ;;  %s2406_s19 = sld [smem:[#allocation10 + $0x43]] }
  0xba   : > { %3857 = sst [smem:[#allocation92_spill]] %s2416_s6  ;;  %s2432_s11 = sld [smem:[#allocation10 + $0x58]]  ;;  %v3738_v24 = vstv %s3861_s8 }
  0xbb   : > { %480 = vrot.lane.b32.xlu0 %v434_v49, %s2047_s22  ;;  %488 = vrot.lane.b32.xlu1 %v434_v49, %s2045_s14  ;;  %3851 = sst [smem:[#allocation86_spill]] %s2394_s26  ;;  %s2430_s13 = sld [smem:[#allocation10 + $0x51]] }
  0xbc   : > { %3852 = sst [smem:[#allocation87_spill]] %s2396_s20  ;;  %s2408_s26 = sld [smem:[#allocation10 + $0x1b]] }
  0xbd   : > { %3853 = sst [smem:[#allocation88_spill]] %s2398_s5  ;;  %s2456_s3 = sld [smem:[#allocation10 + $0x44]] }
  0xbe   : > { %3854 = sst [smem:[#allocation89_spill]] %s2400_s10  ;;  %s2448_s0 = sld [smem:[#allocation10 + $0x3d]] }
  0xbf   : > { %444 = vrot.lane.b32.xlu0 %v443_v50, %s2042_s25  ;;  %452 = vrot.lane.b32.xlu1 %v443_v50, %s2041_s23  ;;  %s2294_s23 = sld [smem:[#allocation10 + $0x17]]  ;;  %s2296_s25 = sld [smem:[#allocation10 + $0x1e]] }
  0xc0   : > { %3855 = sst [smem:[#allocation90_spill]] %s2406_s19  ;;  %s2458_s29 = sld [smem:[#allocation10 + $0x4b]] }
  0xc1   : > { %3858 = sst [smem:[#allocation93_spill]] %s2418_s12  ;;  %s2440_s12 = sld [smem:[#allocation10 + $0x36]] }
  0xc2   : > { %3856 = sst [smem:[#allocation91_spill]] %s2408_s26  ;;  %s2480_s18 = sld [smem:[#allocation10 + $0x37]] }
  0xc3   : > { %460 = vrot.lane.b32.xlu0 %v443_v50, %s2044_s24  ;;  %468 = vrot.lane.b32.xlu1 %v443_v50, %s2043_s30  ;;  %s2298_s30 = sld [smem:[#allocation10 + $0x25]]  ;;  %s2300_s24 = sld [smem:[#allocation10 + $0x2c]] }
  0xc4   : > { %3859 = sst [smem:[#allocation94_spill]] %s2426_s7  ;;  %s2438_s7 = sld [smem:[#allocation10 + $0x5f]] }
  0xc5   : > { %3803 = sst [smem:[#allocation38_spill]] %s2294_s23  ;;  %v719_v9 = vstv %s2294_s23  ;;  %v763_v10 = vstv %s2296_s25  ;;  %s3867_s23 = sld [smem:[#allocation55_spill]] }
  0xc6   : > { %3804 = sst [smem:[#allocation39_spill]] %s2296_s25  ;;  %s2482_s2 = sld [smem:[#allocation10 + $0x18]] }
  0xc7   : > { %476 = vrot.lane.b32.xlu0 %v443_v50, %s2046_s21  ;;  %484 = vrot.lane.b32.xlu1 %v443_v50, %s2047_s22  ;;  %3862 = sst [smem:[#allocation95_spill]] %s2430_s13  ;;  %s2488_s16 = sld [smem:[#allocation10 + $0x1f]] }
  0xc8   : > { %3863 = sst [smem:[#allocation96_spill]] %s2432_s11  ;;  %s2490_s9 = sld [smem:[#allocation10 + $0x26]] }
  0xc9   : > { %3805 = sst [smem:[#allocation40_spill]] %s2298_s30  ;;  %v3747_v11 = vstv %s2298_s30  ;;  %v3737_v12 = vstv %s2300_s24  ;;  %s3866_s30 = sld [smem:[#allocation53_spill]] }
  0xca   : > { %3806 = sst [smem:[#allocation41_spill]] %s2300_s24  ;;  %s2498_s24 = sld [smem:[#allocation10 + $0x2d]] }
  0xcb   : > { %492 = vrot.lane.b32.xlu0 %v443_v50, %s2045_s14  ;;  %547 = vrot.lane.b32.xlu1 %v425_v43, %s2046_s21  ;;  %s2304_s21 = sld [smem:[#allocation10 + $0x7]]  ;;  %3868 = sst [smem:[#allocation97_spill]] %s2438_s7  ;;  %v3742_v30 = vstv %s3867_s23 }
  0xcc   : > { %3869 = sst [smem:[#allocation98_spill]] %s2440_s12  ;;  %s2464_s7 = sld [smem:[#allocation10 + $0x59]] }
  0xcd   : > { %3872 = sst [smem:[#allocation99_spill]] %s2448_s0  ;;  %s3904_s15 = sld [smem:[#allocation81_spill]] }
  0xce   : > { %3877 = sst [smem:[#allocation101_spill]] %s2456_s3  ;;  %s3905_s23 = sld [smem:[#allocation82_spill]] }
  0xcf   : > { %557 = vrot.lane.b32.xlu0 %v425_v43, %s2047_s22  ;;  %567 = vrot.lane.b32.xlu1 %v425_v43, %s2045_s14  ;;  %s2302_s14 = sld [smem:[#allocation10]]  ;;  %s2306_s22 = sld [smem:[#allocation10 + $0x1]]  ;;  %v3739_v29 = vstv %s3866_s30 }
  0xd0   : > { %3878 = sst [smem:[#allocation102_spill]] %s2458_s29  ;;  %s2470_s30 = sld [smem:[#allocation10 + $0x60]] }
  0xd1   : > { %3808 = sst [smem:[#allocation43_spill]] %s2304_s21  ;;  %v619_v16 = vstv %s2304_s21  ;;  %s3870_s21 = sld [smem:[#allocation56_spill]] }
  0xd2   : > { %3883 = sst [smem:[#allocation104_spill]] %s2464_s7  ;;  %s2472_s29 = sld [smem:[#allocation10 + $0x3]] }
  0xd3   : > { %3891 = sst [smem:[#allocation107_spill]] %s2480_s18  ;;  %s2496_s18 = sld [smem:[#allocation10 + $0x3e]] }
  0xd4   : > { %3892 = sst [smem:[#allocation108_spill]] %s2482_s2  ;;  %s3906_s25 = sld [smem:[#allocation83_spill]] }
  0xd5   : > { %3807 = sst [smem:[#allocation42_spill]] %s2302_s14  ;;  %v575_v15 = vstv %s2302_s14  ;;  %v3756_v17 = vstv %s2306_s22  ;;  %s3871_s14 = sld [smem:[#allocation57_spill]] }
  0xd6   : > { %3809 = sst [smem:[#allocation44_spill]] %s2306_s22  ;;  %s2450_s22 = sld [smem:[#allocation10 + $0x14]] }
  0xd7   : > { %v3758_v33 = vstv %s3870_s21  ;;  %3887 = sst [smem:[#allocation105_spill]] %s2470_s30  ;;  %s3896_s30 = sld [smem:[#allocation75_spill]] }
  0xd8   : > { %3888 = sst [smem:[#allocation106_spill]] %s2472_s29  ;;  %s2513_s12 = sld [smem:[#allocation10 + $0x4c]] }
  0xd9   : > { %3897 = sst [smem:[#allocation109_spill]] %s2488_s16  ;;  %s2515_s1 = sld [smem:[#allocation10 + $0x53]] }
  0xda   : > { %3898 = sst [smem:[#allocation110_spill]] %s2490_s9  ;;  %s2504_s9 = sld [smem:[#allocation10 + $0x45]] }
  0xdb   : > { %v3757_v34 = vstv %s3871_s14  ;;  %3902 = sst [smem:[#allocation111_spill]] %s2496_s18  ;;  %s2506_s16 = sld [smem:[#allocation10 + $0xa]] }
  0xdc   : > { %3874 = sst [smem:[#allocation100_spill]] %s2450_s22  ;;  %s2462_s22 = sld [smem:[#allocation10 + $0x52]] }
  0xdd   : > { %3903 = sst [smem:[#allocation112_spill]] %s2498_s24  ;;  %s2521_s8 = sld [smem:[#allocation10 + $0x5a]] }
  0xde   : > { %3911 = sst [smem:[#allocation115_spill]] %s2513_s12  ;;  %s2523_s0 = sld [smem:[#allocation10 + $0x61]] }
  0xdf   : > { %3912 = sst [smem:[#allocation116_spill]] %s2515_s1  ;;  %s3915_s2 = sld [smem:[#allocation93_spill]] }
  0xe0   : > { %3907 = sst [smem:[#allocation113_spill]] %s2504_s9  ;;  %s2531_s17 = sld [smem:[#allocation10 + $0x11]] }
  0xe1   : > { %3908 = sst [smem:[#allocation114_spill]] %s2506_s16  ;;  %s2541_s14 = sld [smem:[#allocation10 + $0x42]] }
  0xe2   : > { %3882 = sst [smem:[#allocation103_spill]] %s2462_s22  ;;  %s3949_s22 = sld [smem:[#allocation41_spill]] }
  0xe3   : > { %3913 = sst [smem:[#allocation117_spill]] %s2521_s8  ;;  %s3945_s8 = sld [smem:[#allocation44_spill]] }
  0xe4   : > { %3914 = sst [smem:[#allocation118_spill]] %s2523_s0  ;;  %s3946_s0 = sld [smem:[#allocation45_spill]] }
  0xe5   : > { %s3951_s1 = sld [smem:[#allocation53_spill]]  ;;  %s3952_s9 = sld [smem:[#allocation55_spill]] }
  0xe6   : > { %3918 = sst [smem:[#allocation93_spill]] %s2531_s17  ;;  %s3950_s17 = sld [smem:[#allocation51_spill]] }
  0xe7   : > { %3925 = sst [smem:[#allocation121_spill]] %s2541_s14  ;;  %s3948_s14 = sld [smem:[#allocation40_spill]] }
  0xe8   : > { %s3953_s18 = sld [smem:[#allocation75_spill]]  ;;  %s3954_s3 = sld [smem:[#allocation81_spill]] }
  0xe9   : > { %s3958_s29 = sld [smem:[#allocation49_spill]]  ;;  %s3959_s11 = sld [smem:[#allocation82_spill]] }
  0xea   : > { %s3960_s13 = sld [smem:[#allocation83_spill]]  ;;  %s3964_s16 = sld [smem:[#allocation50_spill]] }
  0xeb   : > { %s3965_s12 = sld [smem:[#allocation56_spill]]  ;;  %s3966_s4 = sld [smem:[#allocation57_spill]] }
  0xec   : > { %s3967_s19 = sld [smem:[#allocation52_spill]]  ;;  %s3968_s20 = sld [smem:[#allocation54_spill]] }
  0xed   : > { %s3969_s5 = sld [smem:[#allocation63_spill]]  ;;  %s3972_s10 = sld [smem:[#allocation58_spill]] }
  0xee   : > { %s3979_s6 = sld [smem:[#allocation61_spill]]  ;;  %s3981_s7 = sld [smem:[#allocation62_spill]] }
  0xef   : > { %s3991_s24 = sld [smem:[#allocation72_spill]]  ;;  %s3997_s21 = sld [smem:[#allocation73_spill]] }
 0x10d   : > { %v518_v51 = vpop.permute.xlu1 %517  ;;  %v508_v52 = vpop.permute.xlu0 %507 }
 0x10e   : > { %v519_v53 = vrot.slane %v518_v51, 1  ;;  %v509_v54 = vrot.slane %v508_v52, 1 }
 0x110   : > { %521 = vst.msk [vmem:[#allocation4 + $0x32] sm:$0x1] %vm426_vm3, %v519_v53  ;;  %511 = vst.msk [vmem:[#allocation4 + $0x31] sm:$0x1] %vm426_vm3, %v509_v54 }
 0x111   : > { %v538_v55 = vpop.permute.xlu1 %537  ;;  %v528_v56 = vpop.permute.xlu0 %527 }
 0x112   : > { %v539_v57 = vrot.slane %v538_v55, 1  ;;  %v529_v58 = vrot.slane %v528_v56, 1  ;;  %v3745_v56 = vstv %s3896_s30  ;;  %s2539_s30 = sld [smem:[#allocation10 + $0x3b]] }
 0x114   : > { %541 = vst.msk [vmem:[#allocation4 + $0x34] sm:$0x1] %vm426_vm3, %v539_v57  ;;  %531 = vst.msk [vmem:[#allocation4 + $0x33] sm:$0x1] %vm426_vm3, %v529_v58 }
 0x115   : > { %v523_v59 = vpop.permute.xlu1 %522  ;;  %v503_v60 = vpop.permute.xlu0 %502 }
 0x116   : > { %v524_v61 = vrot.slane %v523_v59, 1  ;;  %v504_v62 = vrot.slane %v503_v60, 1 }
 0x118   : > { %526 = vst.msk [vmem:[#allocation4 + $0x13] sm:$0x1] %vm426_vm3, %v524_v61  ;;  %506 = vst.msk [vmem:[#allocation4 + $0x11] sm:$0x1] %vm426_vm3, %v504_v62  ;;  %3923 = sst [smem:[#allocation120_spill]] %s2539_s30  ;;  %s3989_s30 = sld [smem:[#allocation65_spill]] }
 0x119   : > { %v533_v7 = vpop.permute.xlu1 %532  ;;  %v513_v8 = vpop.permute.xlu0 %512 }
 0x11a   : > { %v534_v13 = vrot.slane %v533_v7, 1  ;;  %v514_v14 = vrot.slane %v513_v8, 1  ;;  %v3746_v7 = vstv %s3904_s15  ;;  %v3750_v8 = vstv %s3905_s23  ;;  %s3955_s23 = sld [smem:[#allocation46_spill]]  ;;  %s3956_s15 = sld [smem:[#allocation47_spill]] }
 0x11c   : > { %536 = vst.msk [vmem:[#allocation4 + $0x14] sm:$0x1] %vm426_vm3, %v534_v13  ;;  %516 = vst.msk [vmem:[#allocation4 + $0x12] sm:$0x1] %vm426_vm3, %v514_v14  ;;  %v3752_v13 = vstv %s3906_s25  ;;  %v3753_v14 = vstv %s2392_s27  ;;  %s2533_s25 = sld [smem:[#allocation10 + $0x34]]  ;;  %s3974_s27 = sld [smem:[#allocation60_spill]] }
 0x11d   : > { %v563_v25 = vpop.permute.xlu1 %562  ;;  %v543_v26 = vpop.permute.xlu0 %542 }
 0x11e   : > { %v564_v31 = vrot.slane %v563_v25, 1  ;;  %v544_v32 = vrot.slane %v543_v26, 1 }
 0x120   : > { %566 = vst.msk [vmem:[#allocation4 + $0x17] sm:$0x1] %vm426_vm3, %v564_v31  ;;  %546 = vst.msk [vmem:[#allocation4 + $0x15] sm:$0x1] %vm426_vm3, %v544_v32 }
 0x121   : > { %v553_v43 = vpop.permute.xlu0 %552  ;;  %v436_v44 = vpop.permute.xlu1 %435 }
 0x122   : > { %v554_v49 = vrot.slane %v553_v43, 1  ;;  %438 = vst.msk [vmem:[#allocation4 + $0x9] sm:$0x1] %vm426_vm3, %v436_v44  ;;  %3920 = sst [smem:[#allocation119_spill]] %s2533_s25  ;;  %s3986_s25 = sld [smem:[#allocation68_spill]] }
 0x124   : > { %556 = vst.msk [vmem:[#allocation4 + $0x16] sm:$0x1] %vm426_vm3, %v554_v49  ;;  %v3755_v49 = vstv %s2408_s26  ;;  %s4011_s26 = sld [smem:[#allocation76_spill]] }
 0x125   : > { %v449_v61 = vpop.permute.xlu0 %448  ;;  %v457_v62 = vpop.permute.xlu1 %456 }
 0x126   : > { %451 = vst.msk [vmem:[#allocation4 + $0xa] sm:$0x1] %vm426_vm3, %v449_v61  ;;  %459 = vst.msk [vmem:[#allocation4 + $0xb] sm:$0x1] %vm426_vm3, %v457_v62 }
 0x129   : > { %v465_v60 = vpop.permute.xlu0 %464  ;;  %v473_v44 = vpop.permute.xlu1 %472 }
 0x12a   : > { %467 = vst.msk [vmem:[#allocation4 + $0xc] sm:$0x1] %vm426_vm3, %v465_v60  ;;  %475 = vst.msk [vmem:[#allocation4 + $0xd] sm:$0x1] %vm426_vm3, %v473_v44 }
 0x12b   : > { %v2561_v55 = vld [vmem:[#allocation4 + $0x10] sm:$0xff] }
 0x12c   : > { %3932 = vst [vmem:[#allocation122_spill] sm:$0xff] %v2561_v55  ;;  %v2567_v58 = vld [vmem:[#allocation4 + $0x11] sm:$0xff]  ;;  %v2586_v25 = vmul.f32 %v707_v63, %v2561_v55  ;;  %v2609_v54 = vmul.f32 %v713_v3, %v2561_v55  ;;  %v2633_v50 = vmul.f32 %v719_v9, %v2561_v55  ;;  %v2667_v47 = vmul.f32 %v3738_v24, %v2561_v55 }
 0x12d   : > { %v481_v31 = vpop.permute.xlu0 %480  ;;  %v489_v26 = vpop.permute.xlu1 %488  ;;  %v2569_v59 = vld [vmem:[#allocation4 + $0x12] sm:$0xff]  ;;  %v2618_v57 = vmul.f32 %v757_v4, %v2567_v58  ;;  %v2652_v40 = vmul.f32 %v763_v10, %v2567_v58  ;;  %v2672_v39 = vmul.f32 %v3739_v29, %v2567_v58 }
 0x12e   : > { %v2571_v61 = vld [vmem:[#allocation4 + $0x13] sm:$0xff]  ;;  %483 = vst.msk [vmem:[#allocation4 + $0xe] sm:$0x1] %vm426_vm3, %v481_v31  ;;  %491 = vst.msk [vmem:[#allocation4 + $0xf] sm:$0x1] %vm426_vm3, %v489_v26  ;;  %v2594_v26 = vmul.f32 %v751_v0, %v2567_v58  ;;  %v2599_v31 = vmul.f32 %v795_v1, %v2569_v59  ;;  %v2623_v44 = vmul.f32 %v801_v5, %v2569_v59 }
 0x12f   : > { %v2604_v43 = vmul.f32 %v839_v2, %v2571_v61  ;;  %v2628_v46 = vmul.f32 %v845_v6, %v2571_v61  ;;  %v2677_v41 = vmul.f32 %v3742_v30, %v2569_v59  ;;  %v2682_v38 = vmul.f32 %v3745_v56, %v2571_v61 }
 0x131   : > { %v2611_v62 = vld [vmem:[#allocation4 + $0x5] sm:$0xff]  ;;  %v445_v32 = vpop.permute.xlu0 %444  ;;  %v453_v51 = vpop.permute.xlu1 %452 }
 0x132   : > { %v2613_v60 = vld [vmem:[#allocation4 + $0x6] sm:$0xff]  ;;  %447 = vst.msk [vmem:[#allocation4 + $0x29] sm:$0x1] %vm426_vm3, %v445_v32  ;;  %455 = vst.msk [vmem:[#allocation4 + $0x2a] sm:$0x1] %vm426_vm3, %v453_v51  ;;  %v576_v53 = vmul.f32 %v575_v15, %v2611_v62  ;;  %v582_v48 = vmul.f32 %v3756_v17, %v2611_v62  ;;  %v2657_v51 = vmul.f32 %v3747_v11, %v2569_v59 }
 0x133   : > { %v620_v45 = vmul.f32 %v619_v16, %v2613_v60  ;;  %v626_v52 = vmul.f32 %v3754_v18, %v2613_v60  ;;  %v2662_v32 = vmul.f32 %v3737_v12, %v2571_v61  ;;  %v2687_v12 = vmul.f32 %v3746_v7, %v2561_v55 }
 0x134   : > { %v588_v7 = vmul.f32 %v3749_v19, %v2611_v62  ;;  %v632_v42 = vmul.f32 %v3748_v20, %v2613_v60  ;;  %v2724_v20 = vmul.f32 %v3750_v8, %v2567_v58  ;;  %v2739_v19 = vmul.f32 %v3755_v49, %v2561_v55 }
 0x135   : > { %v2689_v24 = vld [vmem:[#allocation4 + $0x7] sm:$0xff]  ;;  %v461_v30 = vpop.permute.xlu0 %460  ;;  %v469_v37 = vpop.permute.xlu1 %468  ;;  %v622_v56 = vadd.f32 %v620_v45, %v576_v53  ;;  %v628_v35 = vadd.f32 %v626_v52, %v582_v48  ;;  %v2701_v11 = vld [vmem:[#allocation4 + $0xf] sm:$0xff] }
 0x136   : > { %v2691_v36 = vld [vmem:[#allocation4 + $0xd] sm:$0xff]  ;;  %463 = vst.msk [vmem:[#allocation4 + $0x2b] sm:$0x1] %vm426_vm3, %v461_v30  ;;  %471 = vst.msk [vmem:[#allocation4 + $0x2c] sm:$0x1] %vm426_vm3, %v469_v37  ;;  %v664_v45 = vmul.f32 %v663_v21, %v2689_v24  ;;  %v670_v48 = vmul.f32 %v3751_v22, %v2689_v24  ;;  %v2729_v30 = vmul.f32 %v3752_v13, %v2569_v59 }
 0x137   : > { %v2693_v29 = vld [vmem:[#allocation4 + $0xe] sm:$0xff]  ;;  %v577_v52 = vmul.f32 %v575_v15, %v2691_v36  ;;  %v2734_v37 = vmul.f32 %v3753_v14, %v2571_v61  ;;  %3963 = vst [vmem:[#allocation124_spill] sm:$0xff] %v2739_v19 }
 0x138   : > { %v2703_v28 = vld [vmem:[#allocation4 + $0x8] sm:$0xff]  ;;  %v621_v53 = vmul.f32 %v619_v16, %v2693_v29  ;;  %v666_v16 = vadd.f32 %v664_v45, %v622_v56  ;;  %v672_v22 = vadd.f32 %v670_v48, %v628_v35  ;;  %v665_v56 = vmul.f32 %v663_v21, %v2701_v11 }
 0x139   : > { %v2705_v27 = vld [vmem:[#allocation4 + $0x9] sm:$0xff]  ;;  %3962 = vst [vmem:[#allocation123_spill] sm:$0xff] %v2734_v37  ;;  %v708_v8 = vmul.f32 %v707_v63, %v2703_v28  ;;  %v714_v13 = vmul.f32 %v713_v3, %v2703_v28  ;;  %v477_v14 = vpop.permute.xlu0 %476  ;;  %v485_v18 = vpop.permute.xlu1 %484  ;;  %v634_v45 = vadd.f32 %v632_v42, %v588_v7  ;;  %v644_v7 = vmul.f32 %v3757_v34, %v2613_v60 }
 0x13a   : > { %v2741_v15 = vld [vmem:[#allocation4 + $0xa] sm:$0xff]  ;;  %v752_v49 = vmul.f32 %v751_v0, %v2705_v27  ;;  %v623_v17 = vadd.f32 %v621_v53, %v577_v52  ;;  %479 = vst.msk [vmem:[#allocation4 + $0x2d] sm:$0x1] %vm426_vm3, %v477_v14  ;;  %487 = vst.msk [vmem:[#allocation4 + $0x2e] sm:$0x1] %vm426_vm3, %v485_v18  ;;  %v758_v48 = vmul.f32 %v757_v4, %v2705_v27 }
 0x13b   : > { %v710_v63 = vadd.f32 %v708_v8, %v666_v16  ;;  %v2757_v3 = vld [vmem:[#allocation4 + $0xb] sm:$0xff]  ;;  %v716_v35 = vadd.f32 %v714_v13, %v672_v22  ;;  %v676_v0 = vmul.f32 %v3759_v23, %v2689_v24  ;;  %v796_v21 = vmul.f32 %v795_v1, %v2741_v15 }
 0x13c   : > { %v667_v42 = vadd.f32 %v665_v56, %v623_v17  ;;  %v600_v18 = vmul.f32 %v3758_v33, %v2611_v62  ;;  %v802_v4 = vmul.f32 %v801_v5, %v2741_v15  ;;  %v840_v1 = vmul.f32 %v839_v2, %v2757_v3 }
 0x13d   : > { %v754_v8 = vadd.f32 %v752_v49, %v710_v63  ;;  %v760_v22 = vadd.f32 %v758_v48, %v716_v35  ;;  %v678_v13 = vadd.f32 %v676_v0, %v634_v45  ;;  %v493_v14 = vpop.permute.xlu0 %492  ;;  %v548_v52 = vpop.permute.xlu1 %547  ;;  %v2780_v17 = vld [vmem:[#allocation4 + $0x25] sm:$0xff]  ;;  %v846_v53 = vmul.f32 %v845_v6, %v2757_v3 }
 0x13e   : > { %v711_v49 = vadd.f32 %v2586_v25, %v667_v42  ;;  %v720_v16 = vmul.f32 %v719_v9, %v2703_v28  ;;  %495 = vst.msk [vmem:[#allocation4 + $0x2f] sm:$0x1] %vm426_vm3, %v493_v14  ;;  %v549_v5 = vrot.slane %v548_v52, 1  ;;  %v764_v2 = vmul.f32 %v763_v10, %v2705_v27 }
 0x13f   : > { %v798_v56 = vadd.f32 %v796_v21, %v754_v8  ;;  %v804_v45 = vadd.f32 %v802_v4, %v760_v22  ;;  %v3970_v6 = vstv %s3945_s8  ;;  %v3971_v48 = vstv %s3946_s0  ;;  %s3976_s0 = sld [smem:[#allocation59_spill]]  ;;  %s3983_s8 = sld [smem:[#allocation64_spill]] }
 0x140   : > { %v755_v63 = vadd.f32 %v2594_v26, %v711_v49  ;;  %v722_v35 = vadd.f32 %v720_v16, %v678_v13  ;;  %v583_v25 = vmul.f32 %v3970_v6, %v2691_v36  ;;  %v627_v9 = vmul.f32 %v3971_v48, %v2693_v29  ;;  %551 = vst.msk [vmem:[#allocation4 + $0x35] sm:$0x1] %vm426_vm3, %v549_v5 }
 0x141   : > { %v842_v0 = vadd.f32 %v840_v1, %v798_v56  ;;  %v3973_v21 = vstv %s3967_s19  ;;  %v848_v10 = vadd.f32 %v846_v53, %v804_v45  ;;  %v646_v8 = vadd.f32 %v644_v7, %v600_v18  ;;  %v558_v22 = vpop.permute.xlu0 %557  ;;  %v568_v26 = vpop.permute.xlu1 %567  ;;  %v2804_v4 = vld [vmem:[#allocation4 + $0x26] sm:$0xff] }
 0x142   : > { %v884_v42 = vmul.f32 %v3973_v21, %v2780_v17  ;;  %v2806_v13 = vld [vmem:[#allocation4 + $0x27] sm:$0xff]  ;;  %v3975_v14 = vstv %s3968_s20  ;;  %v766_v49 = vadd.f32 %v764_v2, %v722_v35  ;;  %v3977_v1 = vstv %s3948_s14  ;;  %s3995_s14 = sld [smem:[#allocation66_spill]] }
 0x143   : > { %v890_v52 = vmul.f32 %v3975_v14, %v2780_v17  ;;  %v808_v16 = vmul.f32 %v3977_v1, %v2741_v15  ;;  %v3978_v5 = vstv %s3969_s5  ;;  %v559_v18 = vrot.slane %v558_v22, 1 }
 0x144   : > { %v688_v53 = vmul.f32 %v3978_v5, %v2689_v24  ;;  %v569_v7 = vrot.slane %v568_v26, 1  ;;  %v886_v56 = vadd.f32 %v884_v42, %v842_v0  ;;  %v3980_v45 = vstv %s3972_s10 }
 0x145   : > { %v928_v6 = vmul.f32 %v3980_v45, %v2804_v4  ;;  %v892_v48 = vadd.f32 %v890_v52, %v848_v10  ;;  %v3982_v21 = vstv %s3974_s27  ;;  %v799_v2 = vadd.f32 %v2599_v31, %v755_v63  ;;  %561 = vst.msk [vmem:[#allocation4 + $0x36] sm:$0x1] %vm426_vm3, %v559_v18  ;;  %v2835_v5 = vld [vmem:[#allocation4 + $0x28] sm:$0xff] }
 0x146   : > { %v934_v14 = vmul.f32 %v3982_v21, %v2804_v4  ;;  %v629_v35 = vadd.f32 %v627_v9, %v583_v25  ;;  %571 = vst.msk [vmem:[#allocation4 + $0x37] sm:$0x1] %vm426_vm3, %v569_v7  ;;  %v3984_v0 = vstv %s3976_s0  ;;  %v3985_v26 = vstv %s3949_s22  ;;  %v2837_v31 = vld [vmem:[#allocation4 + $0x29] sm:$0xff]  ;;  %s3998_s22 = sld [smem:[#allocation70_spill]] }
 0x147   : > { %v930_v22 = vadd.f32 %v928_v6, %v886_v56  ;;  %v972_v42 = vmul.f32 %v3984_v0, %v2806_v13  ;;  %v852_v10 = vmul.f32 %v3985_v26, %v2757_v3  ;;  %v3987_v52 = vstv %s3958_s29  ;;  %s3993_s29 = sld [smem:[#allocation69_spill]]  ;;  %v2848_v0 = vld [vmem:[#allocation4 + $0x2d] sm:$0xff] }
 0x148   : > { %v671_v1 = vmul.f32 %v3987_v52, %v2701_v11  ;;  %v936_v63 = vadd.f32 %v934_v14, %v892_v48  ;;  %v3988_v25 = vstv %s3979_s6  ;;  %v810_v18 = vadd.f32 %v808_v16, %v766_v49  ;;  %v2853_v52 = vld [vmem:[#allocation4 + $0x2a] sm:$0xff] }
 0x149   : > { %v978_v9 = vmul.f32 %v3988_v25, %v2806_v13  ;;  %v3990_v7 = vstv %s3981_s7  ;;  %v974_v45 = vadd.f32 %v972_v42, %v930_v22  ;;  %v3992_v6 = vstv %s3983_s8  ;;  %v2859_v42 = vld [vmem:[#allocation4 + $0x2e] sm:$0xff] }
 0x14a   : > { %v896_v56 = vmul.f32 %v3990_v7, %v2780_v17  ;;  %v1016_v21 = vmul.f32 %v3992_v6, %v2835_v5  ;;  %v690_v26 = vadd.f32 %v688_v53, %v646_v8  ;;  %v3994_v48 = vstv %s3950_s17  ;;  %s4002_s17 = sld [smem:[#allocation67_spill]] }
 0x14b   : > { %v732_v14 = vmul.f32 %v3994_v48, %v2703_v28  ;;  %v980_v49 = vadd.f32 %v978_v9, %v936_v63  ;;  %v3996_v16 = vstv %s3986_s25  ;;  %v843_v22 = vadd.f32 %v2604_v43, %v799_v2  ;;  %v2870_v9 = vld [vmem:[#allocation4 + $0x2b] sm:$0xff] }
 0x14c   : > { %v1022_v25 = vmul.f32 %v3996_v16, %v2835_v5  ;;  %v673_v7 = vadd.f32 %v671_v1, %v629_v35  ;;  %v1018_v6 = vadd.f32 %v1016_v21, %v974_v45  ;;  %v3999_v8 = vstv %s3989_s30 }
 0x14d   : > { %v1060_v53 = vmul.f32 %v3999_v8, %v2837_v31  ;;  %v4000_v48 = vstv %s3967_s19  ;;  %v4001_v33 = vstv %s3991_s24  ;;  %v4003_v43 = vstv %s3993_s29  ;;  %s4006_s19 = sld [smem:[#allocation74_spill]]  ;;  %v2889_v37 = vld [vmem:[#allocation4 + $0x30] sm:$0xff] }
 0x14e   : > { %v885_v34 = vmul.f32 %v4000_v48, %v2848_v0  ;;  %v940_v63 = vmul.f32 %v4001_v33, %v2804_v4  ;;  %v1024_v16 = vadd.f32 %v1022_v25, %v980_v49  ;;  %v1066_v2 = vmul.f32 %v4003_v43, %v2837_v31  ;;  %v2887_v43 = vld [vmem:[#allocation4 + $0x2f] sm:$0xff] }
 0x14f   : > { %v4004_v23 = vstv %s3972_s10  ;;  %v854_v1 = vadd.f32 %v852_v10, %v810_v18  ;;  %v1062_v45 = vadd.f32 %v1060_v53, %v1018_v6  ;;  %v4005_v21 = vstv %s3995_s14  ;;  %s4009_s10 = sld [smem:[#allocation71_spill]] }
 0x150   : > { %v929_v35 = vmul.f32 %v4004_v23, %v2859_v42  ;;  %v1104_v8 = vmul.f32 %v4005_v21, %v2853_v52  ;;  %v887_v48 = vadd.f32 %v885_v34, %v843_v22  ;;  %v4007_v33 = vstv %s3997_s21 }
 0x151   : > { %v984_v55 = vmul.f32 %v4007_v33, %v2806_v13  ;;  %v1068_v19 = vadd.f32 %v1066_v2, %v1024_v16  ;;  %v4008_v49 = vstv %s3998_s22  ;;  %v898_v23 = vadd.f32 %v896_v56, %v854_v1  ;;  %v2898_v2 = vld [vmem:[#allocation4 + $0x31] sm:$0xff] }
 0x152   : > { %v1110_v25 = vmul.f32 %v4008_v49, %v2853_v52  ;;  %v717_v10 = vadd.f32 %v2609_v54, %v673_v7  ;;  %v1106_v18 = vadd.f32 %v1104_v8, %v1062_v45  ;;  %v4010_v6 = vstv %s4002_s17  ;;  %v2906_v49 = vld [vmem:[#allocation4 + $0x32] sm:$0xff] }
 0x153   : > { %v1148_v34 = vmul.f32 %v4010_v6, %v2870_v9  ;;  %v931_v22 = vadd.f32 %v929_v35, %v887_v48  ;;  %v4012_v53 = vstv %s3976_s0  ;;  %v4013_v33 = vstv %s3983_s8  ;;  %s3762_s0 = smov 3   ;;  %s4019_s8 = sld [smem:[#allocation77_spill]] }
 0x154   : > { %v973_v16 = vmul.f32 %v4012_v53, %v2887_v43  ;;  %v1112_v21 = vadd.f32 %v1110_v25, %v1068_v19  ;;  %v1017_v56 = vmul.f32 %v4013_v33, %v2889_v37  ;;  %v4014_v1 = vstv %s4006_s19 }
 0x155   : > { %v1028_v54 = vmul.f32 %v4014_v1, %v2835_v5  ;;  %v734_v7 = vadd.f32 %v732_v14, %v690_v26  ;;  %v1150_v45 = vadd.f32 %v1148_v34, %v1106_v18  ;;  %v942_v35 = vadd.f32 %v940_v63, %v898_v23  ;;  %v2922_v63 = vld [vmem:[#allocation4 + $0x33] sm:$0xff] }
 0x156   : > { %v975_v8 = vadd.f32 %v973_v16, %v931_v22  ;;  %v761_v48 = vadd.f32 %v2618_v57, %v717_v10  ;;  %v4015_v6 = vstv %s4009_s10  ;;  %v4016_v25 = vstv %s3989_s30  ;;  %s4024_s30 = sld [smem:[#allocation84_spill]] }
 0x157   : > { %v1154_v19 = vmul.f32 %v4015_v6, %v2870_v9  ;;  %v1061_v53 = vmul.f32 %v4016_v25, %v2898_v2  ;;  %v4017_v33 = vstv %s4011_s26  ;;  %v4018_v26 = vstv %s3951_s1  ;;  %1188 = vrot.lane.b32.xlu0 %v1150_v45, %s3762_s0  ;;  %s4023_s1 = sld [smem:[#allocation78_spill]]  ;;  %s4025_s0 = sld [smem:[#allocation88_spill]] }
 0x158   : > { %v1072_v1 = vmul.f32 %v4017_v33, %v2837_v31  ;;  %v776_v14 = vmul.f32 %v4018_v26, %v2705_v27  ;;  %v1019_v57 = vadd.f32 %v1017_v56, %v975_v8  ;;  %v986_v23 = vadd.f32 %v984_v55, %v942_v35  ;;  %s4026_s26 = sld [smem:[#allocation92_spill]] }
 0x159   : > { %v805_v10 = vadd.f32 %v2623_v44, %v761_v48  ;;  %v4020_v18 = vstv %s3968_s20  ;;  %v1156_v22 = vadd.f32 %v1154_v19, %v1112_v21  ;;  %v4021_v16 = vstv %s3995_s14  ;;  %s2049_s20 = smov 2   ;;  %s4044_s14 = sld [smem:[#allocation86_spill]] }
 0x15a   : > { %v891_v34 = vmul.f32 %v4020_v18, %v2848_v0  ;;  %v1105_v6 = vmul.f32 %v4021_v16, %v2906_v49  ;;  %v4022_v25 = vstv %s3974_s27  ;;  %v778_v45 = vadd.f32 %v776_v14, %v734_v7  ;;  %s4032_s27 = sld [smem:[#allocation79_spill]] }
 0x15b   : > { %v935_v33 = vmul.f32 %v4022_v25, %v2859_v42  ;;  %v1063_v56 = vadd.f32 %v1061_v53, %v1019_v57  ;;  %v1030_v8 = vadd.f32 %v1028_v54, %v986_v23  ;;  %v849_v55 = vadd.f32 %v2628_v46, %v805_v10  ;;  %1194 = vrot.lane.b32.xlu0 %v1156_v22, %s2049_s20 }
 0x15c   : > { %v4027_v44 = vstv %s3952_s9  ;;  %v4028_v21 = vstv %s4002_s17  ;;  %v4029_v19 = vstv %s4019_s8  ;;  %v4030_v18 = vstv %s3979_s6  ;;  %s4033_s9 = sld [smem:[#allocation80_spill]]  ;;  %s4043_s6 = smov 3  }
 0x15d   : > { %v820_v35 = vmul.f32 %v4027_v44, %v2741_v15  ;;  %v1149_v48 = vmul.f32 %v4028_v21, %v2922_v63  ;;  %v1116_v26 = vmul.f32 %v4029_v19, %v2853_v52  ;;  %v979_v16 = vmul.f32 %v4030_v18, %v2887_v43  ;;  %s2050_s17 = smov 1  }
 0x15e   : > { %v4031_v7 = vstv %s3953_s18  ;;  %v1107_v46 = vadd.f32 %v1105_v6, %v1063_v56  ;;  %v1074_v54 = vadd.f32 %v1072_v1, %v1030_v8  ;;  %v893_v14 = vadd.f32 %v891_v34, %v849_v55  ;;  %s4041_s18 = sld [smem:[#allocation90_spill]] }
 0x15f   : > { %v864_v53 = vmul.f32 %v4031_v7, %v2757_v3  ;;  %v822_v57 = vadd.f32 %v820_v35, %v778_v45  ;;  %v4034_v23 = vstv %s4023_s1  ;;  %v4035_v25 = vstv %s4024_s30 }
 0x160   : > { %v1160_v10 = vmul.f32 %v4034_v23, %v2870_v9  ;;  %v908_v44 = vmul.f32 %v4035_v25, %v2780_v17  ;;  %v4036_v21 = vstv %s4025_s0  ;;  %v4037_v18 = vstv %s4026_s26 }
 0x161   : > { %v952_v19 = vmul.f32 %v4036_v21, %v2804_v4  ;;  %v2963_v7 = vmul.f32 %v4037_v18, %v2567_v58  ;;  %v1151_v22 = vadd.f32 %v1149_v48, %v1107_v46  ;;  %v1118_v1 = vadd.f32 %v1116_v26, %v1074_v54 }
 0x162   : > { %v937_v34 = vadd.f32 %v935_v33, %v893_v14  ;;  %v866_v6 = vadd.f32 %v864_v53, %v822_v57  ;;  %v4038_v45 = vstv %s3955_s23  ;;  %v4039_v8 = vstv %s3956_s15  ;;  %s4046_s23 = sld [smem:[#allocation94_spill]]  ;;  %s4049_s15 = sld [smem:[#allocation87_spill]] }
 0x163   : > { %v589_v56 = vmul.f32 %v4038_v45, %v2691_v36  ;;  %v633_v55 = vmul.f32 %v4039_v8, %v2693_v29  ;;  %v4040_v35 = vstv %s4032_s27  ;;  %v4042_v25 = vstv %s4033_s9  ;;  %1190 = vrot.lane.b32.xlu1 %v1151_v22, %s4043_s6  ;;  %s3171_s6 = sld [smem:[#allocation10 + $0x49]] }
 0x164   : > { %v606_v23 = vmul.f32 %v4040_v35, %v2611_v62  ;;  %v650_v21 = vmul.f32 %v4042_v25, %v2613_v60  ;;  %v1162_v48 = vadd.f32 %v1160_v10, %v1118_v1  ;;  %v981_v33 = vadd.f32 %v979_v16, %v937_v34 }
 0x165   : > { %v4045_v26 = vstv %s3986_s25  ;;  %v910_v46 = vadd.f32 %v908_v44, %v866_v6  ;;  %v4047_v54 = vstv %s3993_s29  ;;  %v635_v57 = vadd.f32 %v633_v55, %v589_v56  ;;  %s4051_s25 = sld [smem:[#allocation89_spill]]  ;;  %s4055_s29 = sld [smem:[#allocation96_spill]] }
 0x166   : > { %v1023_v53 = vmul.f32 %v4045_v26, %v2889_v37  ;;  %v1067_v14 = vmul.f32 %v4047_v54, %v2898_v2  ;;  %v4048_v18 = vstv %s3964_s16  ;;  %v4050_v8 = vstv %s3915_s2  ;;  %1200 = vrot.lane.b32.xlu0 %v1162_v48, %s2050_s17  ;;  %s4054_s16 = sld [smem:[#allocation95_spill]] }
 0x167   : > { %v677_v45 = vmul.f32 %v4048_v18, %v2701_v11  ;;  %v2990_v22 = vmul.f32 %v4050_v8, %v2569_v59  ;;  %v954_v10 = vadd.f32 %v952_v19, %v910_v46  ;;  %v4052_v44 = vstv %s4041_s18 }
 0x168   : > { %v1025_v16 = vadd.f32 %v1023_v53, %v981_v33  ;;  %v996_v1 = vmul.f32 %v4052_v44, %v2806_v13  ;;  %v4053_v34 = vstv %s2424_s28  ;;  %v652_v55 = vadd.f32 %v650_v21, %v606_v23 }
 0x169   : > { %v1040_v6 = vmul.f32 %v4053_v34, %v2835_v5  ;;  %v679_v56 = vadd.f32 %v677_v45, %v635_v57  ;;  %v4056_v35 = vstv %s4044_s14  ;;  %v4057_v26 = vstv %s4046_s23 }
 0x16a   : > { %v694_v25 = vmul.f32 %v4056_v35, %v2689_v24  ;;  %v3005_v48 = vmul.f32 %v4057_v26, %v2571_v61  ;;  %v1069_v19 = vadd.f32 %v1067_v14, %v1025_v16  ;;  %v4058_v33 = vstv %s3998_s22  ;;  %s4064_s22 = sld [smem:[#allocation97_spill]] }
 0x16b   : > { %v1111_v53 = vmul.f32 %v4058_v33, %v2906_v49  ;;  %v998_v46 = vadd.f32 %v996_v1, %v954_v10  ;;  %v4059_v54 = vstv %s4049_s15  ;;  %v723_v23 = vadd.f32 %v2633_v50, %v679_v56 }
 0x16c   : > { %v612_v18 = vmul.f32 %v4059_v54, %v2611_v62  ;;  %v696_v21 = vadd.f32 %v694_v25, %v652_v55  ;;  %v4060_v57 = vstv %s3954_s3  ;;  %v4061_v8 = vstv %s4051_s25  ;;  %s4066_s3 = sld [smem:[#allocation85_spill]] }
 0x16d   : > { %v738_v45 = vmul.f32 %v4060_v57, %v2703_v28  ;;  %v656_v44 = vmul.f32 %v4061_v8, %v2613_v60  ;;  %v1113_v14 = vadd.f32 %v1111_v53, %v1069_v19  ;;  %v4062_v16 = vstv %s4009_s10  ;;  %s4070_s10 = sld [smem:[#allocation98_spill]] }
 0x16e   : > { %v1155_v10 = vmul.f32 %v4062_v16, %v2922_v63  ;;  %v1042_v1 = vadd.f32 %v1040_v6, %v998_v46  ;;  %v4063_v34 = vstv %s4054_s16  ;;  %v4065_v50 = vstv %s4055_s29 }
 0x16f   : > { %v1084_v35 = vmul.f32 %v4063_v34, %v2837_v31  ;;  %v1128_v56 = vmul.f32 %v4065_v50, %v2853_v52  ;;  %v767_v55 = vadd.f32 %v2652_v40, %v723_v23  ;;  %v740_v25 = vadd.f32 %v738_v45, %v696_v21 }
 0x170   : > { %v4067_v26 = vstv %s3959_s11  ;;  %v1157_v19 = vadd.f32 %v1155_v10, %v1113_v14  ;;  %v4068_v6 = vstv %s3981_s7  ;;  %v4069_v54 = vstv %s3960_s13  ;;  %s4073_s11 = sld [smem:[#allocation99_spill]]  ;;  %s4077_s13 = sld [smem:[#allocation76_spill]] }
 0x171   : > { %v782_v33 = vmul.f32 %v4067_v26, %v2705_v27  ;;  %v1086_v53 = vadd.f32 %v1084_v35, %v1042_v1  ;;  %v897_v46 = vmul.f32 %v4068_v6, %v2848_v0  ;;  %v826_v57 = vmul.f32 %v4069_v54, %v2741_v15  ;;  %s4084_s7 = sld [smem:[#allocation102_spill]] }
 0x172   : > { %v811_v8 = vadd.f32 %v2657_v51, %v767_v55  ;;  %v4071_v40 = vstv %s3965_s12  ;;  %v4072_v21 = vstv %s3966_s4  ;;  %1196 = vrot.lane.b32.xlu1 %v1157_v19, %s2049_s20  ;;  %v4074_v10 = vstv %s4064_s22  ;;  %s4078_s4 = sld [smem:[#allocation100_spill]]  ;;  %s4083_s12 = sld [smem:[#allocation101_spill]] }
 0x173   : > { %v784_v16 = vadd.f32 %v782_v33, %v740_v25  ;;  %v601_v23 = vmul.f32 %v4071_v40, %v2691_v36  ;;  %v645_v45 = vmul.f32 %v4072_v21, %v2693_v29  ;;  %v1130_v14 = vadd.f32 %v1128_v56, %v1086_v53  ;;  %s4087_s20 = sld [smem:[#allocation103_spill]] }
 0x174   : > { %v1172_v1 = vmul.f32 %v4074_v10, %v2870_v9  ;;  %v4075_v34 = vstv %s3991_s24  ;;  %v4076_v51 = vstv %s4066_s3  ;;  %v855_v55 = vadd.f32 %v2662_v32, %v811_v8  ;;  %s4086_s24 = sld [smem:[#allocation91_spill]] }
 0x175   : > { %v941_v35 = vmul.f32 %v4075_v34, %v2859_v42  ;;  %v870_v50 = vmul.f32 %v4076_v51, %v2757_v3  ;;  %v828_v25 = vadd.f32 %v826_v57, %v784_v16  ;;  %v647_v26 = vadd.f32 %v645_v45, %v601_v23  ;;  %s3239_s3 = sld [smem:[#allocation10 + $0x50]] }
 0x176   : > { %v4079_v33 = vstv %s3969_s5  ;;  %v1174_v56 = vadd.f32 %v1172_v1, %v1130_v14  ;;  %v4080_v53 = vstv %s3997_s21  ;;  %v4081_v54 = vstv %s4006_s19  ;;  %s2051_s5 = smov 127   ;;  %s4090_s21 = sld [smem:[#allocation104_spill]] }
 0x177   : > { %v689_v19 = vmul.f32 %v4079_v33, %v2701_v11  ;;  %v985_v6 = vmul.f32 %v4080_v53, %v2887_v43  ;;  %v1029_v40 = vmul.f32 %v4081_v54, %v2889_v37  ;;  %v4082_v21 = vstv %s4070_s10  ;;  %s4091_s19 = sld [smem:[#allocation105_spill]] }
 0x178   : > { %v914_v10 = vmul.f32 %v4082_v21, %v2780_v17  ;;  %v899_v32 = vadd.f32 %v897_v46, %v855_v55  ;;  %v872_v57 = vadd.f32 %v870_v50, %v828_v25  ;;  %v4085_v8 = vstv %s4073_s11  ;;  %1206 = vrot.lane.b32.xlu0 %v1174_v56, %s2051_s5 }
 0x179   : > { %v958_v16 = vmul.f32 %v4085_v8, %v2804_v4  ;;  %v691_v23 = vadd.f32 %v689_v19, %v647_v26  ;;  %v4088_v45 = vstv %s4077_s13  ;;  %v4089_v1 = vstv %s4019_s8  ;;  %s4104_s8 = sld [smem:[#allocation107_spill]]  ;;  %s3267_s13 = sld [smem:[#allocation10 + $0x5e]] }
 0x17a   : > { %v1073_v14 = vmul.f32 %v4088_v45, %v2898_v2  ;;  %v1117_v34 = vmul.f32 %v4089_v1, %v2906_v49  ;;  %v658_v51 = vadd.f32 %v656_v44, %v612_v18  ;;  %v4092_v46 = vstv %s4078_s4 }
 0x17b   : > { %v700_v50 = vmul.f32 %v4092_v46, %v2689_v24  ;;  %v943_v55 = vadd.f32 %v941_v35, %v899_v32  ;;  %v4093_v25 = vstv %s4023_s1  ;;  %v916_v33 = vadd.f32 %v914_v10, %v872_v57  ;;  %s4118_s1 = sld [smem:[#allocation116_spill]] }
 0x17c   : > { %v1161_v26 = vmul.f32 %v4093_v25, %v2922_v63  ;;  %v735_v19 = vadd.f32 %v2667_v47, %v691_v23  ;;  %v4094_v56 = vstv %s4083_s12  ;;  %v4095_v54 = vstv %s4084_s7 }
 0x17d   : > { %v1002_v53 = vmul.f32 %v4094_v56, %v2806_v13  ;;  %v1046_v21 = vmul.f32 %v4095_v54, %v2835_v5  ;;  %v702_v18 = vadd.f32 %v700_v50, %v658_v51  ;;  %v4096_v44 = vstv %s4086_s24  ;;  %s3326_s24 = sld [smem:[#allocation11 + $0x13]] }
 0x17e   : > { %v744_v8 = vmul.f32 %v4096_v44, %v2703_v28  ;;  %v987_v35 = vadd.f32 %v985_v6, %v943_v55  ;;  %v960_v32 = vadd.f32 %v958_v16, %v916_v33  ;;  %v4097_v10 = vstv %s4087_s20 }
 0x17f   : > { %v1090_v57 = vmul.f32 %v4097_v10, %v2837_v31  ;;  %v779_v47 = vadd.f32 %v2672_v39, %v735_v19  ;;  %v4098_v23 = vstv %s4090_s21  ;;  %v4099_v1 = vstv %s4091_s19 }
 0x180   : > { %v1134_v45 = vmul.f32 %v4098_v23, %v2853_v52  ;;  %v1178_v46 = vmul.f32 %v4099_v1, %v2870_v9  ;;  %v746_v51 = vadd.f32 %v744_v8, %v702_v18  ;;  %v4100_v50 = vstv %s4026_s26  ;;  %s4106_s26 = sld [smem:[#allocation111_spill]] }
 0x181   : > { %v788_v25 = vmul.f32 %v4100_v50, %v2705_v27  ;;  %v1031_v6 = vadd.f32 %v1029_v40, %v987_v35  ;;  %v1004_v16 = vadd.f32 %v1002_v53, %v960_v32  ;;  %v823_v55 = vadd.f32 %v2677_v41, %v779_v47 }
 0x182   : > { %v4101_v33 = vstv %s4024_s30  ;;  %v4102_v56 = vstv %s3915_s2  ;;  %v4103_v44 = vstv %s4032_s27  ;;  %v4105_v8 = vstv %s4033_s9  ;;  %s4111_s2 = sld [smem:[#allocation113_spill]]  ;;  %s4123_s30 = sld [smem:[#allocation114_spill]] }
 0x183   : > { %v909_v39 = vmul.f32 %v4101_v33, %v2848_v0  ;;  %v790_v19 = vadd.f32 %v788_v25, %v746_v51  ;;  %v832_v54 = vmul.f32 %v4102_v56, %v2741_v15  ;;  %v607_v18 = vmul.f32 %v4103_v44, %v2691_v36  ;;  %s2052_s27 = smov 126   ;;  %s4125_s9 = sld [smem:[#allocation93_spill]] }
 0x184   : > { %v651_v10 = vmul.f32 %v4105_v8, %v2693_v29  ;;  %v1075_v40 = vadd.f32 %v1073_v14, %v1031_v6  ;;  %v1048_v53 = vadd.f32 %v1046_v21, %v1004_v16  ;;  %v867_v41 = vadd.f32 %v2682_v38, %v823_v55 }
 0x185   : > { %v4107_v35 = vstv %s4025_s0  ;;  %v834_v47 = vadd.f32 %v832_v54, %v790_v19  ;;  %v4108_v23 = vstv %s4046_s23  ;;  %v4109_v50 = vstv %s4044_s14  ;;  %s4113_s0 = sld [smem:[#allocation115_spill]]  ;;  %s4132_s14 = sld [smem:[#allocation118_spill]] }
 0x186   : > { %v953_v32 = vmul.f32 %v4107_v35, %v2859_v42  ;;  %v876_v1 = vmul.f32 %v4108_v23, %v2757_v3  ;;  %v653_v51 = vadd.f32 %v651_v10, %v607_v18  ;;  %v695_v25 = vmul.f32 %v4109_v50, %v2701_v11  ;;  %s4134_s23 = sld [smem:[#allocation108_spill]] }
 0x187   : > { %v1119_v33 = vadd.f32 %v1117_v34, %v1075_v40  ;;  %v1092_v56 = vadd.f32 %v1090_v57, %v1048_v53  ;;  %v911_v14 = vadd.f32 %v909_v39, %v867_v41  ;;  %v4110_v21 = vstv %s4041_s18  ;;  %s4128_s18 = sld [smem:[#allocation117_spill]] }
 0x188   : > { %v997_v38 = vmul.f32 %v4110_v21, %v2887_v43  ;;  %v878_v6 = vadd.f32 %v876_v1, %v834_v47  ;;  %v4112_v16 = vstv %s4104_s8  ;;  %v4114_v19 = vstv %s4106_s26 }
 0x189   : > { %v920_v55 = vmul.f32 %v4112_v16, %v2780_v17  ;;  %v964_v54 = vmul.f32 %v4114_v19, %v2804_v4  ;;  %v697_v44 = vadd.f32 %v695_v25, %v653_v51  ;;  %v1163_v18 = vadd.f32 %v1161_v26, %v1119_v33 }
 0x18a   : > { %v1136_v8 = vadd.f32 %v1134_v45, %v1092_v56  ;;  %v955_v10 = vadd.f32 %v953_v32, %v911_v14  ;;  %v4115_v34 = vstv %s2424_s28  ;;  %v4116_v53 = vstv %s4049_s15  ;;  %s4121_s28 = sld [smem:[#allocation106_spill]]  ;;  %s4140_s15 = sld [smem:[#allocation109_spill]] }
 0x18b   : > { %v1041_v57 = vmul.f32 %v4115_v34, %v2889_v37  ;;  %v922_v39 = vadd.f32 %v920_v55, %v878_v6  ;;  %v741_v40 = vadd.f32 %v2687_v12, %v697_v44  ;;  %v613_v41 = vmul.f32 %v4116_v53, %v2691_v36  ;;  %1202 = vrot.lane.b32.xlu1 %v1163_v18, %s2050_s17  ;;  %s4144_s17 = sld [smem:[#allocation110_spill]] }
 0x18c   : > { %v4117_v35 = vstv %s4051_s25  ;;  %v1180_v26 = vadd.f32 %v1178_v46, %v1136_v8  ;;  %v999_v45 = vadd.f32 %v997_v38, %v955_v10  ;;  %v4119_v32 = vstv %s4111_s2  ;;  %s4148_s25 = sld [smem:[#allocation112_spill]] }
 0x18d   : > { %v657_v47 = vmul.f32 %v4117_v35, %v2693_v29  ;;  %v1008_v23 = vmul.f32 %v4119_v32, %v2806_v13  ;;  %v4120_v1 = vstv %s4113_s0  ;;  %v966_v12 = vadd.f32 %v964_v54, %v922_v39  ;;  %v4135_v35 = vld [vmem:[#allocation123_spill] sm:$0xff] }
 0x18e   : > { %v1052_v51 = vmul.f32 %v4120_v1, %v2835_v5  ;;  %v785_v50 = vadd.f32 %v2724_v20, %v741_v40  ;;  %v4122_v33 = vstv %s4078_s4  ;;  %1212 = vrot.lane.b32.xlu0 %v1180_v26, %s2052_s27  ;;  %v1043_v46 = vadd.f32 %v1041_v57, %v999_v45  ;;  %s3318_s4 = sld [smem:[#allocation11 + $0x1]] }
 0x18f   : > { %v659_v25 = vadd.f32 %v657_v47, %v613_v41  ;;  %v701_v56 = vmul.f32 %v4122_v33, %v2701_v11  ;;  %v4124_v14 = vstv %s4054_s16  ;;  %v4126_v38 = vstv %s4055_s29  ;;  %v4136_v47 = vld [vmem:[#allocation124_spill] sm:$0xff]  ;;  %s4153_s16 = sld [smem:[#allocation119_spill]]  ;;  %s2053_s29 = smov 125  }
 0x190   : > { %v1085_v21 = vmul.f32 %v4124_v14, %v2898_v2  ;;  %v1129_v6 = vmul.f32 %v4126_v38, %v2906_v49  ;;  %v4127_v16 = vstv %s4118_s1  ;;  %v1010_v55 = vadd.f32 %v1008_v23, %v966_v12 }
 0x191   : > { %v1096_v20 = vmul.f32 %v4127_v16, %v2837_v31  ;;  %v829_v19 = vadd.f32 %v2729_v30, %v785_v50  ;;  %v4129_v54 = vstv %s4070_s10  ;;  %v703_v18 = vadd.f32 %v701_v56, %v659_v25  ;;  %s3253_s10 = sld [smem:[#allocation10 + $0x57]] }
 0x192   : > { %v915_v44 = vmul.f32 %v4129_v54, %v2848_v0  ;;  %v1087_v8 = vadd.f32 %v1085_v21, %v1043_v46  ;;  %v4130_v10 = vstv %s4073_s11  ;;  %v4131_v57 = vstv %s4121_s28  ;;  %s4161_s11 = sld [smem:[#allocation121_spill]] }
 0x193   : > { %v959_v34 = vmul.f32 %v4130_v10, %v2859_v42  ;;  %v594_v39 = vmul.f32 %v4131_v57, %v2611_v62  ;;  %v4133_v40 = vstv %s4123_s30  ;;  %v1054_v41 = vadd.f32 %v1052_v51, %v1010_v55 }
 0x194   : > { %v638_v53 = vmul.f32 %v4133_v40, %v2613_v60  ;;  %v873_v30 = vadd.f32 %v4135_v35, %v829_v19  ;;  %v747_v26 = vadd.f32 %v4136_v47, %v703_v18  ;;  %v4137_v45 = vstv %s4125_s9 }
 0x195   : > { %v682_v32 = vmul.f32 %v4137_v45, %v2689_v24  ;;  %v1131_v23 = vadd.f32 %v1129_v6, %v1087_v8  ;;  %v4138_v1 = vstv %s4064_s22  ;;  %v4139_v50 = vstv %s4128_s18  ;;  %s4154_s22 = sld [smem:[#allocation120_spill]] }
 0x196   : > { %v1173_v12 = vmul.f32 %v4138_v1, %v2922_v63  ;;  %v1140_v62 = vmul.f32 %v4139_v50, %v2853_v52  ;;  %v640_v25 = vadd.f32 %v638_v53, %v594_v39  ;;  %v1098_v60 = vadd.f32 %v1096_v20, %v1054_v41 }
 0x197   : > { %v917_v51 = vadd.f32 %v915_v44, %v873_v30  ;;  %v4141_v33 = vstv %s4083_s12  ;;  %v791_v46 = vadd.f32 %v2963_v7, %v747_v26  ;;  %v4142_v14 = vstv %s4132_s14  ;;  %s3320_s12 = sld [smem:[#allocation11 + $0xa]] }
 0x198   : > { %v1003_v56 = vmul.f32 %v4141_v33, %v2887_v43  ;;  %v1175_v24 = vadd.f32 %v1173_v12, %v1131_v23  ;;  %v1184_v21 = vmul.f32 %v4142_v14, %v2870_v9  ;;  %v684_v38 = vadd.f32 %v682_v32, %v640_v25 }
 0x199   : > { %v4143_v6 = vstv %s4134_s23  ;;  %v1142_v55 = vadd.f32 %v1140_v62, %v1098_v60  ;;  %v961_v20 = vadd.f32 %v959_v34, %v917_v51  ;;  %v835_v19 = vadd.f32 %v2990_v22, %v791_v46 }
 0x19a   : > { %v726_v16 = vmul.f32 %v4143_v6, %v2703_v28  ;;  %v4145_v54 = vstv %s4104_s8  ;;  %1208 = vrot.lane.b32.xlu1 %v1175_v24, %s2051_s5  ;;  %v4146_v7 = vstv %s4084_s7  ;;  %v4147_v10 = vstv %s4140_s15  ;;  %s3324_s7 = sld [smem:[#allocation11 + $0x4]]  ;;  %s3328_s5 = sld [smem:[#allocation11 + $0xd]] }
 0x19b   : > { %v921_v44 = vmul.f32 %v4145_v54, %v2848_v0  ;;  %v1047_v18 = vmul.f32 %v4146_v7, %v2889_v37  ;;  %v770_v28 = vmul.f32 %v4147_v10, %v2705_v27  ;;  %v1033_v57 = vstv %s3171_s6  ;;  %s3336_s8 = sld [smem:[#allocation11 + $0x3]]  ;;  %s3373_s6 = sld [smem:[#allocation11 + $0xe]] }
 0x19c   : > { %v728_v8 = vadd.f32 %v726_v16, %v684_v38  ;;  %v1186_v39 = vadd.f32 %v1184_v21, %v1142_v55  ;;  %v1005_v34 = vadd.f32 %v1003_v56, %v961_v20  ;;  %v879_v22 = vadd.f32 %v3005_v48, %v835_v19  ;;  %s3390_s15 = sld [smem:[#allocation11 + $0x18]] }
 0x19d   : > { %v4149_v40 = vstv %s4106_s26  ;;  %v4150_v35 = vstv %s4144_s17  ;;  %v4151_v47 = vstv %s4121_s28  ;;  %v4152_v27 = vstv %s4123_s30  ;;  %s3338_s26 = sld [smem:[#allocation11 + $0x6]]  ;;  %s3346_s28 = sld [smem:[#allocation11 + $0x9]] }
 0x19e   : > { %v965_v53 = vmul.f32 %v4149_v40, %v2859_v42  ;;  %v772_v41 = vadd.f32 %v770_v28, %v728_v8  ;;  %v814_v30 = vmul.f32 %v4150_v35, %v2741_v15  ;;  %v595_v26 = vmul.f32 %v4151_v47, %v2691_v36  ;;  %1218 = vrot.lane.b32.xlu0 %v1186_v39, %s2053_s29  ;;  %s3353_s30 = sld [smem:[#allocation11 + $0xb]] }
 0x19f   : > { %v639_v45 = vmul.f32 %v4152_v27, %v2693_v29  ;;  %v1049_v48 = vadd.f32 %v1047_v18, %v1005_v34  ;;  %v4155_v32 = vstv %s4087_s20  ;;  %v923_v1 = vadd.f32 %v921_v44, %v879_v22  ;;  %s3330_s20 = sld [smem:[#allocation11 + $0x16]] }
 0x1a0   : > { %v1091_v23 = vmul.f32 %v4155_v32, %v2898_v2  ;;  %v4156_v12 = vstv %s4111_s2  ;;  %v816_v36 = vadd.f32 %v814_v30, %v772_v41  ;;  %v4157_v50 = vstv %s4148_s25  ;;  %s3340_s2 = sld [smem:[#allocation11 + $0x2]]  ;;  %s3412_s25 = sld [smem:[#allocation11 + $0x7]] }
 0x1a1   : > { %v1009_v15 = vmul.f32 %v4156_v12, %v2887_v43  ;;  %v858_v29 = vmul.f32 %v4157_v50, %v2757_v3  ;;  %v641_v62 = vadd.f32 %v639_v45, %v595_v26  ;;  %v4158_v25 = vstv %s4125_s9  ;;  %s3362_s9 = sld [smem:[#allocation11 + $0x12]] }
 0x1a2   : > { %v683_v60 = vmul.f32 %v4158_v25, %v2701_v11  ;;  %v1093_v51 = vadd.f32 %v1091_v23, %v1049_v48  ;;  %v4159_v33 = vstv %s4090_s21  ;;  %v967_v46 = vadd.f32 %v965_v53, %v923_v1  ;;  %v4163_v11 = vld [vmem:[#allocation122_spill] sm:$0xff]  ;;  %s3332_s21 = sld [smem:[#allocation11 + $0x19]] }
 0x1a3   : > { %v1135_v56 = vmul.f32 %v4159_v33, %v2906_v49  ;;  %v4160_v24 = vstv %s4153_s16  ;;  %v860_v21 = vadd.f32 %v858_v29, %v816_v36  ;;  %v4162_v3 = vstv %s4154_s22  ;;  %s3414_s16 = sld [smem:[#allocation11 + $0x10]]  ;;  %s2054_s22 = smov 6  }
 0x1a4   : > { %v902_v14 = vmul.f32 %v4160_v24, %v2780_v17  ;;  %v946_v38 = vmul.f32 %v4162_v3, %v2804_v4  ;;  %v685_v6 = vadd.f32 %v683_v60, %v641_v62  ;;  %v4164_v16 = vstv %s4134_s23  ;;  %s3388_s23 = sld [smem:[#allocation11 + $0x15]] }
 0x1a5   : > { %v727_v55 = vmul.f32 %v4164_v16, %v4163_v11  ;;  %v1137_v20 = vadd.f32 %v1135_v56, %v1093_v51  ;;  %v4165_v19 = vstv %s4091_s19  ;;  %v1011_v44 = vadd.f32 %v1009_v15, %v967_v46  ;;  %s3334_s19 = sld [smem:[#allocation11]] }
 0x1a6   : > { %v1179_v54 = vmul.f32 %v4165_v19, %v2922_v63  ;;  %v4166_v17 = vstv %s4113_s0  ;;  %v904_v18 = vadd.f32 %v902_v14, %v860_v21  ;;  %v4167_v8 = vmov %v4147_v10  ;;  %s3342_s0 = sld [smem:[#allocation11 + $0x5]] }
 0x1a7   : > { %v1053_v7 = vmul.f32 %v4166_v17, %v2889_v37  ;;  %v729_v4 = vadd.f32 %v727_v55, %v685_v6  ;;  %v771_v10 = vmul.f32 %v4167_v8, %v2567_v58  ;;  %v4168_v34 = vstv %s4118_s1  ;;  %s3344_s1 = sld [smem:[#allocation11 + $0x8]] }
 0x1a8   : > { %v1181_v28 = vadd.f32 %v1179_v54, %v1137_v20  ;;  %v1097_v22 = vmul.f32 %v4168_v34, %v2898_v2  ;;  %v4169_v40 = vstv %s4161_s11  ;;  %v948_v41 = vadd.f32 %v946_v38, %v904_v18  ;;  %s2056_s11 = smov 12  }
 0x1a9   : > { %v1055_v39 = vadd.f32 %v1053_v7, %v1011_v44  ;;  %v990_v53 = vmul.f32 %v4169_v40, %v2806_v13  ;;  %v1034_v35 = vmul.f32 %v1033_v57, %v2835_v5  ;;  %v773_v30 = vadd.f32 %v771_v10, %v729_v4 }
 0x1aa   : > { %v4170_v47 = vstv %s4144_s17  ;;  %1214 = vrot.lane.b32.xlu1 %v1181_v28, %s2052_s27  ;;  %v4171_v27 = vstv %s4128_s18  ;;  %v1077_v48 = vstv %s3239_s3  ;;  %v4172_v23 = vmov %v4157_v50  ;;  %s3360_s27 = sld [smem:[#allocation11 + $0xc]]  ;;  %s3365_s18 = sld [smem:[#allocation11 + $0xf]] }
 0x1ab   : > { %v815_v58 = vmul.f32 %v4170_v47, %v2569_v59  ;;  %v1099_v26 = vadd.f32 %v1097_v22, %v1055_v39  ;;  %v1141_v45 = vmul.f32 %v4171_v27, %v2906_v49  ;;  %v992_v32 = vadd.f32 %v990_v53, %v948_v41  ;;  %v1301_v41 = vld [vmem:[#allocation5 + $0xc] sm:$0xff]  ;;  %s3395_s17 = sld [smem:[#allocation11 + $0x14]]  ;;  %s3473_s3 = sld [smem:[#allocation11 + $0x1a]] }
 0x1ac   : > { %v859_v1 = vmul.f32 %v4172_v23, %v2571_v61  ;;  %v4173_v5 = vmov %v4160_v24  ;;  %v4174_v59 = vstv %s4132_s14  ;;  %v1121_v50 = vstv %s3253_s10  ;;  %v3367_v23 = vld [vmem:[#allocation5 + $0x2a] sm:$0xff]  ;;  %s3375_s14 = sld [smem:[#allocation11 + $0x11]]  ;;  %s2055_s10 = smov 122  }
 0x1ad   : > { %v817_v13 = vadd.f32 %v815_v58, %v773_v30  ;;  %v903_v12 = vmul.f32 %v4173_v5, %v2848_v0  ;;  %v1143_v15 = vadd.f32 %v1141_v45, %v1099_v26  ;;  %v1185_v36 = vmul.f32 %v4174_v59, %v2922_v63  ;;  %v3355_v26 = vld [vmem:[#allocation5 + $0x6] sm:$0xff] }
 0x1ae   : > { %v1036_v29 = vadd.f32 %v1034_v35, %v992_v32  ;;  %v1078_v62 = vmul.f32 %v1077_v48, %v2837_v31  ;;  %v4175_v60 = vmov %v4162_v3  ;;  %v1165_v56 = vstv %s3267_s13  ;;  %s2057_s13 = smov 116  }
 0x1af   : > { %v861_v25 = vadd.f32 %v859_v1, %v817_v13  ;;  %v947_v51 = vmul.f32 %v4175_v60, %v2859_v42  ;;  %v1187_v33 = vadd.f32 %v1185_v36, %v1143_v15  ;;  %v1122_v61 = vmul.f32 %v1121_v50, %v2853_v52 }
 0x1b0   : > { %v1080_v46 = vadd.f32 %v1078_v62, %v1036_v29  ;;  %v4176_v0 = vmov %v4169_v40  ;;  %v1166_v3 = vmul.f32 %v1165_v56, %v2870_v9  ;;  %v1035_v42 = vmul.f32 %v1033_v57, %v2889_v37 }
 0x1b1   : > { %v905_v24 = vadd.f32 %v903_v12, %v861_v25  ;;  %v991_v14 = vmul.f32 %v4176_v0, %v2887_v43  ;;  %1220 = vrot.lane.b32.xlu1 %v1187_v33, %s2053_s29  ;;  %v1079_v16 = vmul.f32 %v1077_v48, %v2898_v2  ;;  %v1123_v52 = vmul.f32 %v1121_v50, %v2906_v49  ;;  %s3460_s29 = sld [smem:[#allocation11 + $0x17]] }
 0x1b2   : > { %v1124_v21 = vadd.f32 %v1122_v61, %v1080_v46  ;;  %v1167_v43 = vmul.f32 %v1165_v56, %v2922_v63  ;;  %v1310_v35 = vstv %s3320_s12  ;;  %v1236_v27 = vstv %s3318_s4  ;;  %s2058_s4 = smov 18   ;;  %s2059_s12 = smov 110  }
 0x1b3   : > { %v949_v38 = vadd.f32 %v947_v51, %v905_v24  ;;  %v1256_v45 = vstv %s3324_s7  ;;  %v1382_v48 = vstv %s3326_s24  ;;  %v1328_v32 = vstv %s3328_s5  ;;  %s418_s7 = sld [smem:[#allocation13]]  ;;  %s1609_s24 = sld [smem:[#allocation13 + $0x1]] }
 0x1b4   : > { %v1168_v31 = vadd.f32 %v1166_v3, %v1124_v21  ;;  %v1311_v1 = vmul.f32 %v1310_v35, %v1301_v41  ;;  %v1400_v5 = vstv %s3330_s20  ;;  %v1420_v12 = vstv %s3332_s21  ;;  %v1340_v3 = vld [vmem:[#allocation5 + $0x2c] sm:$0xff]  ;;  %s1610_s5 = sld [smem:[#allocation13 + $0x2]] }
 0x1b5   : > { %v993_v6 = vadd.f32 %v991_v14, %v949_v38  ;;  %v1383_v50 = vmul.f32 %v1382_v48, %v3355_v26  ;;  %v1421_v51 = vmul.f32 %v1420_v12, %v3367_v23  ;;  %v1230_v56 = vstv %s3334_s19  ;;  %s4177_s19 = sld [smem:[#allocation29_spill]] }
 0x1b6   : > { %v1250_v46 = vstv %s3336_s8  ;;  %v1304_v61 = vstv %s3346_s28  ;;  %v1270_v0 = vstv %s3338_s26  ;;  %v1242_v14 = vstv %s3340_s2  ;;  %s4178_s8 = sld [smem:[#allocation22_spill]] }
 0x1b7   : > { %v1037_v11 = vadd.f32 %v1035_v42, %v993_v6  ;;  %v1262_v21 = vstv %s3342_s0  ;;  %v1316_v38 = vstv %s3353_s30  ;;  %v1322_v6 = vstv %s3360_s27 }
 0x1b8   : > { %v1376_v42 = vstv %s3362_s9  ;;  %s4180_s9 = sld [smem:[#allocation129_spill]] }
 0x1b9   : > { %v1081_v55 = vadd.f32 %v1079_v16, %v1037_v11  ;;  %s420_s20 = sadd.f32 %s1609_s24, %s418_s7 }
 0x1bb   : > { %v1125_v20 = vadd.f32 %v1123_v52, %v1081_v55  ;;  %v1305_v52 = vmul.f32 %v1304_v61, %v1301_v41  ;;  %s422_s21 = sadd.f32 %s1610_s5, %s420_s20  ;;  %s1608_s2 = sshll.u32 %s4177_s19, 4 }
 0x1bc   : > { %s1742_s0 = sshll.u32 %s4178_s8, 8 }
 0x1bd   : > { %v1169_v19 = vadd.f32 %v1167_v43, %v1125_v20  ;;  %v1342_v20 = vstv %s3365_s18  ;;  %v3428_v43 = vld [vmem:[#allocation5 + $0xe] sm:$0xff] }
 0x1be   : > { %s3527_s18 = scalar_lea.hbm %s4180_s9, %s1742_s0 }
 0x1c9   : > { %v1189_v54 = vpop.permute.xlu0 %1188 }
 0x1ca   : > { %v1192_v4 = vadd.f32 %v1189_v54, %v1168_v31  ;;  %v1282_v31 = vstv %s3344_s1  ;;  %v3432_v54 = vmul.f32 %v1316_v38, %v1301_v41  ;;  %v3454_v41 = vld [vmem:[#allocation5 + $0x32] sm:$0xff]  ;;  %s268_s1 = scalar_lea.vmem [#allocation14], %s1608_s2 }
 0x1cb   : > { %s1478_s28 = sshll.u32 %s268_s1, 4  ;;  %s3529_s28 = int_to_ptr.vmem [resolvable:$true] %s1478_s28 }
 0x1cd   : > { %v1195_v44 = vpop.permute.xlu0 %1194 }
 0x1ce   : > { %v1198_v8 = vadd.f32 %v1195_v44, %v1192_v4  ;;  %v1334_v44 = vstv %s3373_s6  ;;  %v1414_v4 = vstv %s3390_s15  ;;  %s1465_s6 = scalar_lea.sflag [#allocation8], %s4177_s19 }
 0x1d5   : > { %v1191_v9 = vpop.permute.xlu1 %1190 }
 0x1d6   : > { %v1193_v63 = vadd.f32 %v1191_v9, %v1169_v19  ;;  %v3430_v19 = vmul.f32 %v1342_v20, %v1340_v3 }
 0x1d8   : > { %v1201_v17 = vpop.permute.xlu0 %1200 }
 0x1d9   : > { %v1204_v37 = vadd.f32 %v1201_v17, %v1198_v8  ;;  %v1354_v17 = vstv %s3375_s14  ;;  %s1943_s14 = scalar_lea.vmem %s3529_s28, 256 }
 0x1da   : > { %v3438_v9 = vmul.f32 %v1354_v17, %v1340_v3  ;;  %p1944_p11 = scmp.ne.s32.totalorder %s3529_s28, %s1943_s14 }
 0x1dc   : > { %p1945_p10 = pnand %p1944_p11, %p2195_p12 }
 0x1de   : > { %p1946_p0 = pneg %p1945_p10 }
 0x1e4   : > { %v1197_v18 = vpop.permute.xlu1 %1196 }
 0x1e5   : > { %v1199_v22 = vadd.f32 %v1197_v18, %v1193_v63  ;;  %v1394_v18 = vstv %s3388_s23  ;;  %s2060_s23 = smov [#allocation14]  }
 0x1e6   : > { %s1947_s15 = sshll.u32 %s2060_s23, 4  ;;  %s1948_s15 = int_to_ptr.vmem [resolvable:$false] %s1947_s15 }
 0x1e7   : > { %p1950_p9 = scmp.lt.s32.totalorder %s3529_s28, %s1948_s15 }
 0x1ea   : > { %v1207_v7 = vpop.permute.xlu0 %1206 }
 0x1eb   : > { %v1210_v28 = vadd.f32 %v1207_v7, %v1204_v37  ;;  %v3441_v7 = vmul.f32 %v1376_v42, %v3355_v26 }
 0x1fd   : > { %v1203_v57 = vpop.permute.xlu1 %1202 }
 0x1fe   : > { %v1205_v53 = vadd.f32 %v1203_v57, %v1199_v22 }
 0x200   : > { %v1213_v10 = vpop.permute.xlu0 %1212 }
 0x201   : > { %v1216_v2 = vadd.f32 %v1213_v10, %v1210_v28 }
 0x20c   : > { %v1209_v34 = vpop.permute.xlu1 %1208 }
 0x20d   : > { %v1211_v30 = vadd.f32 %v1209_v34, %v1205_v53 }
 0x210   : > { %v1219_v39 = vpop.permute.xlu0 %1218 }
 0x211   : > { %v3316_v49 = vadd.f32 %v1219_v39, %v1216_v2  ;;  %v3450_v2 = vmul.f32 %v1376_v42, %v3428_v43  ;;  %v1388_v39 = vstv %s3395_s17  ;;  %s1949_s17 = scalar_lea.vmem %s1948_s15, 512 }
 0x212   : > { %p1951_p3 = scmp.lt.s32.totalorder %s1949_s17, %s1943_s14 }
 0x213   : > { %1225 = vst.msk [vmem:[#allocation5 + $0x18] sm:$0xff] %vm1224_vm4, %v3316_v49 }
 0x214   : > { %p1952_p6 = por %p1951_p3, %p1950_p9 }
 0x216   : > { %p1953_p5 = pnand %p1952_p6, %p1946_p0 }
 0x21a   : > { %v3349_v47 = vld [vmem:[#allocation5 + $0x12] sm:$0xff] }
 0x21b   : > { %v3351_v58 = vld [vmem:[#allocation5 + $0x18] sm:$0xff]  ;;  %v1237_v59 = vmul.f32 %v1236_v27, %v3349_v47  ;;  %v1231_v16 = vmul.f32 %v1230_v56, %v3349_v47  ;;  %v1243_v57 = vmul.f32 %v1242_v14, %v3349_v47  ;;  %v1276_v47 = vstv %s3412_s25 }
 0x21c   : > { %v1215_v40 = vpop.permute.xlu1 %1214  ;;  %v1257_v36 = vmul.f32 %v1256_v45, %v3351_v58  ;;  %v1329_v62 = vmul.f32 %v1328_v32, %v3351_v58  ;;  %v1401_v60 = vmul.f32 %v1400_v5, %v3351_v58  ;;  %v1251_v55 = vmul.f32 %v1250_v46, %v3351_v58 }
 0x21d   : > { %v1217_v13 = vadd.f32 %v1215_v40, %v1211_v30  ;;  %v1263_v28 = vmul.f32 %v1262_v21, %v3351_v58 }
 0x21e   : > { %v3397_v25 = vadd.f32 %v1257_v36, %v1237_v59  ;;  %v3407_v33 = vadd.f32 %v1329_v62, %v1311_v1  ;;  %v1403_v24 = vadd.f32 %v1401_v60, %v1383_v50  ;;  %v1253_v34 = vadd.f32 %v1251_v55, %v1231_v16  ;;  %v1302_v62 = vld [vmem:[#allocation5 + $0x14] sm:$0xff] }
 0x21f   : > { %v1348_v1 = vstv %s3414_s16  ;;  %v1323_v60 = vmul.f32 %v1322_v6, %v3351_v58  ;;  %v1306_v55 = vmul.f32 %v1304_v61, %v1302_v62 }
 0x220   : > { %v3423_v11 = vadd.f32 %v1421_v51, %v1403_v24  ;;  %v1422_v24 = vmul.f32 %v1420_v12, %v3454_v41 }
 0x223   : > { %v1221_v15 = vpop.permute.xlu1 %1220 }
 0x224   : > { %v3386_v29 = vadd.f32 %v1221_v15, %v1217_v13 }
 0x226   : > { %1226 = vst.msk [vmem:[#allocation5 + $0x20] sm:$0xff] %vm1224_vm4, %v3386_v29 }
 0x22d   : > { %v1267_v8 = vld [vmem:[#allocation5 + $0x1e] sm:$0xff]  ;;  %v1268_v53 = vld [vmem:[#allocation5 + $0x26] sm:$0xff] }
 0x22e   : > { %v1228_v10 = vld [vmem:[#allocation5 + $0x1a] sm:$0xff]  ;;  %v1271_v63 = vmul.f32 %v1270_v0, %v1267_v8  ;;  %v1272_v36 = vmul.f32 %v1270_v0, %v1268_v53  ;;  %v1283_v50 = vmul.f32 %v1282_v31, %v1267_v8  ;;  %v1339_v51 = vld [vmem:[#allocation5 + $0x24] sm:$0xff]  ;;  %v1265_v0 = vadd.f32 %v1263_v28, %v1243_v57 }
 0x22f   : > { %v3445_v37 = vld [vmem:[#allocation5 + $0x20] sm:$0xff]  ;;  %v1232_v22 = vmul.f32 %v1230_v56, %v1228_v10  ;;  %v1244_v30 = vmul.f32 %v1242_v14, %v1228_v10  ;;  %v1350_v56 = vmul.f32 %v1348_v1, %v1340_v3  ;;  %v1284_v16 = vmul.f32 %v1282_v31, %v1268_v53 }
 0x230   : > { %v1252_v40 = vmul.f32 %v1250_v46, %v3445_v37  ;;  %v1264_v13 = vmul.f32 %v1262_v21, %v3445_v37  ;;  %v1273_v15 = vadd.f32 %v1271_v63, %v1253_v34  ;;  %v1384_v46 = vmul.f32 %v1382_v48, %v3428_v43 }
 0x231   : > { %v1324_v42 = vmul.f32 %v1322_v6, %v3445_v37  ;;  %v1335_v3 = vmul.f32 %v1334_v44, %v3351_v58  ;;  %v1318_v34 = vmul.f32 %v1316_v38, %v1302_v62  ;;  %v1285_v48 = vadd.f32 %v1283_v50, %v1265_v0 }
 0x232   : > { %v1254_v59 = vadd.f32 %v1252_v40, %v1232_v22  ;;  %1289 = vrot.lane.b32.xlu0 %v1273_v15, %s2054_s22  ;;  %v1266_v21 = vadd.f32 %v1264_v13, %v1244_v30  ;;  %v1343_v63 = vmul.f32 %v1342_v20, %v1339_v51  ;;  %v1277_v22 = vmul.f32 %v1276_v47, %v1267_v8 }
 0x233   : > { %v1238_v12 = vmul.f32 %v1236_v27, %v1228_v10  ;;  %v1325_v40 = vadd.f32 %v1323_v60, %v1305_v52  ;;  %v1336_v57 = vmul.f32 %v1334_v44, %v3445_v37  ;;  %v1258_v61 = vmul.f32 %v1256_v45, %v3445_v37 }
 0x234   : > { %v1274_v14 = vadd.f32 %v1272_v36, %v1254_v59  ;;  %v1312_v38 = vmul.f32 %v1310_v35, %v1302_v62  ;;  %v1286_v31 = vadd.f32 %v1284_v16, %v1266_v21  ;;  %v1326_v6 = vadd.f32 %v1324_v42, %v1306_v55 }
 0x235   : > { %v1279_v20 = vadd.f32 %v1277_v22, %v3397_v25  ;;  %v1349_v27 = vmul.f32 %v1348_v1, %v1339_v51  ;;  %v1260_v52 = vadd.f32 %v1258_v61, %v1238_v12  ;;  %v1278_v8 = vmul.f32 %v1276_v47, %v1268_v53 }
 0x236   : > { %1291 = vrot.lane.b32.xlu1 %v1274_v14, %s2054_s22  ;;  %1295 = vrot.lane.b32.xlu0 %v1285_v48, %s2055_s10  ;;  %v1330_v44 = vmul.f32 %v1328_v32, %v3445_v37  ;;  %v1402_v10 = vmul.f32 %v1400_v5, %v3445_v37  ;;  %v1345_v35 = vadd.f32 %v1343_v63, %v1325_v40  ;;  %v1406_v30 = vstv %s3460_s29 }
 0x237   : > { %v1355_v45 = vmul.f32 %v1354_v17, %v1339_v51  ;;  %v1395_v28 = vmul.f32 %v1394_v18, %v3351_v58  ;;  %v1351_v25 = vadd.f32 %v1349_v27, %v3407_v33  ;;  %v1280_v53 = vadd.f32 %v1278_v8, %v1260_v52 }
 0x238   : > { %v1332_v13 = vadd.f32 %v1330_v44, %v1312_v38  ;;  %v1404_v32 = vadd.f32 %v1402_v10, %v1384_v46  ;;  %v1346_v5 = vadd.f32 %v3430_v19, %v1326_v6  ;;  %v1337_v47 = vadd.f32 %v1335_v3, %v3432_v54 }
 0x239   : > { %v1338_v1 = vadd.f32 %v1336_v57, %v1318_v34  ;;  %v1396_v17 = vmul.f32 %v1394_v18, %v3445_v37  ;;  %v1415_v33 = vmul.f32 %v1414_v4, %v3367_v23  ;;  %v1397_v50 = vadd.f32 %v1395_v28, %v3441_v7 }
 0x23a   : > { %1297 = vrot.lane.b32.xlu1 %v1286_v31, %s2055_s10  ;;  %1361 = vrot.lane.b32.xlu0 %v1345_v35, %s2056_s11  ;;  %v1352_v15 = vadd.f32 %v1350_v56, %v1332_v13  ;;  %v1424_v59 = vadd.f32 %v1422_v24, %v1404_v32  ;;  %v1357_v36 = vadd.f32 %v1355_v45, %v1337_v47  ;;  %v1426_v60 = vstv %s3473_s3 }
 0x23b   : > { %v1389_v62 = vmul.f32 %v1388_v39, %v3355_v26  ;;  %v1407_v19 = vmul.f32 %v1406_v30, %v3351_v58  ;;  %v1416_v54 = vmul.f32 %v1414_v4, %v3454_v41  ;;  %v1358_v18 = vadd.f32 %v3438_v9, %v1338_v1 }
 0x23c   : > { %v1398_v51 = vadd.f32 %v1396_v17, %v3450_v2  ;;  %v1390_v56 = vmul.f32 %v1388_v39, %v3428_v43  ;;  %v1408_v7 = vmul.f32 %v1406_v30, %v3445_v37  ;;  %v1417_v46 = vadd.f32 %v1415_v33, %v1397_v50 }
 0x23d   : > { %v1409_v26 = vadd.f32 %v1407_v19, %v1389_v62  ;;  %v1427_v58 = vmul.f32 %v1426_v60, %v3367_v23  ;;  %v1428_v14 = vmul.f32 %v1426_v60, %v3454_v41  ;;  %v1447_v44 = vstv %s422_s21 }
 0x23e   : > { %1363 = vrot.lane.b32.xlu1 %v1346_v5, %s2056_s11  ;;  %1367 = vrot.lane.b32.xlu0 %v1357_v36, %s2057_s13  ;;  %v1418_v4 = vadd.f32 %v1416_v54, %v1398_v51  ;;  %v1410_v24 = vadd.f32 %v1408_v7, %v1390_v56 }
 0x23f   : > { %v1429_v9 = vadd.f32 %v1427_v58, %v1409_v26 }
 0x240   : > { %v1430_v2 = vadd.f32 %v1428_v14, %v1410_v24 }
 0x242   : > { %1369 = vrot.lane.b32.xlu1 %v1358_v18, %s2057_s13  ;;  %1433 = vrot.lane.b32.xlu0 %v1417_v46, %s2058_s4 }
 0x246   : > { %1435 = vrot.lane.b32.xlu1 %v1418_v4, %s2058_s4  ;;  %1439 = vrot.lane.b32.xlu0 %v1429_v9, %s2059_s12 }
 0x24a   : > { %1441 = vrot.lane.b32.xlu1 %v1430_v2, %s2059_s12 }
 0x2a4   : > { %v1290_v43 = vpop.permute.xlu0 %1289 }
 0x2a5   : > { %v1293_v37 = vadd.f32 %v1290_v43, %v1279_v20 }
 0x2a8   : > { %v1292_v39 = vpop.permute.xlu1 %1291  ;;  %v1296_v0 = vpop.permute.xlu0 %1295 }
 0x2a9   : > { %v1294_v21 = vadd.f32 %v1292_v39, %v1280_v53  ;;  %v1299_v42 = vadd.f32 %v1296_v0, %v1293_v37 }
 0x2ab   : > { %v1359_v55 = vadd.f32 %v1351_v25, %v1299_v42 }
 0x2ac   : > { %v1298_v16 = vpop.permute.xlu1 %1297  ;;  %v1362_v3 = vpop.permute.xlu0 %1361 }
 0x2ad   : > { %v1300_v23 = vadd.f32 %v1298_v16, %v1294_v21  ;;  %v1365_v48 = vadd.f32 %v1362_v3, %v1359_v55 }
 0x2af   : > { %v1360_v34 = vadd.f32 %v1352_v15, %v1300_v23 }
 0x2b0   : > { %v1364_v41 = vpop.permute.xlu1 %1363  ;;  %v1368_v63 = vpop.permute.xlu0 %1367 }
 0x2b1   : > { %v1366_v22 = vadd.f32 %v1364_v41, %v1360_v34  ;;  %v1371_v12 = vadd.f32 %v1368_v63, %v1365_v48 }
 0x2b3   : > { %v1431_v61 = vadd.f32 %v3423_v11, %v1371_v12 }
 0x2b4   : > { %v1370_v40 = vpop.permute.xlu1 %1369  ;;  %v1434_v38 = vpop.permute.xlu0 %1433 }
 0x2b5   : > { %v1372_v57 = vadd.f32 %v1370_v40, %v1366_v22  ;;  %v1437_v20 = vadd.f32 %v1434_v38, %v1431_v61 }
 0x2b7   : > { %v1432_v31 = vadd.f32 %v1424_v59, %v1372_v57 }
 0x2b8   : > { %v1436_v6 = vpop.permute.xlu1 %1435  ;;  %v1440_v27 = vpop.permute.xlu0 %1439 }
 0x2b9   : > { %v1438_v52 = vadd.f32 %v1436_v6, %v1432_v31  ;;  %v1443_v8 = vadd.f32 %v1440_v27, %v1437_v20 }
 0x2bb   : > { %v1445_v35 = vadd.f32 %v1443_v8, %v3316_v49 }
 0x2bc   : > { %v1442_v10 = vpop.permute.xlu1 %1441 }
 0x2bd   : > { %v1444_v45 = vadd.f32 %v1442_v10, %v1438_v52  ;;  %v1448_v28 = vadd.f32 %v1447_v44, %v1445_v35 }
 0x2bf   : > { %v1446_v25 = vadd.f32 %v1444_v45, %v3386_v29  ;;  %v1734_v30 = vmul.f32 -1.442695, %v1448_v28 }
 0x2c1   : > { %v1449_v11 = vadd.f32 %v1447_v44, %v1446_v25  ;;  %1860 = vpow2.f32 %v1734_v30 }
 0x2c3   : > { %v1735_v53 = vmul.f32 -1.442695, %v1449_v11 }
 0x2c5   : > { %1862 = vpow2.f32 %v1735_v53 }
 0x2cb   : > { %v1861_v13 = vpop.eup %1860 }
 0x2cc   : > { %v1456_v32 = vadd.f32 1.0, %v1861_v13 }
 0x2ce   : > { %1864 = vrcp.f32 %v1456_v32 }
 0x2cf   : > { %v1863_v5 = vpop.eup %1862 }
 0x2d0   : > { %v1457_v47 = vadd.f32 1.0, %v1863_v5 }
 0x2d2   : > { %1866 = vrcp.f32 %v1457_v47 }
 0x2d8   : > { %v1865_v49 = vpop.eup %1864 }
 0x2d9   : > { %1462 = vst.msk [vmem:[%s268_s1] sm:$0xff] %vm1224_vm4, %v1865_v49 }
 0x2dc   : > { %v1867_v29 = vpop.eup %1866 }
 0x2dd   : > { %1463 = vst.msk [vmem:[%s268_s1 + $0x8] sm:$0xff] %vm1224_vm4, %v1867_v29 }
 0x2de   : > { %1956 = shalt.err (!%p1953_p5)
}
 0x2df   : > { %s1957_s25 = scalar_lea.hbm %s3527_s18, 256  ;;  %s1961_s22 = scalar_lea.hbm %s4180_s9, 512 }
 0x2e0   : > { %p1958_p4 = scmp.ne.s32.totalorder %s3527_s18, %s1957_s25  ;;  %p1962_p2 = scmp.lt.u32.totalorder %s3527_s18, %s4180_s9 }
 0x2e1   : > { %p1963_p1 = scmp.lt.u32.totalorder %s1961_s22, %s1957_s25  ;;  %p1965_p11 = scmp.lt.u32.totalorder %s1957_s25, %s3527_s18 }
 0x2e2   : > { %p1959_p8 = pnand %p1958_p4, %p2195_p12 }
 0x2e3   : > { %p1964_p7 = por %p1963_p1, %p1962_p2 }
 0x2e4   : > { %p1960_p13 = pneg %p1959_p8 }
 0x2e5   : > { %p1966_p10 = por %p1965_p11, %p1964_p7 }
 0x2e7   : > { %p1967_p0 = pnand %p1966_p10, %p1960_p13 }
 0x2e9   : > { %1970 = shalt.err (!%p1967_p0)
}
 0x2ea   : > { %s2061_s11 = smov 128   ;;  %s2062_s13 = smov 8  }
 0x2eb   : > { %1757 = dma.vmem_to_hbm [thread:$0]  (%p2195_p12), %s3529_s28, 256, %s3527_s18, %s1465_s6, %s2061_s11, %s2061_s11, %s2062_s13  }
 0x2ec PF: > { %s4181_s4 = sld [smem:[#allocation19_spill]]  ;;  %s4182_s12 = sld [smem:[#allocation25_spill]] }
 0x2ed   : > { %s4183_s7 = sld [smem:[#allocation24_spill]] }
 0x2f2   : > { %s1493_s24 = sand.u32 1, %s4181_s4   ;;  %p4184_p9 = scmp.ne.s32.totalorder %s4182_s12, 0 }
 0x2f3   : > { %p4185_p3 = scmp.ge.s32.totalorder %s4183_s7, 2  ;;  %s1494_s5 = scalar_lea.sflag [#allocation8], %s1493_s24 }
 0x2f5   : > { %p1774_p6 = pnand %p4185_p3, %p4184_p9 }
 0x2f7   : > { %2008 = dma.done.wait (!%p1774_p6), %s1494_s5, 256  }
 0x2f8   : > { %2010 = vsyncadd (!%p1774_p6), %s1494_s5, 4294967040  ;;  %s22_s20 = sadd.s32 1, %s4183_s7   ;;  %s4186_s15 = sld [smem:[#allocation20_spill]] }
 0x2f9   : > { %p19_p5 = scmp.ge.s32.totalorder %s22_s20, 4   ;;  %s4187_s16 = sld [smem:[#allocation21_spill]] }
 0x2fa   : > { %s4188_s17 = sld [smem:[#allocation28_spill]]  ;;  %s4189_s18 = sld [smem:[#allocation23_spill]] }
 0x2fb   : > { %s4190_s19 = sld [smem:[#allocation27_spill]]  ;;  %21 = sbr.rel (!%p19_p5) target bundleno = 14 (0xe), region = 107 }
 0x302   :  { %1499 = vsyncpa [#allocation7], 1 }
 0x303   :  { %1501 = vsyncpa [#allocation7 + $0x1], 1 }
 0x304   :  { %1502 = vsyncpa [#allocation8], 1 }
 0x305   :  { %1504 = vsyncpa [#allocation8 + $0x1], 1 }
 0x306   :  { %1505 = vsyncpa [#allocation9], 1 }
 0x307   :  { %1507 = vsyncpa [#allocation9 + $0x1], 1 }
 0x308   :  { %1508 = vsyncpa [#allocation12], 1 }

</bundles_post_ra>
